<compile_context>
chip_gen: v7x
topology: tpu7x:2x2x1
jax: 0.10.0
libtpu: 0.0.40
codegen_flags: <defaults>
</compile_context>

<pallas_src>
import numpy as np

import jax
import jax.numpy as jnp
from jax.experimental import pallas as pl
from jax.experimental.pallas import tpu as pltpu

# ----------------------------- model dimensions ------------------------------
B = 2                  # batch
CIN = 3                # image channels
IMG = 32               # image height/width (small-scale analog of 224)
PATCH = 4              # Swin patch size
C0 = 32                # base embed dim (feature_extractor.embed_dim analog)
EMBED_DIM = C0
NUM_CLASSES = 10
NUM_HEADS = 2
N_UNSUP = 4
N_CONCEPTS = 4
N_SPATIAL = 4
HP = IMG // PATCH                          # patch-grid side (8 -> 3 merges)
KDIM = CIN * PATCH * PATCH                 # unfolded patch length (48)
POOL_IN = (HP // 8) ** 2 * 8               # analog of 7*7*8 = 392  -> 8
POOL_OUT = 16                              # analog of self.patch_size = 14*14
N_BRANCH = 3

assert HP == 8, "toy backbone assumes an 8x8 patch grid (3 merges)"
assert 8 * C0 == POOL_IN * EMBED_DIM, "num_features must reshape into tokens"
assert N_UNSUP == N_CONCEPTS == N_SPATIAL, "branch stacking assumes equal slot counts"
NSLOTS = N_CONCEPTS


# ------------------ hierarchical (quadtree) patch ordering -------------------
def _hier_perm(hp):
    """Permutation: row-major patch index -> quadtree-digit layout.

    Output row r has digits (d_fine, d_mid, d_coarse) = (r//16, (r//4)%4, r%4)
    with child code d = (i%2) + 2*(j%2) (the PyTorch PatchMerging concat
    order), so every merge stage reads 4 *contiguous* row blocks whose lane
    concat reproduces the reference [x0|x1|x2|x3] feature concat.
    """
    pos = np.zeros((hp, hp), np.int64)
    for i in range(hp):
        for j in range(hp):
            ii, jj, code, n = i, j, 0, hp
            while n > 1:
                n //= 2
                code += ((ii % 2) + 2 * (jj % 2)) * n * n
                ii //= 2
                jj //= 2
            pos[i, j] = code
    return np.argsort(pos.reshape(-1)).astype(np.int32)


def _build_flat_gather_idx():
    """Single flat gather: raw NCHW image -> hierarchically ordered patches."""
    perm = _hier_perm(HP)
    idx = np.empty((HP * HP, KDIM), np.int32)
    for r in range(HP * HP):
        p = int(perm[r])
        i, j = divmod(p, HP)
        kk = 0
        for c in range(CIN):
            for dy in range(PATCH):
                for dx in range(PATCH):
                    idx[r, kk] = c * IMG * IMG + (i * PATCH + dy) * IMG + (j * PATCH + dx)
                    kk += 1
    return idx.reshape(-1)


_FLAT_GATHER_IDX = _build_flat_gather_idx()


# ------------------------------ fused kernel ---------------------------------
def _fused_kernel(patch_ref,
                  pe_w_ref, pe_b_ref, pe_g_ref, pe_bt_ref,
                  m1g_ref, m1b_ref, m1w_ref,
                  m2g_ref, m2b_ref, m2w_ref,
                  m3g_ref, m3b_ref, m3w_ref,
                  fng_ref, fnb_ref, poolw_ref, poolb_ref,
                  ln_ref, qkv_ref, slots_ref, gruw_ref, grub_ref,
                  mlpw_ref, mlpb_ref, pos_ref, wq_ref, wkv_ref,
                  wp_ref, bp_ref,
                  out_ref, attn_ref):
    f32 = jnp.float32
    D = EMBED_DIM
    hd = D // NUM_HEADS

    def ln2(v, g, b):
        m = jnp.mean(v, axis=-1, keepdims=True)
        var = jnp.mean((v - m) ** 2, axis=-1, keepdims=True)
        return (v - m) * jax.lax.rsqrt(var + 1e-5) * g + b

    def softmax_last(v):
        m = jnp.max(v, axis=-1, keepdims=True)
        e = jnp.exp(v - m)
        return e / jnp.sum(e, axis=-1, keepdims=True)     # exact divide (parity)

    def merge(x, g, b, w):
        # PatchMerging: lane-concat of the 4 quadtree row blocks, LayerNorm(4C),
        # then ONE (n, 4C) x (4C, 2C) MXU matmul (full-K contraction).
        n4 = x.shape[0] // 4
        cat = jnp.concatenate([x[m * n4:(m + 1) * n4, :] for m in range(4)],
                              axis=-1)
        return jnp.dot(ln2(cat, g, b), w, preferred_element_type=f32)

    # -------------------------------- backbone --------------------------------
    # patch embed: Conv2d(k=PATCH, s=PATCH) as one matmul + LayerNorm
    h0 = ln2(jnp.dot(patch_ref[...], pe_w_ref[...],
                     preferred_element_type=f32) + pe_b_ref[...],
             pe_g_ref[...], pe_bt_ref[...])                       # (64, C0)

    # TODO(synk): pretrained Swin window-attention blocks inside each stage are
    # omitted; only the stage-boundary PatchMerging (LayerNorm(4C)+4C->2C) is kept.
    y1 = merge(h0, m1g_ref[...], m1b_ref[...], m1w_ref[...])      # (16, 2*C0)
    y2 = merge(y1, m2g_ref[...], m2b_ref[...], m2w_ref[...])      # (4, 4*C0)
    y3 = merge(y2, m3g_ref[...], m3b_ref[...], m3w_ref[...])      # (1, 8*C0)

    f = ln2(y3, fng_ref[...], fnb_ref[...])                       # (1, 8*C0)

    # input_pool_nn: view (1, 8*C0) as (POOL_IN, EMBED_DIM) tokens, then
    # Linear(POOL_IN -> POOL_OUT) over the token axis == ONE MXU matmul.
    f_tok = jnp.concatenate(
        [f[:, j * EMBED_DIM:(j + 1) * EMBED_DIM] for j in range(POOL_IN)],
        axis=0)                                                   # (POOL_IN, D)
    # pool bias is per output position, broadcast over embed dim (matches
    # nn.Linear applied on the transposed sequence axis).
    x = jnp.dot(poolw_ref[...], f_tok,
                preferred_element_type=f32) + poolb_ref[...]      # (POOL_OUT, D)

    # ------------------------------- classifier -------------------------------
    scale_sa = D ** -0.5
    scale_ca = hd ** -0.5
    eps_w = 1e-8

    for br in range(N_BRANCH):                                    # static unroll
        lnp = ln_ref[br]                                          # (6, D)
        slots_prev = slots_ref[br]                                # (S, D)
        grub = grub_ref[br]                                       # (2, 3D)
        mlpb = mlpb_ref[br]                                       # (2, D)

        # ---- ConceptSlotAttention (num_iterations = 1) ----
        xn = ln2(x, lnp[0:1, :], lnp[1:2, :])                     # norm_inputs
        k = jnp.dot(xn, qkv_ref[br, 1], preferred_element_type=f32)
        v = jnp.dot(xn, qkv_ref[br, 2], preferred_element_type=f32)

        # TODO(synk): reference samples slots ~ N(mu, sigma)*noise; a
        # deterministic learned initial slot tensor is used instead.
        sn = ln2(slots_prev, lnp[2:3, :], lnp[3:4, :])            # norm_slots
        q = jnp.dot(sn, qkv_ref[br, 0], preferred_element_type=f32)

        logits = jnp.einsum('nd,sd->ns', k, q,
                            preferred_element_type=f32) * scale_sa  # (N, S)
        attn = softmax_last(logits)                               # softmax over slots
        wts = attn + eps_w
        wts = wts / jnp.sum(wts, axis=0, keepdims=True)           # renorm over tokens
        updates = jnp.einsum('ns,nd->sd', wts, v,
                             preferred_element_type=f32)          # (S, D)

        # GRUCell(updates, slots_prev), PyTorch gate order (r, z, n)
        gi = jnp.dot(updates, gruw_ref[br, 0],
                     preferred_element_type=f32) + grub[0:1, :]
        gh = jnp.dot(slots_prev, gruw_ref[br, 1],
                     preferred_element_type=f32) + grub[1:2, :]
        r = jax.nn.sigmoid(gi[:, 0:D] + gh[:, 0:D])
        z = jax.nn.sigmoid(gi[:, D:2 * D] + gh[:, D:2 * D])
        n_g = jnp.tanh(gi[:, 2 * D:3 * D] + r * gh[:, 2 * D:3 * D])
        slots = (1.0 - z) * n_g + z * slots_prev

        # residual MLP on LayerNorm(slots)
        sm = ln2(slots, lnp[4:5, :], lnp[5:6, :])                 # norm_mlp
        h1 = jax.nn.relu(jnp.dot(sm, mlpw_ref[br, 0],
                                 preferred_element_type=f32) + mlpb[0:1, :])
        slots = slots + jnp.dot(h1, mlpw_ref[br, 1],
                                preferred_element_type=f32) + mlpb[1:2, :]

        # slot positional embedding: concepts += slot_pos.view(-1, S, D)
        slots = slots + pos_ref[br]

        # ---- CrossAttention ----
        qx = jnp.dot(x, wq_ref[br], preferred_element_type=f32)       # (N, D)
        kv = jnp.dot(slots, wkv_ref[br], preferred_element_type=f32)  # (S, 2D)
        kx = kv[:, 0:D]
        vx = kv[:, D:2 * D]

        attn_mean = jnp.zeros((POOL_OUT, NSLOTS), f32)
        heads = []
        for h in range(NUM_HEADS):                                # static unroll
            sl = slice(h * hd, (h + 1) * hd)
            lg = jnp.einsum('nd,sd->ns', qx[:, sl], kx[:, sl],
                            preferred_element_type=f32) * scale_ca
            ah = softmax_last(lg)                                 # (N, S)
            attn_mean = attn_mean + ah * (1.0 / NUM_HEADS)        # head-mean
            heads.append(jnp.einsum('ns,sd->nd', ah, vx[:, sl],
                                    preferred_element_type=f32))  # (N, hd)
        o_cat = jnp.concatenate(heads, axis=-1)                   # (N, D)
        tok_logits = jnp.dot(o_cat, wp_ref[br],
                             preferred_element_type=f32) + bp_ref[br]  # (N, C)

        out_ref[br:br + 1, :] = jnp.mean(tok_logits, axis=0, keepdims=True)
        attn_ref[br, :, :] = attn_mean


# --------------------------------- parameters --------------------------------
def _w(key, shape, scale=0.02):
    return jax.random.normal(key, shape, jnp.float32) * scale


def init_slot_attention_params(key, D, S):
    k = jax.random.split(key, 4)
    ln = jnp.concatenate(
        [jnp.ones((1, D)), jnp.zeros((1, D)),   # norm_inputs
         jnp.ones((1, D)), jnp.zeros((1, D)),   # norm_slots
         jnp.ones((1, D)), jnp.zeros((1, D))],  # norm_mlp
        axis=0)                                  # (6, D)
    return dict(
        ln=ln,
        qkv_w=_w(k[0], (3, D, D)),               # [q, k, v] projections (bias-free)
        slots_init=_w(k[1], (S, D), 1.0),
        gru_w=_w(k[2], (2, D, 3 * D)),           # [W_ih^T, W_hh^T], gates (r, z, n)
        gru_b=jnp.zeros((2, 3 * D)),
        mlp_w=_w(k[3], (2, D, D)),
        mlp_b=jnp.zeros((2, D)),
    )


def init_cross_attention_params(key, D, n_out):
    k = jax.random.split(key, 3)
    return dict(
        wq=_w(k[0], (D, D)),
        wkv=_w(k[1], (D, 2 * D)),
        wp=_w(k[2], (D, n_out)),
        bp=jnp.zeros((1, n_out)),
    )


def init_params(key):
    keys = jax.random.split(key, 12)
    p = {}
    # patch_embed: Conv2d(CIN, C0, k=PATCH, s=PATCH) + LayerNorm(C0)
    p["pe_w"] = _w(keys[0], (KDIM, C0))
    p["pe_b"] = jnp.zeros((1, C0))
    p["pe_ln_g"] = jnp.ones((1, C0))
    p["pe_ln_b"] = jnp.zeros((1, C0))
    # three Swin patch-merging stages: LayerNorm(4C) + bias-free Linear(4C->2C),
    # stored directly as (1, 4C) LN params and a single (4C, 2C) weight.
    merges = []
    for i in range(3):
        ci = C0 * (2 ** i)
        merges.append(dict(
            ln_g=jnp.ones((1, 4 * ci)),
            ln_b=jnp.zeros((1, 4 * ci)),
            w=_w(keys[1 + i], (4 * ci, 2 * ci)),
        ))
    p["merges"] = merges
    cf = 8 * C0
    p["norm_g"] = jnp.ones((1, cf))
    p["norm_b"] = jnp.zeros((1, cf))
    # input_pool_nn: Linear(POOL_IN, POOL_OUT), stored transposed + column bias
    p["pool_wt"] = _w(keys[4], (POOL_OUT, POOL_IN))
    p["pool_b"] = jnp.zeros((POOL_OUT, 1))
    # classifier (CoceptCentricTransformerSwinSA)
    p["unsup_sa"] = init_slot_attention_params(keys[5], EMBED_DIM, N_UNSUP)
    p["concept_sa"] = init_slot_attention_params(keys[6], EMBED_DIM, N_CONCEPTS)
    p["spatial_sa"] = init_slot_attention_params(keys[7], EMBED_DIM, N_SPATIAL)
    p["unsup_ca"] = init_cross_attention_params(keys[8], EMBED_DIM, NUM_CLASSES)   # created but unused (as in reference forward)
    p["concept_ca"] = init_cross_attention_params(keys[9], EMBED_DIM, NUM_CLASSES)
    p["spatial_ca"] = init_cross_attention_params(keys[10], EMBED_DIM, NUM_CLASSES)
    p["unsup_slot_pos"] = jnp.zeros((1, 1, N_UNSUP * EMBED_DIM))
    p["concept_slot_pos"] = jnp.zeros((1, 1, N_CONCEPTS * EMBED_DIM))
    p["spatial_slot_pos"] = jnp.zeros((1, 1, N_SPATIAL * EMBED_DIM))
    return p


def _stack_branch_params(p):
    """Stack the three branches' weights with a leading branch axis (size 3)."""
    sas = [p["unsup_sa"], p["concept_sa"], p["spatial_sa"]]
    # NOTE: the unsup branch reuses concept_ca, reproducing the reference
    # forward (it calls self.concept_tranformer for the unsup concepts).
    cas = [p["concept_ca"], p["concept_ca"], p["spatial_ca"]]
    poss = [p["unsup_slot_pos"], p["concept_slot_pos"], p["spatial_slot_pos"]]
    nslots = [N_UNSUP, N_CONCEPTS, N_SPATIAL]

    def st(key, group):
        return jnp.stack([g[key] for g in group], axis=0)

    return dict(
        ln=st("ln", sas), qkv=st("qkv_w", sas), slots=st("slots_init", sas),
        gru_w=st("gru_w", sas), gru_b=st("gru_b", sas),
        mlp_w=st("mlp_w", sas), mlp_b=st("mlp_b", sas),
        pos=jnp.stack([ps.reshape(ns, EMBED_DIM)
                       for ps, ns in zip(poss, nslots)], axis=0),
        wq=st("wq", cas), wkv=st("wkv", cas), wp=st("wp", cas), bp=st("bp", cas),
    )


# ----------------------------------- forward ---------------------------------
def slot_cswin_sa_forward(p, x_img):
    Bx = x_img.shape[0]

    # unfold + hierarchical patch reorder as ONE precomputed gather; everything
    # downstream (backbone + classifier) is fused inside the single kernel.
    xp = jnp.take(x_img.reshape(Bx, CIN * IMG * IMG),
                  jnp.asarray(_FLAT_GATHER_IDX), axis=1
                  ).reshape(Bx, HP * HP, KDIM)

    bb_w = (p["pe_w"], p["pe_b"], p["pe_ln_g"], p["pe_ln_b"],
            p["merges"][0]["ln_g"], p["merges"][0]["ln_b"], p["merges"][0]["w"],
            p["merges"][1]["ln_g"], p["merges"][1]["ln_b"], p["merges"][1]["w"],
            p["merges"][2]["ln_g"], p["merges"][2]["ln_b"], p["merges"][2]["w"],
            p["norm_g"], p["norm_b"], p["pool_wt"], p["pool_b"])
    sp = _stack_branch_params(p)
    cls_w = (sp["ln"], sp["qkv"], sp["slots"], sp["gru_w"], sp["gru_b"],
             sp["mlp_w"], sp["mlp_b"], sp["pos"], sp["wq"], sp["wkv"],
             sp["wp"], sp["bp"])

    def wspec(arr):
        nd = arr.ndim
        return pl.BlockSpec(arr.shape, lambda b, _n=nd: (0,) * _n)

    branch_out, branch_attn = pl.pallas_call(
        _fused_kernel,
        grid=(Bx,),
        in_specs=[pl.BlockSpec((None, HP * HP, KDIM), lambda b: (b, 0, 0))]
        + [wspec(a) for a in bb_w + cls_w],
        out_specs=[
            pl.BlockSpec((None, N_BRANCH, NUM_CLASSES), lambda b: (b, 0, 0)),
            pl.BlockSpec((None, N_BRANCH, POOL_OUT, NSLOTS),
                         lambda b: (b, 0, 0, 0)),
        ],
        out_shape=[
            jax.ShapeDtypeStruct((Bx, N_BRANCH, NUM_CLASSES), jnp.float32),
            jax.ShapeDtypeStruct((Bx, N_BRANCH, POOL_OUT, NSLOTS), jnp.float32),
        ],
        compiler_params=pltpu.CompilerParams(
            dimension_semantics=("parallel",)),
    )(xp, *bb_w, *cls_w)

    out = jnp.sum(branch_out, axis=1)                   # sum of 3 branch logits
    unsup_concept_attn = branch_attn[:, 0]               # (B, N, S_u), head-meaned
    concept_attn = jnp.mean(branch_attn[:, 1], axis=1)   # extra token-mean -> (B, S_c)
    spatial_concept_attn = branch_attn[:, 2]              # (B, N, S_s)
    return out, unsup_concept_attn, concept_attn, spatial_concept_attn


# ------------------------------------ main ------------------------------------
if __name__ == "__main__":
    key = jax.random.PRNGKey(0)
    kp, kx = jax.random.split(key)
    params = init_params(kp)
    x_img = jax.random.normal(kx, (B, CIN, IMG, IMG), jnp.float32)

    fwd = jax.jit(slot_cswin_sa_forward)
    out, unsup_attn, concept_attn, spatial_attn = fwd(params, x_img)
    jax.block_until_ready((out, unsup_attn, concept_attn, spatial_attn))

    assert out.shape == (B, NUM_CLASSES)
    assert unsup_attn.shape == (B, POOL_OUT, N_UNSUP)
    assert concept_attn.shape == (B, N_CONCEPTS)
    assert spatial_attn.shape == (B, POOL_OUT, N_SPATIAL)
    print("KERNEL_OK")
</pallas_src>

<mosaic_0001>
module attributes {stable_mosaic.version = 11 : i64} {
  func.func private @main(%arg0: i32) attributes {dimension_semantics = [#tpu.dimension_semantics<core_parallel>], iteration_bounds = array<i64: 2>, tpu.core_type = #tpu.core_type<sc_scalar_subcore>, window_params = []} {
    return
  }
}

module attributes {stable_mosaic.version = 11 : i64} {
  func.func private @main(%arg0: i32) attributes {dimension_semantics = [#tpu.dimension_semantics<core_parallel>], iteration_bounds = array<i64: 2>, tpu.core_type = #tpu.core_type<sc_scalar_subcore>, window_params = []} {
    return
  }
}

module attributes {stable_mosaic.version = 11 : i64} {
  func.func @_fused_kernel(%arg0: i32, %arg1: memref<1x64x48xf32, #tpu.memory_space<vmem>>, %arg2: memref<48x32xf32, #tpu.memory_space<vmem>>, %arg3: memref<1x32xf32, #tpu.memory_space<vmem>>, %arg4: memref<1x32xf32, #tpu.memory_space<vmem>>, %arg5: memref<1x32xf32, #tpu.memory_space<vmem>>, %arg6: memref<1x128xf32, #tpu.memory_space<vmem>>, %arg7: memref<1x128xf32, #tpu.memory_space<vmem>>, %arg8: memref<128x64xf32, #tpu.memory_space<vmem>>, %arg9: memref<1x256xf32, #tpu.memory_space<vmem>>, %arg10: memref<1x256xf32, #tpu.memory_space<vmem>>, %arg11: memref<256x128xf32, #tpu.memory_space<vmem>>, %arg12: memref<1x512xf32, #tpu.memory_space<vmem>>, %arg13: memref<1x512xf32, #tpu.memory_space<vmem>>, %arg14: memref<512x256xf32, #tpu.memory_space<vmem>>, %arg15: memref<1x256xf32, #tpu.memory_space<vmem>>, %arg16: memref<1x256xf32, #tpu.memory_space<vmem>>, %arg17: memref<16x8xf32, #tpu.memory_space<vmem>>, %arg18: memref<16x1xf32, #tpu.memory_space<vmem>>, %arg19: memref<3x6x32xf32, #tpu.memory_space<vmem>>, %arg20: memref<3x3x32x32xf32, #tpu.memory_space<vmem>>, %arg21: memref<3x4x32xf32, #tpu.memory_space<vmem>>, %arg22: memref<3x2x32x96xf32, #tpu.memory_space<vmem>>, %arg23: memref<3x2x96xf32, #tpu.memory_space<vmem>>, %arg24: memref<3x2x32x32xf32, #tpu.memory_space<vmem>>, %arg25: memref<3x2x32xf32, #tpu.memory_space<vmem>>, %arg26: memref<3x4x32xf32, #tpu.memory_space<vmem>>, %arg27: memref<3x32x32xf32, #tpu.memory_space<vmem>>, %arg28: memref<3x32x64xf32, #tpu.memory_space<vmem>>, %arg29: memref<3x32x10xf32, #tpu.memory_space<vmem>>, %arg30: memref<3x1x10xf32, #tpu.memory_space<vmem>>, %arg31: memref<1x3x10xf32, #tpu.memory_space<vmem>>, %arg32: memref<1x3x16x4xf32, #tpu.memory_space<vmem>>) attributes {dimension_semantics = [#tpu.dimension_semantics<parallel>], iteration_bounds = array<i64: 2>, scalar_prefetch = 0 : i64, scratch_operands = 0 : i64, tpu.core_type = #tpu.core_type<tc>, window_params = [{transform_indices = @transform_0, window_bounds = array<i64: 1, 64, 48>}, {pipeline_mode = #tpu.pipeline_mode<synchronous>, transform_indices = @transform_1, window_bounds = array<i64: 48, 32>}, {pipeline_mode = #tpu.pipeline_mode<synchronous>, transform_indices = @transform_2, window_bounds = array<i64: 1, 32>}, {pipeline_mode = #tpu.pipeline_mode<synchronous>, transform_indices = @transform_3, window_bounds = array<i64: 1, 32>}, {pipeline_mode = #tpu.pipeline_mode<synchronous>, transform_indices = @transform_4, window_bounds = array<i64: 1, 32>}, {pipeline_mode = #tpu.pipeline_mode<synchronous>, transform_indices = @transform_5, window_bounds = array<i64: 1, 128>}, {pipeline_mode = #tpu.pipeline_mode<synchronous>, transform_indices = @transform_6, window_bounds = array<i64: 1, 128>}, {pipeline_mode = #tpu.pipeline_mode<synchronous>, transform_indices = @transform_7, window_bounds = array<i64: 128, 64>}, {pipeline_mode = #tpu.pipeline_mode<synchronous>, transform_indices = @transform_8, window_bounds = array<i64: 1, 256>}, {pipeline_mode = #tpu.pipeline_mode<synchronous>, transform_indices = @transform_9, window_bounds = array<i64: 1, 256>}, {pipeline_mode = #tpu.pipeline_mode<synchronous>, transform_indices = @transform_10, window_bounds = array<i64: 256, 128>}, {pipeline_mode = #tpu.pipeline_mode<synchronous>, transform_indices = @transform_11, window_bounds = array<i64: 1, 512>}, {pipeline_mode = #tpu.pipeline_mode<synchronous>, transform_indices = @transform_12, window_bounds = array<i64: 1, 512>}, {pipeline_mode = #tpu.pipeline_mode<synchronous>, transform_indices = @transform_13, window_bounds = array<i64: 512, 256>}, {pipeline_mode = #tpu.pipeline_mode<synchronous>, transform_indices = @transform_14, window_bounds = array<i64: 1, 256>}, {pipeline_mode = #tpu.pipeline_mode<synchronous>, transform_indices = @transform_15, window_bounds = array<i64: 1, 256>}, {pipeline_mode = #tpu.pipeline_mode<synchronous>, transform_indices = @transform_16, window_bounds = array<i64: 16, 8>}, {pipeline_mode = #tpu.pipeline_mode<synchronous>, transform_indices = @transform_17, window_bounds = array<i64: 16, 1>}, {pipeline_mode = #tpu.pipeline_mode<synchronous>, transform_indices = @transform_18, window_bounds = array<i64: 3, 6, 32>}, {pipeline_mode = #tpu.pipeline_mode<synchronous>, transform_indices = @transform_19, window_bounds = array<i64: 3, 3, 32, 32>}, {pipeline_mode = #tpu.pipeline_mode<synchronous>, transform_indices = @transform_20, window_bounds = array<i64: 3, 4, 32>}, {pipeline_mode = #tpu.pipeline_mode<synchronous>, transform_indices = @transform_21, window_bounds = array<i64: 3, 2, 32, 96>}, {pipeline_mode = #tpu.pipeline_mode<synchronous>, transform_indices = @transform_22, window_bounds = array<i64: 3, 2, 96>}, {pipeline_mode = #tpu.pipeline_mode<synchronous>, transform_indices = @transform_23, window_bounds = array<i64: 3, 2, 32, 32>}, {pipeline_mode = #tpu.pipeline_mode<synchronous>, transform_indices = @transform_24, window_bounds = array<i64: 3, 2, 32>}, {pipeline_mode = #tpu.pipeline_mode<synchronous>, transform_indices = @transform_25, window_bounds = array<i64: 3, 4, 32>}, {pipeline_mode = #tpu.pipeline_mode<synchronous>, transform_indices = @transform_26, window_bounds = array<i64: 3, 32, 32>}, {pipeline_mode = #tpu.pipeline_mode<synchronous>, transform_indices = @transform_27, window_bounds = array<i64: 3, 32, 64>}, {pipeline_mode = #tpu.pipeline_mode<synchronous>, transform_indices = @transform_28, window_bounds = array<i64: 3, 32, 10>}, {pipeline_mode = #tpu.pipeline_mode<synchronous>, transform_indices = @transform_29, window_bounds = array<i64: 3, 1, 10>}, {transform_indices = @transform_30, window_bounds = array<i64: 1, 3, 10>}, {transform_indices = @transform_31, window_bounds = array<i64: 1, 3, 16, 4>}]} {
    %c0 = arith.constant 0 : index
    %c0_0 = arith.constant 0 : index
    %c0_1 = arith.constant 0 : index
    %0 = vector.load %arg1[%c0, %c0_0, %c0_1] : memref<1x64x48xf32, #tpu.memory_space<vmem>>, vector<1x64x48xf32>
    %1 = vector.shape_cast %0 : vector<1x64x48xf32> to vector<64x48xf32>
    %c0_2 = arith.constant 0 : index
    %c0_3 = arith.constant 0 : index
    %2 = vector.load %arg2[%c0_2, %c0_3] : memref<48x32xf32, #tpu.memory_space<vmem>>, vector<48x32xf32>
    %cst = arith.constant dense<0.000000e+00> : vector<64x32xf32>
    %3 = tpu.matmul %1, %2, %cst {dimension_numbers = #tpu.dot_dimension_numbers<[1], [0], [0], [1], [0, 0, 1, 1], [], []>} : vector<64x48xf32>, vector<48x32xf32>, vector<64x32xf32> -> vector<64x32xf32>
    %c0_4 = arith.constant 0 : index
    %c0_5 = arith.constant 0 : index
    %4 = vector.load %arg3[%c0_4, %c0_5] : memref<1x32xf32, #tpu.memory_space<vmem>>, vector<1x32xf32>
    %5 = vector.broadcast %4 : vector<1x32xf32> to vector<64x32xf32>
    %6 = arith.addf %3, %5 : vector<64x32xf32>
    %c0_6 = arith.constant 0 : index
    %c0_7 = arith.constant 0 : index
    %7 = vector.load %arg4[%c0_6, %c0_7] : memref<1x32xf32, #tpu.memory_space<vmem>>, vector<1x32xf32>
    %c0_8 = arith.constant 0 : index
    %c0_9 = arith.constant 0 : index
    %8 = vector.load %arg5[%c0_8, %c0_9] : memref<1x32xf32, #tpu.memory_space<vmem>>, vector<1x32xf32>
    %cst_10 = arith.constant dense<0.000000e+00> : vector<64xf32>
    %9 = vector.multi_reduction <add>, %6, %cst_10 [1] : vector<64x32xf32> to vector<64xf32>
    %10 = vector.shape_cast %9 : vector<64xf32> to vector<64x1xf32>
    %cst_11 = arith.constant 3.200000e+01 : f32
    %11 = vector.broadcast %cst_11 : f32 to vector<64x1xf32>
    %12 = arith.divf %10, %11 : vector<64x1xf32>
    %13 = vector.broadcast %12 : vector<64x1xf32> to vector<64x32xf32>
    %14 = arith.subf %6, %13 : vector<64x32xf32>
    %15 = arith.mulf %14, %14 : vector<64x32xf32>
    %cst_12 = arith.constant dense<0.000000e+00> : vector<64xf32>
    %16 = vector.multi_reduction <add>, %15, %cst_12 [1] : vector<64x32xf32> to vector<64xf32>
    %17 = vector.shape_cast %16 : vector<64xf32> to vector<64x1xf32>
    %cst_13 = arith.constant 3.200000e+01 : f32
    %18 = vector.broadcast %cst_13 : f32 to vector<64x1xf32>
    %19 = arith.divf %17, %18 : vector<64x1xf32>
    %20 = vector.broadcast %12 : vector<64x1xf32> to vector<64x32xf32>
    %21 = arith.subf %6, %20 : vector<64x32xf32>
    %cst_14 = arith.constant 9.99999974E-6 : f32
    %22 = vector.broadcast %cst_14 : f32 to vector<64x1xf32>
    %23 = arith.addf %19, %22 : vector<64x1xf32>
    %24 = math.rsqrt %23 : vector<64x1xf32>
    %25 = vector.broadcast %24 : vector<64x1xf32> to vector<64x32xf32>
    %26 = arith.mulf %21, %25 : vector<64x32xf32>
    %27 = vector.broadcast %7 : vector<1x32xf32> to vector<64x32xf32>
    %28 = arith.mulf %26, %27 : vector<64x32xf32>
    %29 = vector.broadcast %8 : vector<1x32xf32> to vector<64x32xf32>
    %30 = arith.addf %28, %29 : vector<64x32xf32>
    %c0_15 = arith.constant 0 : index
    %c0_16 = arith.constant 0 : index
    %31 = vector.load %arg6[%c0_15, %c0_16] : memref<1x128xf32, #tpu.memory_space<vmem>>, vector<1x128xf32>
    %c0_17 = arith.constant 0 : index
    %c0_18 = arith.constant 0 : index
    %32 = vector.load %arg7[%c0_17, %c0_18] : memref<1x128xf32, #tpu.memory_space<vmem>>, vector<1x128xf32>
    %c0_19 = arith.constant 0 : index
    %c0_20 = arith.constant 0 : index
    %33 = vector.load %arg8[%c0_19, %c0_20] : memref<128x64xf32, #tpu.memory_space<vmem>>, vector<128x64xf32>
    %34 = vector.extract_strided_slice %30 {offsets = [0, 0], sizes = [16, 32], strides = [1, 1]} : vector<64x32xf32> to vector<16x32xf32>
    %35 = vector.extract_strided_slice %30 {offsets = [16, 0], sizes = [16, 32], strides = [1, 1]} : vector<64x32xf32> to vector<16x32xf32>
    %36 = vector.extract_strided_slice %30 {offsets = [32, 0], sizes = [16, 32], strides = [1, 1]} : vector<64x32xf32> to vector<16x32xf32>
    %37 = vector.extract_strided_slice %30 {offsets = [48, 0], sizes = [16, 32], strides = [1, 1]} : vector<64x32xf32> to vector<16x32xf32>
    %38 = tpu.concatenate %34, %35, %36, %37 in 1 : vector<16x32xf32>, vector<16x32xf32>, vector<16x32xf32>, vector<16x32xf32> -> vector<16x128xf32>
    %cst_21 = arith.constant dense<0.000000e+00> : vector<16xf32>
    %39 = vector.multi_reduction <add>, %38, %cst_21 [1] : vector<16x128xf32> to vector<16xf32>
    %40 = vector.shape_cast %39 : vector<16xf32> to vector<16x1xf32>
    %cst_22 = arith.constant 1.280000e+02 : f32
    %41 = vector.broadcast %cst_22 : f32 to vector<16x1xf32>
    %42 = arith.divf %40, %41 : vector<16x1xf32>
    %43 = vector.broadcast %42 : vector<16x1xf32> to vector<16x128xf32>
    %44 = arith.subf %38, %43 : vector<16x128xf32>
    %45 = arith.mulf %44, %44 : vector<16x128xf32>
    %cst_23 = arith.constant dense<0.000000e+00> : vector<16xf32>
    %46 = vector.multi_reduction <add>, %45, %cst_23 [1] : vector<16x128xf32> to vector<16xf32>
    %47 = vector.shape_cast %46 : vector<16xf32> to vector<16x1xf32>
    %cst_24 = arith.constant 1.280000e+02 : f32
    %48 = vector.broadcast %cst_24 : f32 to vector<16x1xf32>
    %49 = arith.divf %47, %48 : vector<16x1xf32>
    %50 = vector.broadcast %42 : vector<16x1xf32> to vector<16x128xf32>
    %51 = arith.subf %38, %50 : vector<16x128xf32>
    %cst_25 = arith.constant 9.99999974E-6 : f32
    %52 = vector.broadcast %cst_25 : f32 to vector<16x1xf32>
    %53 = arith.addf %49, %52 : vector<16x1xf32>
    %54 = math.rsqrt %53 : vector<16x1xf32>
    %55 = vector.broadcast %54 : vector<16x1xf32> to vector<16x128xf32>
    %56 = arith.mulf %51, %55 : vector<16x128xf32>
    %57 = vector.broadcast %31 : vector<1x128xf32> to vector<16x128xf32>
    %58 = arith.mulf %56, %57 : vector<16x128xf32>
    %59 = vector.broadcast %32 : vector<1x128xf32> to vector<16x128xf32>
    %60 = arith.addf %58, %59 : vector<16x128xf32>
    %cst_26 = arith.constant dense<0.000000e+00> : vector<16x64xf32>
    %61 = tpu.matmul %60, %33, %cst_26 {dimension_numbers = #tpu.dot_dimension_numbers<[1], [0], [0], [1], [0, 0, 1, 1], [], []>} : vector<16x128xf32>, vector<128x64xf32>, vector<16x64xf32> -> vector<16x64xf32>
    %c0_27 = arith.constant 0 : index
    %c0_28 = arith.constant 0 : index
    %62 = vector.load %arg9[%c0_27, %c0_28] : memref<1x256xf32, #tpu.memory_space<vmem>>, vector<1x256xf32>
    %c0_29 = arith.constant 0 : index
    %c0_30 = arith.constant 0 : index
    %63 = vector.load %arg10[%c0_29, %c0_30] : memref<1x256xf32, #tpu.memory_space<vmem>>, vector<1x256xf32>
    %c0_31 = arith.constant 0 : index
    %c0_32 = arith.constant 0 : index
    %64 = vector.load %arg11[%c0_31, %c0_32] : memref<256x128xf32, #tpu.memory_space<vmem>>, vector<256x128xf32>
    %65 = vector.extract_strided_slice %61 {offsets = [0, 0], sizes = [4, 64], strides = [1, 1]} : vector<16x64xf32> to vector<4x64xf32>
    %66 = vector.extract_strided_slice %61 {offsets = [4, 0], sizes = [4, 64], strides = [1, 1]} : vector<16x64xf32> to vector<4x64xf32>
    %67 = vector.extract_strided_slice %61 {offsets = [8, 0], sizes = [4, 64], strides = [1, 1]} : vector<16x64xf32> to vector<4x64xf32>
    %68 = vector.extract_strided_slice %61 {offsets = [12, 0], sizes = [4, 64], strides = [1, 1]} : vector<16x64xf32> to vector<4x64xf32>
    %69 = tpu.concatenate %65, %66, %67, %68 in 1 : vector<4x64xf32>, vector<4x64xf32>, vector<4x64xf32>, vector<4x64xf32> -> vector<4x256xf32>
    %cst_33 = arith.constant dense<0.000000e+00> : vector<4xf32>
    %70 = vector.multi_reduction <add>, %69, %cst_33 [1] : vector<4x256xf32> to vector<4xf32>
    %71 = vector.shape_cast %70 : vector<4xf32> to vector<4x1xf32>
    %cst_34 = arith.constant 2.560000e+02 : f32
    %72 = vector.broadcast %cst_34 : f32 to vector<4x1xf32>
    %73 = arith.divf %71, %72 : vector<4x1xf32>
    %74 = vector.broadcast %73 : vector<4x1xf32> to vector<4x256xf32>
    %75 = arith.subf %69, %74 : vector<4x256xf32>
    %76 = arith.mulf %75, %75 : vector<4x256xf32>
    %cst_35 = arith.constant dense<0.000000e+00> : vector<4xf32>
    %77 = vector.multi_reduction <add>, %76, %cst_35 [1] : vector<4x256xf32> to vector<4xf32>
    %78 = vector.shape_cast %77 : vector<4xf32> to vector<4x1xf32>
    %cst_36 = arith.constant 2.560000e+02 : f32
    %79 = vector.broadcast %cst_36 : f32 to vector<4x1xf32>
    %80 = arith.divf %78, %79 : vector<4x1xf32>
    %81 = vector.broadcast %73 : vector<4x1xf32> to vector<4x256xf32>
    %82 = arith.subf %69, %81 : vector<4x256xf32>
    %cst_37 = arith.constant 9.99999974E-6 : f32
    %83 = vector.broadcast %cst_37 : f32 to vector<4x1xf32>
    %84 = arith.addf %80, %83 : vector<4x1xf32>
    %85 = math.rsqrt %84 : vector<4x1xf32>
    %86 = vector.broadcast %85 : vector<4x1xf32> to vector<4x256xf32>
    %87 = arith.mulf %82, %86 : vector<4x256xf32>
    %88 = vector.broadcast %62 : vector<1x256xf32> to vector<4x256xf32>
    %89 = arith.mulf %87, %88 : vector<4x256xf32>
    %90 = vector.broadcast %63 : vector<1x256xf32> to vector<4x256xf32>
    %91 = arith.addf %89, %90 : vector<4x256xf32>
    %cst_38 = arith.constant dense<0.000000e+00> : vector<4x128xf32>
    %92 = tpu.matmul %91, %64, %cst_38 {dimension_numbers = #tpu.dot_dimension_numbers<[1], [0], [0], [1], [0, 0, 1, 1], [], []>} : vector<4x256xf32>, vector<256x128xf32>, vector<4x128xf32> -> vector<4x128xf32>
    %c0_39 = arith.constant 0 : index
    %c0_40 = arith.constant 0 : index
    %93 = vector.load %arg12[%c0_39, %c0_40] : memref<1x512xf32, #tpu.memory_space<vmem>>, vector<1x512xf32>
    %c0_41 = arith.constant 0 : index
    %c0_42 = arith.constant 0 : index
    %94 = vector.load %arg13[%c0_41, %c0_42] : memref<1x512xf32, #tpu.memory_space<vmem>>, vector<1x512xf32>
    %c0_43 = arith.constant 0 : index
    %c0_44 = arith.constant 0 : index
    %95 = vector.load %arg14[%c0_43, %c0_44] : memref<512x256xf32, #tpu.memory_space<vmem>>, vector<512x256xf32>
    %96 = vector.extract_strided_slice %92 {offsets = [0, 0], sizes = [1, 128], strides = [1, 1]} : vector<4x128xf32> to vector<1x128xf32>
    %97 = vector.extract_strided_slice %92 {offsets = [1, 0], sizes = [1, 128], strides = [1, 1]} : vector<4x128xf32> to vector<1x128xf32>
    %98 = vector.extract_strided_slice %92 {offsets = [2, 0], sizes = [1, 128], strides = [1, 1]} : vector<4x128xf32> to vector<1x128xf32>
    %99 = vector.extract_strided_slice %92 {offsets = [3, 0], sizes = [1, 128], strides = [1, 1]} : vector<4x128xf32> to vector<1x128xf32>
    %100 = tpu.concatenate %96, %97, %98, %99 in 1 : vector<1x128xf32>, vector<1x128xf32>, vector<1x128xf32>, vector<1x128xf32> -> vector<1x512xf32>
    %cst_45 = arith.constant dense<0.000000e+00> : vector<1xf32>
    %101 = vector.multi_reduction <add>, %100, %cst_45 [1] : vector<1x512xf32> to vector<1xf32>
    %102 = vector.shape_cast %101 : vector<1xf32> to vector<1x1xf32>
    %cst_46 = arith.constant 5.120000e+02 : f32
    %103 = vector.broadcast %cst_46 : f32 to vector<1x1xf32>
    %104 = arith.divf %102, %103 : vector<1x1xf32>
    %105 = vector.broadcast %104 : vector<1x1xf32> to vector<1x512xf32>
    %106 = arith.subf %100, %105 : vector<1x512xf32>
    %107 = arith.mulf %106, %106 : vector<1x512xf32>
    %cst_47 = arith.constant dense<0.000000e+00> : vector<1xf32>
    %108 = vector.multi_reduction <add>, %107, %cst_47 [1] : vector<1x512xf32> to vector<1xf32>
    %109 = vector.shape_cast %108 : vector<1xf32> to vector<1x1xf32>
    %cst_48 = arith.constant 5.120000e+02 : f32
    %110 = vector.broadcast %cst_48 : f32 to vector<1x1xf32>
    %111 = arith.divf %109, %110 : vector<1x1xf32>
    %112 = vector.broadcast %104 : vector<1x1xf32> to vector<1x512xf32>
    %113 = arith.subf %100, %112 : vector<1x512xf32>
    %cst_49 = arith.constant 9.99999974E-6 : f32
    %114 = vector.broadcast %cst_49 : f32 to vector<1x1xf32>
    %115 = arith.addf %111, %114 : vector<1x1xf32>
    %116 = math.rsqrt %115 : vector<1x1xf32>
    %117 = vector.broadcast %116 : vector<1x1xf32> to vector<1x512xf32>
    %118 = arith.mulf %113, %117 : vector<1x512xf32>
    %119 = arith.mulf %118, %93 : vector<1x512xf32>
    %120 = arith.addf %119, %94 : vector<1x512xf32>
    %cst_50 = arith.constant dense<0.000000e+00> : vector<1x256xf32>
    %121 = tpu.matmul %120, %95, %cst_50 {dimension_numbers = #tpu.dot_dimension_numbers<[1], [0], [0], [1], [0, 0, 1, 1], [], []>} : vector<1x512xf32>, vector<512x256xf32>, vector<1x256xf32> -> vector<1x256xf32>
    %c0_51 = arith.constant 0 : index
    %c0_52 = arith.constant 0 : index
    %122 = vector.load %arg15[%c0_51, %c0_52] : memref<1x256xf32, #tpu.memory_space<vmem>>, vector<1x256xf32>
    %c0_53 = arith.constant 0 : index
    %c0_54 = arith.constant 0 : index
    %123 = vector.load %arg16[%c0_53, %c0_54] : memref<1x256xf32, #tpu.memory_space<vmem>>, vector<1x256xf32>
    %cst_55 = arith.constant dense<0.000000e+00> : vector<1xf32>
    %124 = vector.multi_reduction <add>, %121, %cst_55 [1] : vector<1x256xf32> to vector<1xf32>
    %125 = vector.shape_cast %124 : vector<1xf32> to vector<1x1xf32>
    %cst_56 = arith.constant 2.560000e+02 : f32
    %126 = vector.broadcast %cst_56 : f32 to vector<1x1xf32>
    %127 = arith.divf %125, %126 : vector<1x1xf32>
    %128 = vector.broadcast %127 : vector<1x1xf32> to vector<1x256xf32>
    %129 = arith.subf %121, %128 : vector<1x256xf32>
    %130 = arith.mulf %129, %129 : vector<1x256xf32>
    %cst_57 = arith.constant dense<0.000000e+00> : vector<1xf32>
    %131 = vector.multi_reduction <add>, %130, %cst_57 [1] : vector<1x256xf32> to vector<1xf32>
    %132 = vector.shape_cast %131 : vector<1xf32> to vector<1x1xf32>
    %cst_58 = arith.constant 2.560000e+02 : f32
    %133 = vector.broadcast %cst_58 : f32 to vector<1x1xf32>
    %134 = arith.divf %132, %133 : vector<1x1xf32>
    %135 = vector.broadcast %127 : vector<1x1xf32> to vector<1x256xf32>
    %136 = arith.subf %121, %135 : vector<1x256xf32>
    %cst_59 = arith.constant 9.99999974E-6 : f32
    %137 = vector.broadcast %cst_59 : f32 to vector<1x1xf32>
    %138 = arith.addf %134, %137 : vector<1x1xf32>
    %139 = math.rsqrt %138 : vector<1x1xf32>
    %140 = vector.broadcast %139 : vector<1x1xf32> to vector<1x256xf32>
    %141 = arith.mulf %136, %140 : vector<1x256xf32>
    %142 = arith.mulf %141, %122 : vector<1x256xf32>
    %143 = arith.addf %142, %123 : vector<1x256xf32>
    %144 = vector.extract_strided_slice %143 {offsets = [0, 0], sizes = [1, 32], strides = [1, 1]} : vector<1x256xf32> to vector<1x32xf32>
    %145 = vector.extract_strided_slice %143 {offsets = [0, 32], sizes = [1, 32], strides = [1, 1]} : vector<1x256xf32> to vector<1x32xf32>
    %146 = vector.extract_strided_slice %143 {offsets = [0, 64], sizes = [1, 32], strides = [1, 1]} : vector<1x256xf32> to vector<1x32xf32>
    %147 = vector.extract_strided_slice %143 {offsets = [0, 96], sizes = [1, 32], strides = [1, 1]} : vector<1x256xf32> to vector<1x32xf32>
    %148 = vector.extract_strided_slice %143 {offsets = [0, 128], sizes = [1, 32], strides = [1, 1]} : vector<1x256xf32> to vector<1x32xf32>
    %149 = vector.extract_strided_slice %143 {offsets = [0, 160], sizes = [1, 32], strides = [1, 1]} : vector<1x256xf32> to vector<1x32xf32>
    %150 = vector.extract_strided_slice %143 {offsets = [0, 192], sizes = [1, 32], strides = [1, 1]} : vector<1x256xf32> to vector<1x32xf32>
    %151 = vector.extract_strided_slice %143 {offsets = [0, 224], sizes = [1, 32], strides = [1, 1]} : vector<1x256xf32> to vector<1x32xf32>
    %152 = tpu.concatenate %144, %145, %146, %147, %148, %149, %150, %151 in 0 : vector<1x32xf32>, vector<1x32xf32>, vector<1x32xf32>, vector<1x32xf32>, vector<1x32xf32>, vector<1x32xf32>, vector<1x32xf32>, vector<1x32xf32> -> vector<8x32xf32>
    %c0_60 = arith.constant 0 : index
    %c0_61 = arith.constant 0 : index
    %153 = vector.load %arg17[%c0_60, %c0_61] : memref<16x8xf32, #tpu.memory_space<vmem>>, vector<16x8xf32>
    %cst_62 = arith.constant dense<0.000000e+00> : vector<16x32xf32>
    %154 = tpu.matmul %153, %152, %cst_62 {dimension_numbers = #tpu.dot_dimension_numbers<[1], [0], [0], [1], [0, 0, 1, 1], [], []>} : vector<16x8xf32>, vector<8x32xf32>, vector<16x32xf32> -> vector<16x32xf32>
    %c0_63 = arith.constant 0 : index
    %c0_64 = arith.constant 0 : index
    %155 = vector.load %arg18[%c0_63, %c0_64] : memref<16x1xf32, #tpu.memory_space<vmem>>, vector<16x1xf32>
    %156 = vector.broadcast %155 : vector<16x1xf32> to vector<16x32xf32>
    %157 = arith.addf %154, %156 : vector<16x32xf32>
    %c0_65 = arith.constant 0 : index
    %c0_66 = arith.constant 0 : index
    %c0_67 = arith.constant 0 : index
    %158 = vector.load %arg19[%c0_65, %c0_66, %c0_67] : memref<3x6x32xf32, #tpu.memory_space<vmem>>, vector<1x6x32xf32>
    %159 = vector.shape_cast %158 : vector<1x6x32xf32> to vector<6x32xf32>
    %c0_68 = arith.constant 0 : index
    %c0_69 = arith.constant 0 : index
    %c0_70 = arith.constant 0 : index
    %160 = vector.load %arg21[%c0_68, %c0_69, %c0_70] : memref<3x4x32xf32, #tpu.memory_space<vmem>>, vector<1x4x32xf32>
    %161 = vector.shape_cast %160 : vector<1x4x32xf32> to vector<4x32xf32>
    %c0_71 = arith.constant 0 : index
    %c0_72 = arith.constant 0 : index
    %c0_73 = arith.constant 0 : index
    %162 = vector.load %arg23[%c0_71, %c0_72, %c0_73] : memref<3x2x96xf32, #tpu.memory_space<vmem>>, vector<1x2x96xf32>
    %163 = vector.shape_cast %162 : vector<1x2x96xf32> to vector<2x96xf32>
    %c0_74 = arith.constant 0 : index
    %c0_75 = arith.constant 0 : index
    %c0_76 = arith.constant 0 : index
    %164 = vector.load %arg25[%c0_74, %c0_75, %c0_76] : memref<3x2x32xf32, #tpu.memory_space<vmem>>, vector<1x2x32xf32>
    %165 = vector.shape_cast %164 : vector<1x2x32xf32> to vector<2x32xf32>
    %166 = vector.extract_strided_slice %159 {offsets = [0, 0], sizes = [1, 32], strides = [1, 1]} : vector<6x32xf32> to vector<1x32xf32>
    %167 = vector.extract_strided_slice %159 {offsets = [1, 0], sizes = [1, 32], strides = [1, 1]} : vector<6x32xf32> to vector<1x32xf32>
    %cst_77 = arith.constant dense<0.000000e+00> : vector<16xf32>
    %168 = vector.multi_reduction <add>, %157, %cst_77 [1] : vector<16x32xf32> to vector<16xf32>
    %169 = vector.shape_cast %168 : vector<16xf32> to vector<16x1xf32>
    %cst_78 = arith.constant 3.200000e+01 : f32
    %170 = vector.broadcast %cst_78 : f32 to vector<16x1xf32>
    %171 = arith.divf %169, %170 : vector<16x1xf32>
    %172 = vector.broadcast %171 : vector<16x1xf32> to vector<16x32xf32>
    %173 = arith.subf %157, %172 : vector<16x32xf32>
    %174 = arith.mulf %173, %173 : vector<16x32xf32>
    %cst_79 = arith.constant dense<0.000000e+00> : vector<16xf32>
    %175 = vector.multi_reduction <add>, %174, %cst_79 [1] : vector<16x32xf32> to vector<16xf32>
    %176 = vector.shape_cast %175 : vector<16xf32> to vector<16x1xf32>
    %cst_80 = arith.constant 3.200000e+01 : f32
    %177 = vector.broadcast %cst_80 : f32 to vector<16x1xf32>
    %178 = arith.divf %176, %177 : vector<16x1xf32>
    %179 = vector.broadcast %171 : vector<16x1xf32> to vector<16x32xf32>
    %180 = arith.subf %157, %179 : vector<16x32xf32>
    %cst_81 = arith.constant 9.99999974E-6 : f32
    %181 = vector.broadcast %cst_81 : f32 to vector<16x1xf32>
    %182 = arith.addf %178, %181 : vector<16x1xf32>
    %183 = math.rsqrt %182 : vector<16x1xf32>
    %184 = vector.broadcast %183 : vector<16x1xf32> to vector<16x32xf32>
    %185 = arith.mulf %180, %184 : vector<16x32xf32>
    %186 = vector.broadcast %166 : vector<1x32xf32> to vector<16x32xf32>
    %187 = arith.mulf %185, %186 : vector<16x32xf32>
    %188 = vector.broadcast %167 : vector<1x32xf32> to vector<16x32xf32>
    %189 = arith.addf %187, %188 : vector<16x32xf32>
    %c0_82 = arith.constant 0 : index
    %c1 = arith.constant 1 : index
    %c0_83 = arith.constant 0 : index
    %c0_84 = arith.constant 0 : index
    %190 = vector.load %arg20[%c0_82, %c1, %c0_83, %c0_84] : memref<3x3x32x32xf32, #tpu.memory_space<vmem>>, vector<1x1x32x32xf32>
    %191 = vector.shape_cast %190 : vector<1x1x32x32xf32> to vector<32x32xf32>
    %cst_85 = arith.constant dense<0.000000e+00> : vector<16x32xf32>
    %192 = tpu.matmul %189, %191, %cst_85 {dimension_numbers = #tpu.dot_dimension_numbers<[1], [0], [0], [1], [0, 0, 1, 1], [], []>} : vector<16x32xf32>, vector<32x32xf32>, vector<16x32xf32> -> vector<16x32xf32>
    %c0_86 = arith.constant 0 : index
    %c2 = arith.constant 2 : index
    %c0_87 = arith.constant 0 : index
    %c0_88 = arith.constant 0 : index
    %193 = vector.load %arg20[%c0_86, %c2, %c0_87, %c0_88] : memref<3x3x32x32xf32, #tpu.memory_space<vmem>>, vector<1x1x32x32xf32>
    %194 = vector.shape_cast %193 : vector<1x1x32x32xf32> to vector<32x32xf32>
    %cst_89 = arith.constant dense<0.000000e+00> : vector<16x32xf32>
    %195 = tpu.matmul %189, %194, %cst_89 {dimension_numbers = #tpu.dot_dimension_numbers<[1], [0], [0], [1], [0, 0, 1, 1], [], []>} : vector<16x32xf32>, vector<32x32xf32>, vector<16x32xf32> -> vector<16x32xf32>
    %196 = vector.extract_strided_slice %159 {offsets = [2, 0], sizes = [1, 32], strides = [1, 1]} : vector<6x32xf32> to vector<1x32xf32>
    %197 = vector.extract_strided_slice %159 {offsets = [3, 0], sizes = [1, 32], strides = [1, 1]} : vector<6x32xf32> to vector<1x32xf32>
    %cst_90 = arith.constant dense<0.000000e+00> : vector<4xf32>
    %198 = vector.multi_reduction <add>, %161, %cst_90 [1] : vector<4x32xf32> to vector<4xf32>
    %199 = vector.shape_cast %198 : vector<4xf32> to vector<4x1xf32>
    %cst_91 = arith.constant 3.200000e+01 : f32
    %200 = vector.broadcast %cst_91 : f32 to vector<4x1xf32>
    %201 = arith.divf %199, %200 : vector<4x1xf32>
    %202 = vector.broadcast %201 : vector<4x1xf32> to vector<4x32xf32>
    %203 = arith.subf %161, %202 : vector<4x32xf32>
    %204 = arith.mulf %203, %203 : vector<4x32xf32>
    %cst_92 = arith.constant dense<0.000000e+00> : vector<4xf32>
    %205 = vector.multi_reduction <add>, %204, %cst_92 [1] : vector<4x32xf32> to vector<4xf32>
    %206 = vector.shape_cast %205 : vector<4xf32> to vector<4x1xf32>
    %cst_93 = arith.constant 3.200000e+01 : f32
    %207 = vector.broadcast %cst_93 : f32 to vector<4x1xf32>
    %208 = arith.divf %206, %207 : vector<4x1xf32>
    %209 = vector.broadcast %201 : vector<4x1xf32> to vector<4x32xf32>
    %210 = arith.subf %161, %209 : vector<4x32xf32>
    %cst_94 = arith.constant 9.99999974E-6 : f32
    %211 = vector.broadcast %cst_94 : f32 to vector<4x1xf32>
    %212 = arith.addf %208, %211 : vector<4x1xf32>
    %213 = math.rsqrt %212 : vector<4x1xf32>
    %214 = vector.broadcast %213 : vector<4x1xf32> to vector<4x32xf32>
    %215 = arith.mulf %210, %214 : vector<4x32xf32>
    %216 = vector.broadcast %196 : vector<1x32xf32> to vector<4x32xf32>
    %217 = arith.mulf %215, %216 : vector<4x32xf32>
    %218 = vector.broadcast %197 : vector<1x32xf32> to vector<4x32xf32>
    %219 = arith.addf %217, %218 : vector<4x32xf32>
    %c0_95 = arith.constant 0 : index
    %c0_96 = arith.constant 0 : index
    %c0_97 = arith.constant 0 : index
    %c0_98 = arith.constant 0 : index
    %220 = vector.load %arg20[%c0_95, %c0_96, %c0_97, %c0_98] : memref<3x3x32x32xf32, #tpu.memory_space<vmem>>, vector<1x1x32x32xf32>
    %221 = vector.shape_cast %220 : vector<1x1x32x32xf32> to vector<32x32xf32>
    %cst_99 = arith.constant dense<0.000000e+00> : vector<4x32xf32>
    %222 = tpu.matmul %219, %221, %cst_99 {dimension_numbers = #tpu.dot_dimension_numbers<[1], [0], [0], [1], [0, 0, 1, 1], [], []>} : vector<4x32xf32>, vector<32x32xf32>, vector<4x32xf32> -> vector<4x32xf32>
    "tpu.trace_start"() <{level = 10 : i32, message = "nd,sd->ns"}> : () -> ()
    %cst_100 = arith.constant dense<0.000000e+00> : vector<16x4xf32>
    %223 = tpu.matmul %192, %222, %cst_100 {dimension_numbers = #tpu.dot_dimension_numbers<[1], [1], [0], [0], [0, 0, 1, 0], [], []>} : vector<16x32xf32>, vector<4x32xf32>, vector<16x4xf32> -> vector<16x4xf32>
    "tpu.trace_stop"() : () -> ()
    %cst_101 = arith.constant 0.176776692 : f32
    %224 = vector.broadcast %cst_101 : f32 to vector<16x4xf32>
    %225 = arith.mulf %223, %224 : vector<16x4xf32>
    %cst_102 = arith.constant dense<0xFF800000> : vector<16xf32>
    %226 = vector.multi_reduction <maximumf>, %225, %cst_102 [1] : vector<16x4xf32> to vector<16xf32>
    %227 = vector.shape_cast %226 : vector<16xf32> to vector<16x1xf32>
    %228 = vector.broadcast %227 : vector<16x1xf32> to vector<16x4xf32>
    %229 = arith.subf %225, %228 : vector<16x4xf32>
    %230 = math.exp %229 : vector<16x4xf32>
    %cst_103 = arith.constant dense<0.000000e+00> : vector<16xf32>
    %231 = vector.multi_reduction <add>, %230, %cst_103 [1] : vector<16x4xf32> to vector<16xf32>
    %232 = vector.shape_cast %231 : vector<16xf32> to vector<16x1xf32>
    %233 = vector.broadcast %232 : vector<16x1xf32> to vector<16x4xf32>
    %234 = arith.divf %230, %233 : vector<16x4xf32>
    %cst_104 = arith.constant 9.99999993E-9 : f32
    %235 = vector.broadcast %cst_104 : f32 to vector<16x4xf32>
    %236 = arith.addf %234, %235 : vector<16x4xf32>
    %cst_105 = arith.constant dense<0.000000e+00> : vector<4xf32>
    %237 = vector.multi_reduction <add>, %236, %cst_105 [0] : vector<16x4xf32> to vector<4xf32>
    %238 = vector.shape_cast %237 : vector<4xf32> to vector<1x4xf32>
    %239 = vector.broadcast %238 : vector<1x4xf32> to vector<16x4xf32>
    %240 = arith.divf %236, %239 : vector<16x4xf32>
    "tpu.trace_start"() <{level = 10 : i32, message = "ns,nd->sd"}> : () -> ()
    %cst_106 = arith.constant dense<0.000000e+00> : vector<4x32xf32>
    %241 = tpu.matmul %240, %195, %cst_106 {dimension_numbers = #tpu.dot_dimension_numbers<[0], [0], [1], [1], [0, 1, 1, 1], [], []>} : vector<16x4xf32>, vector<16x32xf32>, vector<4x32xf32> -> vector<4x32xf32>
    "tpu.trace_stop"() : () -> ()
    %c0_107 = arith.constant 0 : index
    %c0_108 = arith.constant 0 : index
    %c0_109 = arith.constant 0 : index
    %c0_110 = arith.constant 0 : index
    %242 = vector.load %arg22[%c0_107, %c0_108, %c0_109, %c0_110] : memref<3x2x32x96xf32, #tpu.memory_space<vmem>>, vector<1x1x32x96xf32>
    %243 = vector.shape_cast %242 : vector<1x1x32x96xf32> to vector<32x96xf32>
    %cst_111 = arith.constant dense<0.000000e+00> : vector<4x96xf32>
    %244 = tpu.matmul %241, %243, %cst_111 {dimension_numbers = #tpu.dot_dimension_numbers<[1], [0], [0], [1], [0, 0, 1, 1], [], []>} : vector<4x32xf32>, vector<32x96xf32>, vector<4x96xf32> -> vector<4x96xf32>
    %245 = vector.extract_strided_slice %163 {offsets = [0, 0], sizes = [1, 96], strides = [1, 1]} : vector<2x96xf32> to vector<1x96xf32>
    %246 = vector.broadcast %245 : vector<1x96xf32> to vector<4x96xf32>
    %247 = arith.addf %244, %246 : vector<4x96xf32>
    %c0_112 = arith.constant 0 : index
    %c1_113 = arith.constant 1 : index
    %c0_114 = arith.constant 0 : index
    %c0_115 = arith.constant 0 : index
    %248 = vector.load %arg22[%c0_112, %c1_113, %c0_114, %c0_115] : memref<3x2x32x96xf32, #tpu.memory_space<vmem>>, vector<1x1x32x96xf32>
    %249 = vector.shape_cast %248 : vector<1x1x32x96xf32> to vector<32x96xf32>
    %cst_116 = arith.constant dense<0.000000e+00> : vector<4x96xf32>
    %250 = tpu.matmul %161, %249, %cst_116 {dimension_numbers = #tpu.dot_dimension_numbers<[1], [0], [0], [1], [0, 0, 1, 1], [], []>} : vector<4x32xf32>, vector<32x96xf32>, vector<4x96xf32> -> vector<4x96xf32>
    %251 = vector.extract_strided_slice %163 {offsets = [1, 0], sizes = [1, 96], strides = [1, 1]} : vector<2x96xf32> to vector<1x96xf32>
    %252 = vector.broadcast %251 : vector<1x96xf32> to vector<4x96xf32>
    %253 = arith.addf %250, %252 : vector<4x96xf32>
    %254 = vector.extract_strided_slice %247 {offsets = [0, 0], sizes = [4, 32], strides = [1, 1]} : vector<4x96xf32> to vector<4x32xf32>
    %255 = vector.extract_strided_slice %253 {offsets = [0, 0], sizes = [4, 32], strides = [1, 1]} : vector<4x96xf32> to vector<4x32xf32>
    %256 = arith.addf %254, %255 : vector<4x32xf32>
    %257 = arith.negf %256 : vector<4x32xf32>
    %258 = math.exp %257 : vector<4x32xf32>
    %cst_117 = arith.constant 1.000000e+00 : f32
    %259 = vector.broadcast %cst_117 : f32 to vector<4x32xf32>
    %260 = arith.addf %259, %258 : vector<4x32xf32>
    %261 = arith.divf %259, %260 : vector<4x32xf32>
    %262 = vector.extract_strided_slice %247 {offsets = [0, 32], sizes = [4, 32], strides = [1, 1]} : vector<4x96xf32> to vector<4x32xf32>
    %263 = vector.extract_strided_slice %253 {offsets = [0, 32], sizes = [4, 32], strides = [1, 1]} : vector<4x96xf32> to vector<4x32xf32>
    %264 = arith.addf %262, %263 : vector<4x32xf32>
    %265 = arith.negf %264 : vector<4x32xf32>
    %266 = math.exp %265 : vector<4x32xf32>
    %cst_118 = arith.constant 1.000000e+00 : f32
    %267 = vector.broadcast %cst_118 : f32 to vector<4x32xf32>
    %268 = arith.addf %267, %266 : vector<4x32xf32>
    %269 = arith.divf %267, %268 : vector<4x32xf32>
    %270 = vector.extract_strided_slice %247 {offsets = [0, 64], sizes = [4, 32], strides = [1, 1]} : vector<4x96xf32> to vector<4x32xf32>
    %271 = vector.extract_strided_slice %253 {offsets = [0, 64], sizes = [4, 32], strides = [1, 1]} : vector<4x96xf32> to vector<4x32xf32>
    %272 = arith.mulf %261, %271 : vector<4x32xf32>
    %273 = arith.addf %270, %272 : vector<4x32xf32>
    %274 = math.tanh %273 : vector<4x32xf32>
    %cst_119 = arith.constant 1.000000e+00 : f32
    %275 = vector.broadcast %cst_119 : f32 to vector<4x32xf32>
    %276 = arith.subf %275, %269 : vector<4x32xf32>
    %277 = arith.mulf %276, %274 : vector<4x32xf32>
    %278 = arith.mulf %269, %161 : vector<4x32xf32>
    %279 = arith.addf %277, %278 : vector<4x32xf32>
    %280 = vector.extract_strided_slice %159 {offsets = [4, 0], sizes = [1, 32], strides = [1, 1]} : vector<6x32xf32> to vector<1x32xf32>
    %281 = vector.extract_strided_slice %159 {offsets = [5, 0], sizes = [1, 32], strides = [1, 1]} : vector<6x32xf32> to vector<1x32xf32>
    %cst_120 = arith.constant dense<0.000000e+00> : vector<4xf32>
    %282 = vector.multi_reduction <add>, %279, %cst_120 [1] : vector<4x32xf32> to vector<4xf32>
    %283 = vector.shape_cast %282 : vector<4xf32> to vector<4x1xf32>
    %cst_121 = arith.constant 3.200000e+01 : f32
    %284 = vector.broadcast %cst_121 : f32 to vector<4x1xf32>
    %285 = arith.divf %283, %284 : vector<4x1xf32>
    %286 = vector.broadcast %285 : vector<4x1xf32> to vector<4x32xf32>
    %287 = arith.subf %279, %286 : vector<4x32xf32>
    %288 = arith.mulf %287, %287 : vector<4x32xf32>
    %cst_122 = arith.constant dense<0.000000e+00> : vector<4xf32>
    %289 = vector.multi_reduction <add>, %288, %cst_122 [1] : vector<4x32xf32> to vector<4xf32>
    %290 = vector.shape_cast %289 : vector<4xf32> to vector<4x1xf32>
    %cst_123 = arith.constant 3.200000e+01 : f32
    %291 = vector.broadcast %cst_123 : f32 to vector<4x1xf32>
    %292 = arith.divf %290, %291 : vector<4x1xf32>
    %293 = vector.broadcast %285 : vector<4x1xf32> to vector<4x32xf32>
    %294 = arith.subf %279, %293 : vector<4x32xf32>
    %cst_124 = arith.constant 9.99999974E-6 : f32
    %295 = vector.broadcast %cst_124 : f32 to vector<4x1xf32>
    %296 = arith.addf %292, %295 : vector<4x1xf32>
    %297 = math.rsqrt %296 : vector<4x1xf32>
    %298 = vector.broadcast %297 : vector<4x1xf32> to vector<4x32xf32>
    %299 = arith.mulf %294, %298 : vector<4x32xf32>
    %300 = vector.broadcast %280 : vector<1x32xf32> to vector<4x32xf32>
    %301 = arith.mulf %299, %300 : vector<4x32xf32>
    %302 = vector.broadcast %281 : vector<1x32xf32> to vector<4x32xf32>
    %303 = arith.addf %301, %302 : vector<4x32xf32>
    %c0_125 = arith.constant 0 : index
    %c0_126 = arith.constant 0 : index
    %c0_127 = arith.constant 0 : index
    %c0_128 = arith.constant 0 : index
    %304 = vector.load %arg24[%c0_125, %c0_126, %c0_127, %c0_128] : memref<3x2x32x32xf32, #tpu.memory_space<vmem>>, vector<1x1x32x32xf32>
    %305 = vector.shape_cast %304 : vector<1x1x32x32xf32> to vector<32x32xf32>
    %cst_129 = arith.constant dense<0.000000e+00> : vector<4x32xf32>
    %306 = tpu.matmul %303, %305, %cst_129 {dimension_numbers = #tpu.dot_dimension_numbers<[1], [0], [0], [1], [0, 0, 1, 1], [], []>} : vector<4x32xf32>, vector<32x32xf32>, vector<4x32xf32> -> vector<4x32xf32>
    %307 = vector.extract_strided_slice %165 {offsets = [0, 0], sizes = [1, 32], strides = [1, 1]} : vector<2x32xf32> to vector<1x32xf32>
    %308 = vector.broadcast %307 : vector<1x32xf32> to vector<4x32xf32>
    %309 = arith.addf %306, %308 : vector<4x32xf32>
    %cst_130 = arith.constant 0.000000e+00 : f32
    %310 = vector.broadcast %cst_130 : f32 to vector<4x32xf32>
    %311 = arith.maximumf %309, %310 : vector<4x32xf32>
    %c0_131 = arith.constant 0 : index
    %c1_132 = arith.constant 1 : index
    %c0_133 = arith.constant 0 : index
    %c0_134 = arith.constant 0 : index
    %312 = vector.load %arg24[%c0_131, %c1_132, %c0_133, %c0_134] : memref<3x2x32x32xf32, #tpu.memory_space<vmem>>, vector<1x1x32x32xf32>
    %313 = vector.shape_cast %312 : vector<1x1x32x32xf32> to vector<32x32xf32>
    %cst_135 = arith.constant dense<0.000000e+00> : vector<4x32xf32>
    %314 = tpu.matmul %311, %313, %cst_135 {dimension_numbers = #tpu.dot_dimension_numbers<[1], [0], [0], [1], [0, 0, 1, 1], [], []>} : vector<4x32xf32>, vector<32x32xf32>, vector<4x32xf32> -> vector<4x32xf32>
    %315 = arith.addf %279, %314 : vector<4x32xf32>
    %316 = vector.extract_strided_slice %165 {offsets = [1, 0], sizes = [1, 32], strides = [1, 1]} : vector<2x32xf32> to vector<1x32xf32>
    %317 = vector.broadcast %316 : vector<1x32xf32> to vector<4x32xf32>
    %318 = arith.addf %315, %317 : vector<4x32xf32>
    %c0_136 = arith.constant 0 : index
    %c0_137 = arith.constant 0 : index
    %c0_138 = arith.constant 0 : index
    %319 = vector.load %arg26[%c0_136, %c0_137, %c0_138] : memref<3x4x32xf32, #tpu.memory_space<vmem>>, vector<1x4x32xf32>
    %320 = vector.shape_cast %319 : vector<1x4x32xf32> to vector<4x32xf32>
    %321 = arith.addf %318, %320 : vector<4x32xf32>
    %c0_139 = arith.constant 0 : index
    %c0_140 = arith.constant 0 : index
    %c0_141 = arith.constant 0 : index
    %322 = vector.load %arg27[%c0_139, %c0_140, %c0_141] : memref<3x32x32xf32, #tpu.memory_space<vmem>>, vector<1x32x32xf32>
    %323 = vector.shape_cast %322 : vector<1x32x32xf32> to vector<32x32xf32>
    %cst_142 = arith.constant dense<0.000000e+00> : vector<16x32xf32>
    %324 = tpu.matmul %157, %323, %cst_142 {dimension_numbers = #tpu.dot_dimension_numbers<[1], [0], [0], [1], [0, 0, 1, 1], [], []>} : vector<16x32xf32>, vector<32x32xf32>, vector<16x32xf32> -> vector<16x32xf32>
    %c0_143 = arith.constant 0 : index
    %c0_144 = arith.constant 0 : index
    %c0_145 = arith.constant 0 : index
    %325 = vector.load %arg28[%c0_143, %c0_144, %c0_145] : memref<3x32x64xf32, #tpu.memory_space<vmem>>, vector<1x32x64xf32>
    %326 = vector.shape_cast %325 : vector<1x32x64xf32> to vector<32x64xf32>
    %cst_146 = arith.constant dense<0.000000e+00> : vector<4x64xf32>
    %327 = tpu.matmul %321, %326, %cst_146 {dimension_numbers = #tpu.dot_dimension_numbers<[1], [0], [0], [1], [0, 0, 1, 1], [], []>} : vector<4x32xf32>, vector<32x64xf32>, vector<4x64xf32> -> vector<4x64xf32>
    %328 = vector.extract_strided_slice %327 {offsets = [0, 0], sizes = [4, 32], strides = [1, 1]} : vector<4x64xf32> to vector<4x32xf32>
    %329 = vector.extract_strided_slice %327 {offsets = [0, 32], sizes = [4, 32], strides = [1, 1]} : vector<4x64xf32> to vector<4x32xf32>
    %cst_147 = arith.constant 0.000000e+00 : f32
    %330 = vector.broadcast %cst_147 : f32 to vector<16x4xf32>
    %331 = vector.extract_strided_slice %324 {offsets = [0, 0], sizes = [16, 16], strides = [1, 1]} : vector<16x32xf32> to vector<16x16xf32>
    %332 = vector.extract_strided_slice %328 {offsets = [0, 0], sizes = [4, 16], strides = [1, 1]} : vector<4x32xf32> to vector<4x16xf32>
    "tpu.trace_start"() <{level = 10 : i32, message = "nd,sd->ns"}> : () -> ()
    %cst_148 = arith.constant dense<0.000000e+00> : vector<16x4xf32>
    %333 = tpu.matmul %331, %332, %cst_148 {dimension_numbers = #tpu.dot_dimension_numbers<[1], [1], [0], [0], [0, 0, 1, 0], [], []>} : vector<16x16xf32>, vector<4x16xf32>, vector<16x4xf32> -> vector<16x4xf32>
    "tpu.trace_stop"() : () -> ()
    %cst_149 = arith.constant 2.500000e-01 : f32
    %334 = vector.broadcast %cst_149 : f32 to vector<16x4xf32>
    %335 = arith.mulf %333, %334 : vector<16x4xf32>
    %cst_150 = arith.constant dense<0xFF800000> : vector<16xf32>
    %336 = vector.multi_reduction <maximumf>, %335, %cst_150 [1] : vector<16x4xf32> to vector<16xf32>
    %337 = vector.shape_cast %336 : vector<16xf32> to vector<16x1xf32>
    %338 = vector.broadcast %337 : vector<16x1xf32> to vector<16x4xf32>
    %339 = arith.subf %335, %338 : vector<16x4xf32>
    %340 = math.exp %339 : vector<16x4xf32>
    %cst_151 = arith.constant dense<0.000000e+00> : vector<16xf32>
    %341 = vector.multi_reduction <add>, %340, %cst_151 [1] : vector<16x4xf32> to vector<16xf32>
    %342 = vector.shape_cast %341 : vector<16xf32> to vector<16x1xf32>
    %343 = vector.broadcast %342 : vector<16x1xf32> to vector<16x4xf32>
    %344 = arith.divf %340, %343 : vector<16x4xf32>
    %cst_152 = arith.constant 5.000000e-01 : f32
    %345 = vector.broadcast %cst_152 : f32 to vector<16x4xf32>
    %346 = arith.mulf %344, %345 : vector<16x4xf32>
    %347 = arith.addf %330, %346 : vector<16x4xf32>
    %348 = vector.extract_strided_slice %329 {offsets = [0, 0], sizes = [4, 16], strides = [1, 1]} : vector<4x32xf32> to vector<4x16xf32>
    "tpu.trace_start"() <{level = 10 : i32, message = "ns,sd->nd"}> : () -> ()
    %cst_153 = arith.constant dense<0.000000e+00> : vector<16x16xf32>
    %349 = tpu.matmul %344, %348, %cst_153 {dimension_numbers = #tpu.dot_dimension_numbers<[1], [0], [0], [1], [0, 0, 1, 1], [], []>} : vector<16x4xf32>, vector<4x16xf32>, vector<16x16xf32> -> vector<16x16xf32>
    "tpu.trace_stop"() : () -> ()
    %350 = vector.extract_strided_slice %324 {offsets = [0, 16], sizes = [16, 16], strides = [1, 1]} : vector<16x32xf32> to vector<16x16xf32>
    %351 = vector.extract_strided_slice %328 {offsets = [0, 16], sizes = [4, 16], strides = [1, 1]} : vector<4x32xf32> to vector<4x16xf32>
    "tpu.trace_start"() <{level = 10 : i32, message = "nd,sd->ns"}> : () -> ()
    %cst_154 = arith.constant dense<0.000000e+00> : vector<16x4xf32>
    %352 = tpu.matmul %350, %351, %cst_154 {dimension_numbers = #tpu.dot_dimension_numbers<[1], [1], [0], [0], [0, 0, 1, 0], [], []>} : vector<16x16xf32>, vector<4x16xf32>, vector<16x4xf32> -> vector<16x4xf32>
    "tpu.trace_stop"() : () -> ()
    %cst_155 = arith.constant 2.500000e-01 : f32
    %353 = vector.broadcast %cst_155 : f32 to vector<16x4xf32>
    %354 = arith.mulf %352, %353 : vector<16x4xf32>
    %cst_156 = arith.constant dense<0xFF800000> : vector<16xf32>
    %355 = vector.multi_reduction <maximumf>, %354, %cst_156 [1] : vector<16x4xf32> to vector<16xf32>
    %356 = vector.shape_cast %355 : vector<16xf32> to vector<16x1xf32>
    %357 = vector.broadcast %356 : vector<16x1xf32> to vector<16x4xf32>
    %358 = arith.subf %354, %357 : vector<16x4xf32>
    %359 = math.exp %358 : vector<16x4xf32>
    %cst_157 = arith.constant dense<0.000000e+00> : vector<16xf32>
    %360 = vector.multi_reduction <add>, %359, %cst_157 [1] : vector<16x4xf32> to vector<16xf32>
    %361 = vector.shape_cast %360 : vector<16xf32> to vector<16x1xf32>
    %362 = vector.broadcast %361 : vector<16x1xf32> to vector<16x4xf32>
    %363 = arith.divf %359, %362 : vector<16x4xf32>
    %cst_158 = arith.constant 5.000000e-01 : f32
    %364 = vector.broadcast %cst_158 : f32 to vector<16x4xf32>
    %365 = arith.mulf %363, %364 : vector<16x4xf32>
    %366 = arith.addf %347, %365 : vector<16x4xf32>
    %367 = vector.extract_strided_slice %329 {offsets = [0, 16], sizes = [4, 16], strides = [1, 1]} : vector<4x32xf32> to vector<4x16xf32>
    "tpu.trace_start"() <{level = 10 : i32, message = "ns,sd->nd"}> : () -> ()
    %cst_159 = arith.constant dense<0.000000e+00> : vector<16x16xf32>
    %368 = tpu.matmul %363, %367, %cst_159 {dimension_numbers = #tpu.dot_dimension_numbers<[1], [0], [0], [1], [0, 0, 1, 1], [], []>} : vector<16x4xf32>, vector<4x16xf32>, vector<16x16xf32> -> vector<16x16xf32>
    "tpu.trace_stop"() : () -> ()
    %369 = tpu.concatenate %349, %368 in 1 : vector<16x16xf32>, vector<16x16xf32> -> vector<16x32xf32>
    %c0_160 = arith.constant 0 : index
    %c0_161 = arith.constant 0 : index
    %c0_162 = arith.constant 0 : index
    %370 = vector.load %arg29[%c0_160, %c0_161, %c0_162] : memref<3x32x10xf32, #tpu.memory_space<vmem>>, vector<1x32x10xf32>
    %371 = vector.shape_cast %370 : vector<1x32x10xf32> to vector<32x10xf32>
    %cst_163 = arith.constant dense<0.000000e+00> : vector<16x10xf32>
    %372 = tpu.matmul %369, %371, %cst_163 {dimension_numbers = #tpu.dot_dimension_numbers<[1], [0], [0], [1], [0, 0, 1, 1], [], []>} : vector<16x32xf32>, vector<32x10xf32>, vector<16x10xf32> -> vector<16x10xf32>
    %c0_164 = arith.constant 0 : index
    %c0_165 = arith.constant 0 : index
    %c0_166 = arith.constant 0 : index
    %373 = vector.load %arg30[%c0_164, %c0_165, %c0_166] : memref<3x1x10xf32, #tpu.memory_space<vmem>>, vector<1x1x10xf32>
    %374 = vector.shape_cast %373 : vector<1x1x10xf32> to vector<1x10xf32>
    %375 = vector.broadcast %374 : vector<1x10xf32> to vector<16x10xf32>
    %376 = arith.addf %372, %375 : vector<16x10xf32>
    %cst_167 = arith.constant dense<0.000000e+00> : vector<10xf32>
    %377 = vector.multi_reduction <add>, %376, %cst_167 [0] : vector<16x10xf32> to vector<10xf32>
    %378 = vector.shape_cast %377 : vector<10xf32> to vector<1x10xf32>
    %cst_168 = arith.constant 1.600000e+01 : f32
    %379 = vector.broadcast %cst_168 : f32 to vector<1x10xf32>
    %380 = arith.divf %378, %379 : vector<1x10xf32>
    %c0_169 = arith.constant 0 : index
    %c0_170 = arith.constant 0 : index
    %c0_171 = arith.constant 0 : index
    %381 = vector.load %arg31[%c0_169, %c0_170, %c0_171] : memref<1x3x10xf32, #tpu.memory_space<vmem>>, vector<1x1x10xf32>
    %382 = vector.shape_cast %381 : vector<1x1x10xf32> to vector<1x10xf32>
    %383 = vector.shape_cast %380 : vector<1x10xf32> to vector<1x1x10xf32>
    tpu.vector_store %arg31[%c0_169, %c0_170, %c0_171], %383 {strides = array<i32>} : memref<1x3x10xf32, #tpu.memory_space<vmem>>, vector<1x1x10xf32>,
    %c0_172 = arith.constant 0 : index
    %c0_173 = arith.constant 0 : index
    %c0_174 = arith.constant 0 : index
    %c0_175 = arith.constant 0 : index
    %384 = vector.load %arg32[%c0_172, %c0_173, %c0_174, %c0_175] : memref<1x3x16x4xf32, #tpu.memory_space<vmem>>, vector<1x1x16x4xf32>
    %385 = vector.shape_cast %384 : vector<1x1x16x4xf32> to vector<16x4xf32>
    %386 = vector.shape_cast %366 : vector<16x4xf32> to vector<1x1x16x4xf32>
    tpu.vector_store %arg32[%c0_172, %c0_173, %c0_174, %c0_175], %386 {strides = array<i32>} : memref<1x3x16x4xf32, #tpu.memory_space<vmem>>, vector<1x1x16x4xf32>,
    %c1_176 = arith.constant 1 : index
    %c0_177 = arith.constant 0 : index
    %c0_178 = arith.constant 0 : index
    %387 = vector.load %arg19[%c1_176, %c0_177, %c0_178] : memref<3x6x32xf32, #tpu.memory_space<vmem>>, vector<1x6x32xf32>
    %388 = vector.shape_cast %387 : vector<1x6x32xf32> to vector<6x32xf32>
    %c1_179 = arith.constant 1 : index
    %c0_180 = arith.constant 0 : index
    %c0_181 = arith.constant 0 : index
    %389 = vector.load %arg21[%c1_179, %c0_180, %c0_181] : memref<3x4x32xf32, #tpu.memory_space<vmem>>, vector<1x4x32xf32>
    %390 = vector.shape_cast %389 : vector<1x4x32xf32> to vector<4x32xf32>
    %c1_182 = arith.constant 1 : index
    %c0_183 = arith.constant 0 : index
    %c0_184 = arith.constant 0 : index
    %391 = vector.load %arg23[%c1_182, %c0_183, %c0_184] : memref<3x2x96xf32, #tpu.memory_space<vmem>>, vector<1x2x96xf32>
    %392 = vector.shape_cast %391 : vector<1x2x96xf32> to vector<2x96xf32>
    %c1_185 = arith.constant 1 : index
    %c0_186 = arith.constant 0 : index
    %c0_187 = arith.constant 0 : index
    %393 = vector.load %arg25[%c1_185, %c0_186, %c0_187] : memref<3x2x32xf32, #tpu.memory_space<vmem>>, vector<1x2x32xf32>
    %394 = vector.shape_cast %393 : vector<1x2x32xf32> to vector<2x32xf32>
    %395 = vector.extract_strided_slice %388 {offsets = [0, 0], sizes = [1, 32], strides = [1, 1]} : vector<6x32xf32> to vector<1x32xf32>
    %396 = vector.extract_strided_slice %388 {offsets = [1, 0], sizes = [1, 32], strides = [1, 1]} : vector<6x32xf32> to vector<1x32xf32>
    %cst_188 = arith.constant dense<0.000000e+00> : vector<16xf32>
    %397 = vector.multi_reduction <add>, %157, %cst_188 [1] : vector<16x32xf32> to vector<16xf32>
    %398 = vector.shape_cast %397 : vector<16xf32> to vector<16x1xf32>
    %cst_189 = arith.constant 3.200000e+01 : f32
    %399 = vector.broadcast %cst_189 : f32 to vector<16x1xf32>
    %400 = arith.divf %398, %399 : vector<16x1xf32>
    %401 = vector.broadcast %400 : vector<16x1xf32> to vector<16x32xf32>
    %402 = arith.subf %157, %401 : vector<16x32xf32>
    %403 = arith.mulf %402, %402 : vector<16x32xf32>
    %cst_190 = arith.constant dense<0.000000e+00> : vector<16xf32>
    %404 = vector.multi_reduction <add>, %403, %cst_190 [1] : vector<16x32xf32> to vector<16xf32>
    %405 = vector.shape_cast %404 : vector<16xf32> to vector<16x1xf32>
    %cst_191 = arith.constant 3.200000e+01 : f32
    %406 = vector.broadcast %cst_191 : f32 to vector<16x1xf32>
    %407 = arith.divf %405, %406 : vector<16x1xf32>
    %408 = vector.broadcast %400 : vector<16x1xf32> to vector<16x32xf32>
    %409 = arith.subf %157, %408 : vector<16x32xf32>
    %cst_192 = arith.constant 9.99999974E-6 : f32
    %410 = vector.broadcast %cst_192 : f32 to vector<16x1xf32>
    %411 = arith.addf %407, %410 : vector<16x1xf32>
    %412 = math.rsqrt %411 : vector<16x1xf32>
    %413 = vector.broadcast %412 : vector<16x1xf32> to vector<16x32xf32>
    %414 = arith.mulf %409, %413 : vector<16x32xf32>
    %415 = vector.broadcast %395 : vector<1x32xf32> to vector<16x32xf32>
    %416 = arith.mulf %414, %415 : vector<16x32xf32>
    %417 = vector.broadcast %396 : vector<1x32xf32> to vector<16x32xf32>
    %418 = arith.addf %416, %417 : vector<16x32xf32>
    %c1_193 = arith.constant 1 : index
    %c1_194 = arith.constant 1 : index
    %c0_195 = arith.constant 0 : index
    %c0_196 = arith.constant 0 : index
    %419 = vector.load %arg20[%c1_193, %c1_194, %c0_195, %c0_196] : memref<3x3x32x32xf32, #tpu.memory_space<vmem>>, vector<1x1x32x32xf32>
    %420 = vector.shape_cast %419 : vector<1x1x32x32xf32> to vector<32x32xf32>
    %cst_197 = arith.constant dense<0.000000e+00> : vector<16x32xf32>
    %421 = tpu.matmul %418, %420, %cst_197 {dimension_numbers = #tpu.dot_dimension_numbers<[1], [0], [0], [1], [0, 0, 1, 1], [], []>} : vector<16x32xf32>, vector<32x32xf32>, vector<16x32xf32> -> vector<16x32xf32>
    %c1_198 = arith.constant 1 : index
    %c2_199 = arith.constant 2 : index
    %c0_200 = arith.constant 0 : index
    %c0_201 = arith.constant 0 : index
    %422 = vector.load %arg20[%c1_198, %c2_199, %c0_200, %c0_201] : memref<3x3x32x32xf32, #tpu.memory_space<vmem>>, vector<1x1x32x32xf32>
    %423 = vector.shape_cast %422 : vector<1x1x32x32xf32> to vector<32x32xf32>
    %cst_202 = arith.constant dense<0.000000e+00> : vector<16x32xf32>
    %424 = tpu.matmul %418, %423, %cst_202 {dimension_numbers = #tpu.dot_dimension_numbers<[1], [0], [0], [1], [0, 0, 1, 1], [], []>} : vector<16x32xf32>, vector<32x32xf32>, vector<16x32xf32> -> vector<16x32xf32>
    %425 = vector.extract_strided_slice %388 {offsets = [2, 0], sizes = [1, 32], strides = [1, 1]} : vector<6x32xf32> to vector<1x32xf32>
    %426 = vector.extract_strided_slice %388 {offsets = [3, 0], sizes = [1, 32], strides = [1, 1]} : vector<6x32xf32> to vector<1x32xf32>
    %cst_203 = arith.constant dense<0.000000e+00> : vector<4xf32>
    %427 = vector.multi_reduction <add>, %390, %cst_203 [1] : vector<4x32xf32> to vector<4xf32>
    %428 = vector.shape_cast %427 : vector<4xf32> to vector<4x1xf32>
    %cst_204 = arith.constant 3.200000e+01 : f32
    %429 = vector.broadcast %cst_204 : f32 to vector<4x1xf32>
    %430 = arith.divf %428, %429 : vector<4x1xf32>
    %431 = vector.broadcast %430 : vector<4x1xf32> to vector<4x32xf32>
    %432 = arith.subf %390, %431 : vector<4x32xf32>
    %433 = arith.mulf %432, %432 : vector<4x32xf32>
    %cst_205 = arith.constant dense<0.000000e+00> : vector<4xf32>
    %434 = vector.multi_reduction <add>, %433, %cst_205 [1] : vector<4x32xf32> to vector<4xf32>
    %435 = vector.shape_cast %434 : vector<4xf32> to vector<4x1xf32>
    %cst_206 = arith.constant 3.200000e+01 : f32
    %436 = vector.broadcast %cst_206 : f32 to vector<4x1xf32>
    %437 = arith.divf %435, %436 : vector<4x1xf32>
    %438 = vector.broadcast %430 : vector<4x1xf32> to vector<4x32xf32>
    %439 = arith.subf %390, %438 : vector<4x32xf32>
    %cst_207 = arith.constant 9.99999974E-6 : f32
    %440 = vector.broadcast %cst_207 : f32 to vector<4x1xf32>
    %441 = arith.addf %437, %440 : vector<4x1xf32>
    %442 = math.rsqrt %441 : vector<4x1xf32>
    %443 = vector.broadcast %442 : vector<4x1xf32> to vector<4x32xf32>
    %444 = arith.mulf %439, %443 : vector<4x32xf32>
    %445 = vector.broadcast %425 : vector<1x32xf32> to vector<4x32xf32>
    %446 = arith.mulf %444, %445 : vector<4x32xf32>
    %447 = vector.broadcast %426 : vector<1x32xf32> to vector<4x32xf32>
    %448 = arith.addf %446, %447 : vector<4x32xf32>
    %c1_208 = arith.constant 1 : index
    %c0_209 = arith.constant 0 : index
    %c0_210 = arith.constant 0 : index
    %c0_211 = arith.constant 0 : index
    %449 = vector.load %arg20[%c1_208, %c0_209, %c0_210, %c0_211] : memref<3x3x32x32xf32, #tpu.memory_space<vmem>>, vector<1x1x32x32xf32>
    %450 = vector.shape_cast %449 : vector<1x1x32x32xf32> to vector<32x32xf32>
    %cst_212 = arith.constant dense<0.000000e+00> : vector<4x32xf32>
    %451 = tpu.matmul %448, %450, %cst_212 {dimension_numbers = #tpu.dot_dimension_numbers<[1], [0], [0], [1], [0, 0, 1, 1], [], []>} : vector<4x32xf32>, vector<32x32xf32>, vector<4x32xf32> -> vector<4x32xf32>
    "tpu.trace_start"() <{level = 10 : i32, message = "nd,sd->ns"}> : () -> ()
    %cst_213 = arith.constant dense<0.000000e+00> : vector<16x4xf32>
    %452 = tpu.matmul %421, %451, %cst_213 {dimension_numbers = #tpu.dot_dimension_numbers<[1], [1], [0], [0], [0, 0, 1, 0], [], []>} : vector<16x32xf32>, vector<4x32xf32>, vector<16x4xf32> -> vector<16x4xf32>
    "tpu.trace_stop"() : () -> ()
    %cst_214 = arith.constant 0.176776692 : f32
    %453 = vector.broadcast %cst_214 : f32 to vector<16x4xf32>
    %454 = arith.mulf %452, %453 : vector<16x4xf32>
    %cst_215 = arith.constant dense<0xFF800000> : vector<16xf32>
    %455 = vector.multi_reduction <maximumf>, %454, %cst_215 [1] : vector<16x4xf32> to vector<16xf32>
    %456 = vector.shape_cast %455 : vector<16xf32> to vector<16x1xf32>
    %457 = vector.broadcast %456 : vector<16x1xf32> to vector<16x4xf32>
    %458 = arith.subf %454, %457 : vector<16x4xf32>
    %459 = math.exp %458 : vector<16x4xf32>
    %cst_216 = arith.constant dense<0.000000e+00> : vector<16xf32>
    %460 = vector.multi_reduction <add>, %459, %cst_216 [1] : vector<16x4xf32> to vector<16xf32>
    %461 = vector.shape_cast %460 : vector<16xf32> to vector<16x1xf32>
    %462 = vector.broadcast %461 : vector<16x1xf32> to vector<16x4xf32>
    %463 = arith.divf %459, %462 : vector<16x4xf32>
    %cst_217 = arith.constant 9.99999993E-9 : f32
    %464 = vector.broadcast %cst_217 : f32 to vector<16x4xf32>
    %465 = arith.addf %463, %464 : vector<16x4xf32>
    %cst_218 = arith.constant dense<0.000000e+00> : vector<4xf32>
    %466 = vector.multi_reduction <add>, %465, %cst_218 [0] : vector<16x4xf32> to vector<4xf32>
    %467 = vector.shape_cast %466 : vector<4xf32> to vector<1x4xf32>
    %468 = vector.broadcast %467 : vector<1x4xf32> to vector<16x4xf32>
    %469 = arith.divf %465, %468 : vector<16x4xf32>
    "tpu.trace_start"() <{level = 10 : i32, message = "ns,nd->sd"}> : () -> ()
    %cst_219 = arith.constant dense<0.000000e+00> : vector<4x32xf32>
    %470 = tpu.matmul %469, %424, %cst_219 {dimension_numbers = #tpu.dot_dimension_numbers<[0], [0], [1], [1], [0, 1, 1, 1], [], []>} : vector<16x4xf32>, vector<16x32xf32>, vector<4x32xf32> -> vector<4x32xf32>
    "tpu.trace_stop"() : () -> ()
    %c1_220 = arith.constant 1 : index
    %c0_221 = arith.constant 0 : index
    %c0_222 = arith.constant 0 : index
    %c0_223 = arith.constant 0 : index
    %471 = vector.load %arg22[%c1_220, %c0_221, %c0_222, %c0_223] : memref<3x2x32x96xf32, #tpu.memory_space<vmem>>, vector<1x1x32x96xf32>
    %472 = vector.shape_cast %471 : vector<1x1x32x96xf32> to vector<32x96xf32>
    %cst_224 = arith.constant dense<0.000000e+00> : vector<4x96xf32>
    %473 = tpu.matmul %470, %472, %cst_224 {dimension_numbers = #tpu.dot_dimension_numbers<[1], [0], [0], [1], [0, 0, 1, 1], [], []>} : vector<4x32xf32>, vector<32x96xf32>, vector<4x96xf32> -> vector<4x96xf32>
    %474 = vector.extract_strided_slice %392 {offsets = [0, 0], sizes = [1, 96], strides = [1, 1]} : vector<2x96xf32> to vector<1x96xf32>
    %475 = vector.broadcast %474 : vector<1x96xf32> to vector<4x96xf32>
    %476 = arith.addf %473, %475 : vector<4x96xf32>
    %c1_225 = arith.constant 1 : index
    %c1_226 = arith.constant 1 : index
    %c0_227 = arith.constant 0 : index
    %c0_228 = arith.constant 0 : index
    %477 = vector.load %arg22[%c1_225, %c1_226, %c0_227, %c0_228] : memref<3x2x32x96xf32, #tpu.memory_space<vmem>>, vector<1x1x32x96xf32>
    %478 = vector.shape_cast %477 : vector<1x1x32x96xf32> to vector<32x96xf32>
    %cst_229 = arith.constant dense<0.000000e+00> : vector<4x96xf32>
    %479 = tpu.matmul %390, %478, %cst_229 {dimension_numbers = #tpu.dot_dimension_numbers<[1], [0], [0], [1], [0, 0, 1, 1], [], []>} : vector<4x32xf32>, vector<32x96xf32>, vector<4x96xf32> -> vector<4x96xf32>
    %480 = vector.extract_strided_slice %392 {offsets = [1, 0], sizes = [1, 96], strides = [1, 1]} : vector<2x96xf32> to vector<1x96xf32>
    %481 = vector.broadcast %480 : vector<1x96xf32> to vector<4x96xf32>
    %482 = arith.addf %479, %481 : vector<4x96xf32>
    %483 = vector.extract_strided_slice %476 {offsets = [0, 0], sizes = [4, 32], strides = [1, 1]} : vector<4x96xf32> to vector<4x32xf32>
    %484 = vector.extract_strided_slice %482 {offsets = [0, 0], sizes = [4, 32], strides = [1, 1]} : vector<4x96xf32> to vector<4x32xf32>
    %485 = arith.addf %483, %484 : vector<4x32xf32>
    %486 = arith.negf %485 : vector<4x32xf32>
    %487 = math.exp %486 : vector<4x32xf32>
    %cst_230 = arith.constant 1.000000e+00 : f32
    %488 = vector.broadcast %cst_230 : f32 to vector<4x32xf32>
    %489 = arith.addf %488, %487 : vector<4x32xf32>
    %490 = arith.divf %488, %489 : vector<4x32xf32>
    %491 = vector.extract_strided_slice %476 {offsets = [0, 32], sizes = [4, 32], strides = [1, 1]} : vector<4x96xf32> to vector<4x32xf32>
    %492 = vector.extract_strided_slice %482 {offsets = [0, 32], sizes = [4, 32], strides = [1, 1]} : vector<4x96xf32> to vector<4x32xf32>
    %493 = arith.addf %491, %492 : vector<4x32xf32>
    %494 = arith.negf %493 : vector<4x32xf32>
    %495 = math.exp %494 : vector<4x32xf32>
    %cst_231 = arith.constant 1.000000e+00 : f32
    %496 = vector.broadcast %cst_231 : f32 to vector<4x32xf32>
    %497 = arith.addf %496, %495 : vector<4x32xf32>
    %498 = arith.divf %496, %497 : vector<4x32xf32>
    %499 = vector.extract_strided_slice %476 {offsets = [0, 64], sizes = [4, 32], strides = [1, 1]} : vector<4x96xf32> to vector<4x32xf32>
    %500 = vector.extract_strided_slice %482 {offsets = [0, 64], sizes = [4, 32], strides = [1, 1]} : vector<4x96xf32> to vector<4x32xf32>
    %501 = arith.mulf %490, %500 : vector<4x32xf32>
    %502 = arith.addf %499, %501 : vector<4x32xf32>
    %503 = math.tanh %502 : vector<4x32xf32>
    %cst_232 = arith.constant 1.000000e+00 : f32
    %504 = vector.broadcast %cst_232 : f32 to vector<4x32xf32>
    %505 = arith.subf %504, %498 : vector<4x32xf32>
    %506 = arith.mulf %505, %503 : vector<4x32xf32>
    %507 = arith.mulf %498, %390 : vector<4x32xf32>
    %508 = arith.addf %506, %507 : vector<4x32xf32>
    %509 = vector.extract_strided_slice %388 {offsets = [4, 0], sizes = [1, 32], strides = [1, 1]} : vector<6x32xf32> to vector<1x32xf32>
    %510 = vector.extract_strided_slice %388 {offsets = [5, 0], sizes = [1, 32], strides = [1, 1]} : vector<6x32xf32> to vector<1x32xf32>
    %cst_233 = arith.constant dense<0.000000e+00> : vector<4xf32>
    %511 = vector.multi_reduction <add>, %508, %cst_233 [1] : vector<4x32xf32> to vector<4xf32>
    %512 = vector.shape_cast %511 : vector<4xf32> to vector<4x1xf32>
    %cst_234 = arith.constant 3.200000e+01 : f32
    %513 = vector.broadcast %cst_234 : f32 to vector<4x1xf32>
    %514 = arith.divf %512, %513 : vector<4x1xf32>
    %515 = vector.broadcast %514 : vector<4x1xf32> to vector<4x32xf32>
    %516 = arith.subf %508, %515 : vector<4x32xf32>
    %517 = arith.mulf %516, %516 : vector<4x32xf32>
    %cst_235 = arith.constant dense<0.000000e+00> : vector<4xf32>
    %518 = vector.multi_reduction <add>, %517, %cst_235 [1] : vector<4x32xf32> to vector<4xf32>
    %519 = vector.shape_cast %518 : vector<4xf32> to vector<4x1xf32>
    %cst_236 = arith.constant 3.200000e+01 : f32
    %520 = vector.broadcast %cst_236 : f32 to vector<4x1xf32>
    %521 = arith.divf %519, %520 : vector<4x1xf32>
    %522 = vector.broadcast %514 : vector<4x1xf32> to vector<4x32xf32>
    %523 = arith.subf %508, %522 : vector<4x32xf32>
    %cst_237 = arith.constant 9.99999974E-6 : f32
    %524 = vector.broadcast %cst_237 : f32 to vector<4x1xf32>
    %525 = arith.addf %521, %524 : vector<4x1xf32>
    %526 = math.rsqrt %525 : vector<4x1xf32>
    %527 = vector.broadcast %526 : vector<4x1xf32> to vector<4x32xf32>
    %528 = arith.mulf %523, %527 : vector<4x32xf32>
    %529 = vector.broadcast %509 : vector<1x32xf32> to vector<4x32xf32>
    %530 = arith.mulf %528, %529 : vector<4x32xf32>
    %531 = vector.broadcast %510 : vector<1x32xf32> to vector<4x32xf32>
    %532 = arith.addf %530, %531 : vector<4x32xf32>
    %c1_238 = arith.constant 1 : index
    %c0_239 = arith.constant 0 : index
    %c0_240 = arith.constant 0 : index
    %c0_241 = arith.constant 0 : index
    %533 = vector.load %arg24[%c1_238, %c0_239, %c0_240, %c0_241] : memref<3x2x32x32xf32, #tpu.memory_space<vmem>>, vector<1x1x32x32xf32>
    %534 = vector.shape_cast %533 : vector<1x1x32x32xf32> to vector<32x32xf32>
    %cst_242 = arith.constant dense<0.000000e+00> : vector<4x32xf32>
    %535 = tpu.matmul %532, %534, %cst_242 {dimension_numbers = #tpu.dot_dimension_numbers<[1], [0], [0], [1], [0, 0, 1, 1], [], []>} : vector<4x32xf32>, vector<32x32xf32>, vector<4x32xf32> -> vector<4x32xf32>
    %536 = vector.extract_strided_slice %394 {offsets = [0, 0], sizes = [1, 32], strides = [1, 1]} : vector<2x32xf32> to vector<1x32xf32>
    %537 = vector.broadcast %536 : vector<1x32xf32> to vector<4x32xf32>
    %538 = arith.addf %535, %537 : vector<4x32xf32>
    %cst_243 = arith.constant 0.000000e+00 : f32
    %539 = vector.broadcast %cst_243 : f32 to vector<4x32xf32>
    %540 = arith.maximumf %538, %539 : vector<4x32xf32>
    %c1_244 = arith.constant 1 : index
    %c1_245 = arith.constant 1 : index
    %c0_246 = arith.constant 0 : index
    %c0_247 = arith.constant 0 : index
    %541 = vector.load %arg24[%c1_244, %c1_245, %c0_246, %c0_247] : memref<3x2x32x32xf32, #tpu.memory_space<vmem>>, vector<1x1x32x32xf32>
    %542 = vector.shape_cast %541 : vector<1x1x32x32xf32> to vector<32x32xf32>
    %cst_248 = arith.constant dense<0.000000e+00> : vector<4x32xf32>
    %543 = tpu.matmul %540, %542, %cst_248 {dimension_numbers = #tpu.dot_dimension_numbers<[1], [0], [0], [1], [0, 0, 1, 1], [], []>} : vector<4x32xf32>, vector<32x32xf32>, vector<4x32xf32> -> vector<4x32xf32>
    %544 = arith.addf %508, %543 : vector<4x32xf32>
    %545 = vector.extract_strided_slice %394 {offsets = [1, 0], sizes = [1, 32], strides = [1, 1]} : vector<2x32xf32> to vector<1x32xf32>
    %546 = vector.broadcast %545 : vector<1x32xf32> to vector<4x32xf32>
    %547 = arith.addf %544, %546 : vector<4x32xf32>
    %c1_249 = arith.constant 1 : index
    %c0_250 = arith.constant 0 : index
    %c0_251 = arith.constant 0 : index
    %548 = vector.load %arg26[%c1_249, %c0_250, %c0_251] : memref<3x4x32xf32, #tpu.memory_space<vmem>>, vector<1x4x32xf32>
    %549 = vector.shape_cast %548 : vector<1x4x32xf32> to vector<4x32xf32>
    %550 = arith.addf %547, %549 : vector<4x32xf32>
    %c1_252 = arith.constant 1 : index
    %c0_253 = arith.constant 0 : index
    %c0_254 = arith.constant 0 : index
    %551 = vector.load %arg27[%c1_252, %c0_253, %c0_254] : memref<3x32x32xf32, #tpu.memory_space<vmem>>, vector<1x32x32xf32>
    %552 = vector.shape_cast %551 : vector<1x32x32xf32> to vector<32x32xf32>
    %cst_255 = arith.constant dense<0.000000e+00> : vector<16x32xf32>
    %553 = tpu.matmul %157, %552, %cst_255 {dimension_numbers = #tpu.dot_dimension_numbers<[1], [0], [0], [1], [0, 0, 1, 1], [], []>} : vector<16x32xf32>, vector<32x32xf32>, vector<16x32xf32> -> vector<16x32xf32>
    %c1_256 = arith.constant 1 : index
    %c0_257 = arith.constant 0 : index
    %c0_258 = arith.constant 0 : index
    %554 = vector.load %arg28[%c1_256, %c0_257, %c0_258] : memref<3x32x64xf32, #tpu.memory_space<vmem>>, vector<1x32x64xf32>
    %555 = vector.shape_cast %554 : vector<1x32x64xf32> to vector<32x64xf32>
    %cst_259 = arith.constant dense<0.000000e+00> : vector<4x64xf32>
    %556 = tpu.matmul %550, %555, %cst_259 {dimension_numbers = #tpu.dot_dimension_numbers<[1], [0], [0], [1], [0, 0, 1, 1], [], []>} : vector<4x32xf32>, vector<32x64xf32>, vector<4x64xf32> -> vector<4x64xf32>
    %557 = vector.extract_strided_slice %556 {offsets = [0, 0], sizes = [4, 32], strides = [1, 1]} : vector<4x64xf32> to vector<4x32xf32>
    %558 = vector.extract_strided_slice %556 {offsets = [0, 32], sizes = [4, 32], strides = [1, 1]} : vector<4x64xf32> to vector<4x32xf32>
    %cst_260 = arith.constant 0.000000e+00 : f32
    %559 = vector.broadcast %cst_260 : f32 to vector<16x4xf32>
    %560 = vector.extract_strided_slice %553 {offsets = [0, 0], sizes = [16, 16], strides = [1, 1]} : vector<16x32xf32> to vector<16x16xf32>
    %561 = vector.extract_strided_slice %557 {offsets = [0, 0], sizes = [4, 16], strides = [1, 1]} : vector<4x32xf32> to vector<4x16xf32>
    "tpu.trace_start"() <{level = 10 : i32, message = "nd,sd->ns"}> : () -> ()
    %cst_261 = arith.constant dense<0.000000e+00> : vector<16x4xf32>
    %562 = tpu.matmul %560, %561, %cst_261 {dimension_numbers = #tpu.dot_dimension_numbers<[1], [1], [0], [0], [0, 0, 1, 0], [], []>} : vector<16x16xf32>, vector<4x16xf32>, vector<16x4xf32> -> vector<16x4xf32>
    "tpu.trace_stop"() : () -> ()
    %cst_262 = arith.constant 2.500000e-01 : f32
    %563 = vector.broadcast %cst_262 : f32 to vector<16x4xf32>
    %564 = arith.mulf %562, %563 : vector<16x4xf32>
    %cst_263 = arith.constant dense<0xFF800000> : vector<16xf32>
    %565 = vector.multi_reduction <maximumf>, %564, %cst_263 [1] : vector<16x4xf32> to vector<16xf32>
    %566 = vector.shape_cast %565 : vector<16xf32> to vector<16x1xf32>
    %567 = vector.broadcast %566 : vector<16x1xf32> to vector<16x4xf32>
    %568 = arith.subf %564, %567 : vector<16x4xf32>
    %569 = math.exp %568 : vector<16x4xf32>
    %cst_264 = arith.constant dense<0.000000e+00> : vector<16xf32>
    %570 = vector.multi_reduction <add>, %569, %cst_264 [1] : vector<16x4xf32> to vector<16xf32>
    %571 = vector.shape_cast %570 : vector<16xf32> to vector<16x1xf32>
    %572 = vector.broadcast %571 : vector<16x1xf32> to vector<16x4xf32>
    %573 = arith.divf %569, %572 : vector<16x4xf32>
    %cst_265 = arith.constant 5.000000e-01 : f32
    %574 = vector.broadcast %cst_265 : f32 to vector<16x4xf32>
    %575 = arith.mulf %573, %574 : vector<16x4xf32>
    %576 = arith.addf %559, %575 : vector<16x4xf32>
    %577 = vector.extract_strided_slice %558 {offsets = [0, 0], sizes = [4, 16], strides = [1, 1]} : vector<4x32xf32> to vector<4x16xf32>
    "tpu.trace_start"() <{level = 10 : i32, message = "ns,sd->nd"}> : () -> ()
    %cst_266 = arith.constant dense<0.000000e+00> : vector<16x16xf32>
    %578 = tpu.matmul %573, %577, %cst_266 {dimension_numbers = #tpu.dot_dimension_numbers<[1], [0], [0], [1], [0, 0, 1, 1], [], []>} : vector<16x4xf32>, vector<4x16xf32>, vector<16x16xf32> -> vector<16x16xf32>
    "tpu.trace_stop"() : () -> ()
    %579 = vector.extract_strided_slice %553 {offsets = [0, 16], sizes = [16, 16], strides = [1, 1]} : vector<16x32xf32> to vector<16x16xf32>
    %580 = vector.extract_strided_slice %557 {offsets = [0, 16], sizes = [4, 16], strides = [1, 1]} : vector<4x32xf32> to vector<4x16xf32>
    "tpu.trace_start"() <{level = 10 : i32, message = "nd,sd->ns"}> : () -> ()
    %cst_267 = arith.constant dense<0.000000e+00> : vector<16x4xf32>
    %581 = tpu.matmul %579, %580, %cst_267 {dimension_numbers = #tpu.dot_dimension_numbers<[1], [1], [0], [0], [0, 0, 1, 0], [], []>} : vector<16x16xf32>, vector<4x16xf32>, vector<16x4xf32> -> vector<16x4xf32>
    "tpu.trace_stop"() : () -> ()
    %cst_268 = arith.constant 2.500000e-01 : f32
    %582 = vector.broadcast %cst_268 : f32 to vector<16x4xf32>
    %583 = arith.mulf %581, %582 : vector<16x4xf32>
    %cst_269 = arith.constant dense<0xFF800000> : vector<16xf32>
    %584 = vector.multi_reduction <maximumf>, %583, %cst_269 [1] : vector<16x4xf32> to vector<16xf32>
    %585 = vector.shape_cast %584 : vector<16xf32> to vector<16x1xf32>
    %586 = vector.broadcast %585 : vector<16x1xf32> to vector<16x4xf32>
    %587 = arith.subf %583, %586 : vector<16x4xf32>
    %588 = math.exp %587 : vector<16x4xf32>
    %cst_270 = arith.constant dense<0.000000e+00> : vector<16xf32>
    %589 = vector.multi_reduction <add>, %588, %cst_270 [1] : vector<16x4xf32> to vector<16xf32>
    %590 = vector.shape_cast %589 : vector<16xf32> to vector<16x1xf32>
    %591 = vector.broadcast %590 : vector<16x1xf32> to vector<16x4xf32>
    %592 = arith.divf %588, %591 : vector<16x4xf32>
    %cst_271 = arith.constant 5.000000e-01 : f32
    %593 = vector.broadcast %cst_271 : f32 to vector<16x4xf32>
    %594 = arith.mulf %592, %593 : vector<16x4xf32>
    %595 = arith.addf %576, %594 : vector<16x4xf32>
    %596 = vector.extract_strided_slice %558 {offsets = [0, 16], sizes = [4, 16], strides = [1, 1]} : vector<4x32xf32> to vector<4x16xf32>
    "tpu.trace_start"() <{level = 10 : i32, message = "ns,sd->nd"}> : () -> ()
    %cst_272 = arith.constant dense<0.000000e+00> : vector<16x16xf32>
    %597 = tpu.matmul %592, %596, %cst_272 {dimension_numbers = #tpu.dot_dimension_numbers<[1], [0], [0], [1], [0, 0, 1, 1], [], []>} : vector<16x4xf32>, vector<4x16xf32>, vector<16x16xf32> -> vector<16x16xf32>
    "tpu.trace_stop"() : () -> ()
    %598 = tpu.concatenate %578, %597 in 1 : vector<16x16xf32>, vector<16x16xf32> -> vector<16x32xf32>
    %c1_273 = arith.constant 1 : index
    %c0_274 = arith.constant 0 : index
    %c0_275 = arith.constant 0 : index
    %599 = vector.load %arg29[%c1_273, %c0_274, %c0_275] : memref<3x32x10xf32, #tpu.memory_space<vmem>>, vector<1x32x10xf32>
    %600 = vector.shape_cast %599 : vector<1x32x10xf32> to vector<32x10xf32>
    %cst_276 = arith.constant dense<0.000000e+00> : vector<16x10xf32>
    %601 = tpu.matmul %598, %600, %cst_276 {dimension_numbers = #tpu.dot_dimension_numbers<[1], [0], [0], [1], [0, 0, 1, 1], [], []>} : vector<16x32xf32>, vector<32x10xf32>, vector<16x10xf32> -> vector<16x10xf32>
    %c1_277 = arith.constant 1 : index
    %c0_278 = arith.constant 0 : index
    %c0_279 = arith.constant 0 : index
    %602 = vector.load %arg30[%c1_277, %c0_278, %c0_279] : memref<3x1x10xf32, #tpu.memory_space<vmem>>, vector<1x1x10xf32>
    %603 = vector.shape_cast %602 : vector<1x1x10xf32> to vector<1x10xf32>
    %604 = vector.broadcast %603 : vector<1x10xf32> to vector<16x10xf32>
    %605 = arith.addf %601, %604 : vector<16x10xf32>
    %cst_280 = arith.constant dense<0.000000e+00> : vector<10xf32>
    %606 = vector.multi_reduction <add>, %605, %cst_280 [0] : vector<16x10xf32> to vector<10xf32>
    %607 = vector.shape_cast %606 : vector<10xf32> to vector<1x10xf32>
    %cst_281 = arith.constant 1.600000e+01 : f32
    %608 = vector.broadcast %cst_281 : f32 to vector<1x10xf32>
    %609 = arith.divf %607, %608 : vector<1x10xf32>
    %c0_282 = arith.constant 0 : index
    %c1_283 = arith.constant 1 : index
    %c0_284 = arith.constant 0 : index
    %610 = vector.load %arg31[%c0_282, %c1_283, %c0_284] : memref<1x3x10xf32, #tpu.memory_space<vmem>>, vector<1x1x10xf32>
    %611 = vector.shape_cast %610 : vector<1x1x10xf32> to vector<1x10xf32>
    %612 = vector.shape_cast %609 : vector<1x10xf32> to vector<1x1x10xf32>
    tpu.vector_store %arg31[%c0_282, %c1_283, %c0_284], %612 {strides = array<i32>} : memref<1x3x10xf32, #tpu.memory_space<vmem>>, vector<1x1x10xf32>,
    %c0_285 = arith.constant 0 : index
    %c1_286 = arith.constant 1 : index
    %c0_287 = arith.constant 0 : index
    %c0_288 = arith.constant 0 : index
    %613 = vector.load %arg32[%c0_285, %c1_286, %c0_287, %c0_288] : memref<1x3x16x4xf32, #tpu.memory_space<vmem>>, vector<1x1x16x4xf32>
    %614 = vector.shape_cast %613 : vector<1x1x16x4xf32> to vector<16x4xf32>
    %615 = vector.shape_cast %595 : vector<16x4xf32> to vector<1x1x16x4xf32>
    tpu.vector_store %arg32[%c0_285, %c1_286, %c0_287, %c0_288], %615 {strides = array<i32>} : memref<1x3x16x4xf32, #tpu.memory_space<vmem>>, vector<1x1x16x4xf32>,
    %c2_289 = arith.constant 2 : index
    %c0_290 = arith.constant 0 : index
    %c0_291 = arith.constant 0 : index
    %616 = vector.load %arg19[%c2_289, %c0_290, %c0_291] : memref<3x6x32xf32, #tpu.memory_space<vmem>>, vector<1x6x32xf32>
    %617 = vector.shape_cast %616 : vector<1x6x32xf32> to vector<6x32xf32>
    %c2_292 = arith.constant 2 : index
    %c0_293 = arith.constant 0 : index
    %c0_294 = arith.constant 0 : index
    %618 = vector.load %arg21[%c2_292, %c0_293, %c0_294] : memref<3x4x32xf32, #tpu.memory_space<vmem>>, vector<1x4x32xf32>
    %619 = vector.shape_cast %618 : vector<1x4x32xf32> to vector<4x32xf32>
    %c2_295 = arith.constant 2 : index
    %c0_296 = arith.constant 0 : index
    %c0_297 = arith.constant 0 : index
    %620 = vector.load %arg23[%c2_295, %c0_296, %c0_297] : memref<3x2x96xf32, #tpu.memory_space<vmem>>, vector<1x2x96xf32>
    %621 = vector.shape_cast %620 : vector<1x2x96xf32> to vector<2x96xf32>
    %c2_298 = arith.constant 2 : index
    %c0_299 = arith.constant 0 : index
    %c0_300 = arith.constant 0 : index
    %622 = vector.load %arg25[%c2_298, %c0_299, %c0_300] : memref<3x2x32xf32, #tpu.memory_space<vmem>>, vector<1x2x32xf32>
    %623 = vector.shape_cast %622 : vector<1x2x32xf32> to vector<2x32xf32>
    %624 = vector.extract_strided_slice %617 {offsets = [0, 0], sizes = [1, 32], strides = [1, 1]} : vector<6x32xf32> to vector<1x32xf32>
    %625 = vector.extract_strided_slice %617 {offsets = [1, 0], sizes = [1, 32], strides = [1, 1]} : vector<6x32xf32> to vector<1x32xf32>
    %cst_301 = arith.constant dense<0.000000e+00> : vector<16xf32>
    %626 = vector.multi_reduction <add>, %157, %cst_301 [1] : vector<16x32xf32> to vector<16xf32>
    %627 = vector.shape_cast %626 : vector<16xf32> to vector<16x1xf32>
    %cst_302 = arith.constant 3.200000e+01 : f32
    %628 = vector.broadcast %cst_302 : f32 to vector<16x1xf32>
    %629 = arith.divf %627, %628 : vector<16x1xf32>
    %630 = vector.broadcast %629 : vector<16x1xf32> to vector<16x32xf32>
    %631 = arith.subf %157, %630 : vector<16x32xf32>
    %632 = arith.mulf %631, %631 : vector<16x32xf32>
    %cst_303 = arith.constant dense<0.000000e+00> : vector<16xf32>
    %633 = vector.multi_reduction <add>, %632, %cst_303 [1] : vector<16x32xf32> to vector<16xf32>
    %634 = vector.shape_cast %633 : vector<16xf32> to vector<16x1xf32>
    %cst_304 = arith.constant 3.200000e+01 : f32
    %635 = vector.broadcast %cst_304 : f32 to vector<16x1xf32>
    %636 = arith.divf %634, %635 : vector<16x1xf32>
    %637 = vector.broadcast %629 : vector<16x1xf32> to vector<16x32xf32>
    %638 = arith.subf %157, %637 : vector<16x32xf32>
    %cst_305 = arith.constant 9.99999974E-6 : f32
    %639 = vector.broadcast %cst_305 : f32 to vector<16x1xf32>
    %640 = arith.addf %636, %639 : vector<16x1xf32>
    %641 = math.rsqrt %640 : vector<16x1xf32>
    %642 = vector.broadcast %641 : vector<16x1xf32> to vector<16x32xf32>
    %643 = arith.mulf %638, %642 : vector<16x32xf32>
    %644 = vector.broadcast %624 : vector<1x32xf32> to vector<16x32xf32>
    %645 = arith.mulf %643, %644 : vector<16x32xf32>
    %646 = vector.broadcast %625 : vector<1x32xf32> to vector<16x32xf32>
    %647 = arith.addf %645, %646 : vector<16x32xf32>
    %c2_306 = arith.constant 2 : index
    %c1_307 = arith.constant 1 : index
    %c0_308 = arith.constant 0 : index
    %c0_309 = arith.constant 0 : index
    %648 = vector.load %arg20[%c2_306, %c1_307, %c0_308, %c0_309] : memref<3x3x32x32xf32, #tpu.memory_space<vmem>>, vector<1x1x32x32xf32>
    %649 = vector.shape_cast %648 : vector<1x1x32x32xf32> to vector<32x32xf32>
    %cst_310 = arith.constant dense<0.000000e+00> : vector<16x32xf32>
    %650 = tpu.matmul %647, %649, %cst_310 {dimension_numbers = #tpu.dot_dimension_numbers<[1], [0], [0], [1], [0, 0, 1, 1], [], []>} : vector<16x32xf32>, vector<32x32xf32>, vector<16x32xf32> -> vector<16x32xf32>
    %c2_311 = arith.constant 2 : index
    %c2_312 = arith.constant 2 : index
    %c0_313 = arith.constant 0 : index
    %c0_314 = arith.constant 0 : index
    %651 = vector.load %arg20[%c2_311, %c2_312, %c0_313, %c0_314] : memref<3x3x32x32xf32, #tpu.memory_space<vmem>>, vector<1x1x32x32xf32>
    %652 = vector.shape_cast %651 : vector<1x1x32x32xf32> to vector<32x32xf32>
    %cst_315 = arith.constant dense<0.000000e+00> : vector<16x32xf32>
    %653 = tpu.matmul %647, %652, %cst_315 {dimension_numbers = #tpu.dot_dimension_numbers<[1], [0], [0], [1], [0, 0, 1, 1], [], []>} : vector<16x32xf32>, vector<32x32xf32>, vector<16x32xf32> -> vector<16x32xf32>
    %654 = vector.extract_strided_slice %617 {offsets = [2, 0], sizes = [1, 32], strides = [1, 1]} : vector<6x32xf32> to vector<1x32xf32>
    %655 = vector.extract_strided_slice %617 {offsets = [3, 0], sizes = [1, 32], strides = [1, 1]} : vector<6x32xf32> to vector<1x32xf32>
    %cst_316 = arith.constant dense<0.000000e+00> : vector<4xf32>
    %656 = vector.multi_reduction <add>, %619, %cst_316 [1] : vector<4x32xf32> to vector<4xf32>
    %657 = vector.shape_cast %656 : vector<4xf32> to vector<4x1xf32>
    %cst_317 = arith.constant 3.200000e+01 : f32
    %658 = vector.broadcast %cst_317 : f32 to vector<4x1xf32>
    %659 = arith.divf %657, %658 : vector<4x1xf32>
    %660 = vector.broadcast %659 : vector<4x1xf32> to vector<4x32xf32>
    %661 = arith.subf %619, %660 : vector<4x32xf32>
    %662 = arith.mulf %661, %661 : vector<4x32xf32>
    %cst_318 = arith.constant dense<0.000000e+00> : vector<4xf32>
    %663 = vector.multi_reduction <add>, %662, %cst_318 [1] : vector<4x32xf32> to vector<4xf32>
    %664 = vector.shape_cast %663 : vector<4xf32> to vector<4x1xf32>
    %cst_319 = arith.constant 3.200000e+01 : f32
    %665 = vector.broadcast %cst_319 : f32 to vector<4x1xf32>
    %666 = arith.divf %664, %665 : vector<4x1xf32>
    %667 = vector.broadcast %659 : vector<4x1xf32> to vector<4x32xf32>
    %668 = arith.subf %619, %667 : vector<4x32xf32>
    %cst_320 = arith.constant 9.99999974E-6 : f32
    %669 = vector.broadcast %cst_320 : f32 to vector<4x1xf32>
    %670 = arith.addf %666, %669 : vector<4x1xf32>
    %671 = math.rsqrt %670 : vector<4x1xf32>
    %672 = vector.broadcast %671 : vector<4x1xf32> to vector<4x32xf32>
    %673 = arith.mulf %668, %672 : vector<4x32xf32>
    %674 = vector.broadcast %654 : vector<1x32xf32> to vector<4x32xf32>
    %675 = arith.mulf %673, %674 : vector<4x32xf32>
    %676 = vector.broadcast %655 : vector<1x32xf32> to vector<4x32xf32>
    %677 = arith.addf %675, %676 : vector<4x32xf32>
    %c2_321 = arith.constant 2 : index
    %c0_322 = arith.constant 0 : index
    %c0_323 = arith.constant 0 : index
    %c0_324 = arith.constant 0 : index
    %678 = vector.load %arg20[%c2_321, %c0_322, %c0_323, %c0_324] : memref<3x3x32x32xf32, #tpu.memory_space<vmem>>, vector<1x1x32x32xf32>
    %679 = vector.shape_cast %678 : vector<1x1x32x32xf32> to vector<32x32xf32>
    %cst_325 = arith.constant dense<0.000000e+00> : vector<4x32xf32>
    %680 = tpu.matmul %677, %679, %cst_325 {dimension_numbers = #tpu.dot_dimension_numbers<[1], [0], [0], [1], [0, 0, 1, 1], [], []>} : vector<4x32xf32>, vector<32x32xf32>, vector<4x32xf32> -> vector<4x32xf32>
    "tpu.trace_start"() <{level = 10 : i32, message = "nd,sd->ns"}> : () -> ()
    %cst_326 = arith.constant dense<0.000000e+00> : vector<16x4xf32>
    %681 = tpu.matmul %650, %680, %cst_326 {dimension_numbers = #tpu.dot_dimension_numbers<[1], [1], [0], [0], [0, 0, 1, 0], [], []>} : vector<16x32xf32>, vector<4x32xf32>, vector<16x4xf32> -> vector<16x4xf32>
    "tpu.trace_stop"() : () -> ()
    %cst_327 = arith.constant 0.176776692 : f32
    %682 = vector.broadcast %cst_327 : f32 to vector<16x4xf32>
    %683 = arith.mulf %681, %682 : vector<16x4xf32>
    %cst_328 = arith.constant dense<0xFF800000> : vector<16xf32>
    %684 = vector.multi_reduction <maximumf>, %683, %cst_328 [1] : vector<16x4xf32> to vector<16xf32>
    %685 = vector.shape_cast %684 : vector<16xf32> to vector<16x1xf32>
    %686 = vector.broadcast %685 : vector<16x1xf32> to vector<16x4xf32>
    %687 = arith.subf %683, %686 : vector<16x4xf32>
    %688 = math.exp %687 : vector<16x4xf32>
    %cst_329 = arith.constant dense<0.000000e+00> : vector<16xf32>
    %689 = vector.multi_reduction <add>, %688, %cst_329 [1] : vector<16x4xf32> to vector<16xf32>
    %690 = vector.shape_cast %689 : vector<16xf32> to vector<16x1xf32>
    %691 = vector.broadcast %690 : vector<16x1xf32> to vector<16x4xf32>
    %692 = arith.divf %688, %691 : vector<16x4xf32>
    %cst_330 = arith.constant 9.99999993E-9 : f32
    %693 = vector.broadcast %cst_330 : f32 to vector<16x4xf32>
    %694 = arith.addf %692, %693 : vector<16x4xf32>
    %cst_331 = arith.constant dense<0.000000e+00> : vector<4xf32>
    %695 = vector.multi_reduction <add>, %694, %cst_331 [0] : vector<16x4xf32> to vector<4xf32>
    %696 = vector.shape_cast %695 : vector<4xf32> to vector<1x4xf32>
    %697 = vector.broadcast %696 : vector<1x4xf32> to vector<16x4xf32>
    %698 = arith.divf %694, %697 : vector<16x4xf32>
    "tpu.trace_start"() <{level = 10 : i32, message = "ns,nd->sd"}> : () -> ()
    %cst_332 = arith.constant dense<0.000000e+00> : vector<4x32xf32>
    %699 = tpu.matmul %698, %653, %cst_332 {dimension_numbers = #tpu.dot_dimension_numbers<[0], [0], [1], [1], [0, 1, 1, 1], [], []>} : vector<16x4xf32>, vector<16x32xf32>, vector<4x32xf32> -> vector<4x32xf32>
    "tpu.trace_stop"() : () -> ()
    %c2_333 = arith.constant 2 : index
    %c0_334 = arith.constant 0 : index
    %c0_335 = arith.constant 0 : index
    %c0_336 = arith.constant 0 : index
    %700 = vector.load %arg22[%c2_333, %c0_334, %c0_335, %c0_336] : memref<3x2x32x96xf32, #tpu.memory_space<vmem>>, vector<1x1x32x96xf32>
    %701 = vector.shape_cast %700 : vector<1x1x32x96xf32> to vector<32x96xf32>
    %cst_337 = arith.constant dense<0.000000e+00> : vector<4x96xf32>
    %702 = tpu.matmul %699, %701, %cst_337 {dimension_numbers = #tpu.dot_dimension_numbers<[1], [0], [0], [1], [0, 0, 1, 1], [], []>} : vector<4x32xf32>, vector<32x96xf32>, vector<4x96xf32> -> vector<4x96xf32>
    %703 = vector.extract_strided_slice %621 {offsets = [0, 0], sizes = [1, 96], strides = [1, 1]} : vector<2x96xf32> to vector<1x96xf32>
    %704 = vector.broadcast %703 : vector<1x96xf32> to vector<4x96xf32>
    %705 = arith.addf %702, %704 : vector<4x96xf32>
    %c2_338 = arith.constant 2 : index
    %c1_339 = arith.constant 1 : index
    %c0_340 = arith.constant 0 : index
    %c0_341 = arith.constant 0 : index
    %706 = vector.load %arg22[%c2_338, %c1_339, %c0_340, %c0_341] : memref<3x2x32x96xf32, #tpu.memory_space<vmem>>, vector<1x1x32x96xf32>
    %707 = vector.shape_cast %706 : vector<1x1x32x96xf32> to vector<32x96xf32>
    %cst_342 = arith.constant dense<0.000000e+00> : vector<4x96xf32>
    %708 = tpu.matmul %619, %707, %cst_342 {dimension_numbers = #tpu.dot_dimension_numbers<[1], [0], [0], [1], [0, 0, 1, 1], [], []>} : vector<4x32xf32>, vector<32x96xf32>, vector<4x96xf32> -> vector<4x96xf32>
    %709 = vector.extract_strided_slice %621 {offsets = [1, 0], sizes = [1, 96], strides = [1, 1]} : vector<2x96xf32> to vector<1x96xf32>
    %710 = vector.broadcast %709 : vector<1x96xf32> to vector<4x96xf32>
    %711 = arith.addf %708, %710 : vector<4x96xf32>
    %712 = vector.extract_strided_slice %705 {offsets = [0, 0], sizes = [4, 32], strides = [1, 1]} : vector<4x96xf32> to vector<4x32xf32>
    %713 = vector.extract_strided_slice %711 {offsets = [0, 0], sizes = [4, 32], strides = [1, 1]} : vector<4x96xf32> to vector<4x32xf32>
    %714 = arith.addf %712, %713 : vector<4x32xf32>
    %715 = arith.negf %714 : vector<4x32xf32>
    %716 = math.exp %715 : vector<4x32xf32>
    %cst_343 = arith.constant 1.000000e+00 : f32
    %717 = vector.broadcast %cst_343 : f32 to vector<4x32xf32>
    %718 = arith.addf %717, %716 : vector<4x32xf32>
    %719 = arith.divf %717, %718 : vector<4x32xf32>
    %720 = vector.extract_strided_slice %705 {offsets = [0, 32], sizes = [4, 32], strides = [1, 1]} : vector<4x96xf32> to vector<4x32xf32>
    %721 = vector.extract_strided_slice %711 {offsets = [0, 32], sizes = [4, 32], strides = [1, 1]} : vector<4x96xf32> to vector<4x32xf32>
    %722 = arith.addf %720, %721 : vector<4x32xf32>
    %723 = arith.negf %722 : vector<4x32xf32>
    %724 = math.exp %723 : vector<4x32xf32>
    %cst_344 = arith.constant 1.000000e+00 : f32
    %725 = vector.broadcast %cst_344 : f32 to vector<4x32xf32>
    %726 = arith.addf %725, %724 : vector<4x32xf32>
    %727 = arith.divf %725, %726 : vector<4x32xf32>
    %728 = vector.extract_strided_slice %705 {offsets = [0, 64], sizes = [4, 32], strides = [1, 1]} : vector<4x96xf32> to vector<4x32xf32>
    %729 = vector.extract_strided_slice %711 {offsets = [0, 64], sizes = [4, 32], strides = [1, 1]} : vector<4x96xf32> to vector<4x32xf32>
    %730 = arith.mulf %719, %729 : vector<4x32xf32>
    %731 = arith.addf %728, %730 : vector<4x32xf32>
    %732 = math.tanh %731 : vector<4x32xf32>
    %cst_345 = arith.constant 1.000000e+00 : f32
    %733 = vector.broadcast %cst_345 : f32 to vector<4x32xf32>
    %734 = arith.subf %733, %727 : vector<4x32xf32>
    %735 = arith.mulf %734, %732 : vector<4x32xf32>
    %736 = arith.mulf %727, %619 : vector<4x32xf32>
    %737 = arith.addf %735, %736 : vector<4x32xf32>
    %738 = vector.extract_strided_slice %617 {offsets = [4, 0], sizes = [1, 32], strides = [1, 1]} : vector<6x32xf32> to vector<1x32xf32>
    %739 = vector.extract_strided_slice %617 {offsets = [5, 0], sizes = [1, 32], strides = [1, 1]} : vector<6x32xf32> to vector<1x32xf32>
    %cst_346 = arith.constant dense<0.000000e+00> : vector<4xf32>
    %740 = vector.multi_reduction <add>, %737, %cst_346 [1] : vector<4x32xf32> to vector<4xf32>
    %741 = vector.shape_cast %740 : vector<4xf32> to vector<4x1xf32>
    %cst_347 = arith.constant 3.200000e+01 : f32
    %742 = vector.broadcast %cst_347 : f32 to vector<4x1xf32>
    %743 = arith.divf %741, %742 : vector<4x1xf32>
    %744 = vector.broadcast %743 : vector<4x1xf32> to vector<4x32xf32>
    %745 = arith.subf %737, %744 : vector<4x32xf32>
    %746 = arith.mulf %745, %745 : vector<4x32xf32>
    %cst_348 = arith.constant dense<0.000000e+00> : vector<4xf32>
    %747 = vector.multi_reduction <add>, %746, %cst_348 [1] : vector<4x32xf32> to vector<4xf32>
    %748 = vector.shape_cast %747 : vector<4xf32> to vector<4x1xf32>
    %cst_349 = arith.constant 3.200000e+01 : f32
    %749 = vector.broadcast %cst_349 : f32 to vector<4x1xf32>
    %750 = arith.divf %748, %749 : vector<4x1xf32>
    %751 = vector.broadcast %743 : vector<4x1xf32> to vector<4x32xf32>
    %752 = arith.subf %737, %751 : vector<4x32xf32>
    %cst_350 = arith.constant 9.99999974E-6 : f32
    %753 = vector.broadcast %cst_350 : f32 to vector<4x1xf32>
    %754 = arith.addf %750, %753 : vector<4x1xf32>
    %755 = math.rsqrt %754 : vector<4x1xf32>
    %756 = vector.broadcast %755 : vector<4x1xf32> to vector<4x32xf32>
    %757 = arith.mulf %752, %756 : vector<4x32xf32>
    %758 = vector.broadcast %738 : vector<1x32xf32> to vector<4x32xf32>
    %759 = arith.mulf %757, %758 : vector<4x32xf32>
    %760 = vector.broadcast %739 : vector<1x32xf32> to vector<4x32xf32>
    %761 = arith.addf %759, %760 : vector<4x32xf32>
    %c2_351 = arith.constant 2 : index
    %c0_352 = arith.constant 0 : index
    %c0_353 = arith.constant 0 : index
    %c0_354 = arith.constant 0 : index
    %762 = vector.load %arg24[%c2_351, %c0_352, %c0_353, %c0_354] : memref<3x2x32x32xf32, #tpu.memory_space<vmem>>, vector<1x1x32x32xf32>
    %763 = vector.shape_cast %762 : vector<1x1x32x32xf32> to vector<32x32xf32>
    %cst_355 = arith.constant dense<0.000000e+00> : vector<4x32xf32>
    %764 = tpu.matmul %761, %763, %cst_355 {dimension_numbers = #tpu.dot_dimension_numbers<[1], [0], [0], [1], [0, 0, 1, 1], [], []>} : vector<4x32xf32>, vector<32x32xf32>, vector<4x32xf32> -> vector<4x32xf32>
    %765 = vector.extract_strided_slice %623 {offsets = [0, 0], sizes = [1, 32], strides = [1, 1]} : vector<2x32xf32> to vector<1x32xf32>
    %766 = vector.broadcast %765 : vector<1x32xf32> to vector<4x32xf32>
    %767 = arith.addf %764, %766 : vector<4x32xf32>
    %cst_356 = arith.constant 0.000000e+00 : f32
    %768 = vector.broadcast %cst_356 : f32 to vector<4x32xf32>
    %769 = arith.maximumf %767, %768 : vector<4x32xf32>
    %c2_357 = arith.constant 2 : index
    %c1_358 = arith.constant 1 : index
    %c0_359 = arith.constant 0 : index
    %c0_360 = arith.constant 0 : index
    %770 = vector.load %arg24[%c2_357, %c1_358, %c0_359, %c0_360] : memref<3x2x32x32xf32, #tpu.memory_space<vmem>>, vector<1x1x32x32xf32>
    %771 = vector.shape_cast %770 : vector<1x1x32x32xf32> to vector<32x32xf32>
    %cst_361 = arith.constant dense<0.000000e+00> : vector<4x32xf32>
    %772 = tpu.matmul %769, %771, %cst_361 {dimension_numbers = #tpu.dot_dimension_numbers<[1], [0], [0], [1], [0, 0, 1, 1], [], []>} : vector<4x32xf32>, vector<32x32xf32>, vector<4x32xf32> -> vector<4x32xf32>
    %773 = arith.addf %737, %772 : vector<4x32xf32>
    %774 = vector.extract_strided_slice %623 {offsets = [1, 0], sizes = [1, 32], strides = [1, 1]} : vector<2x32xf32> to vector<1x32xf32>
    %775 = vector.broadcast %774 : vector<1x32xf32> to vector<4x32xf32>
    %776 = arith.addf %773, %775 : vector<4x32xf32>
    %c2_362 = arith.constant 2 : index
    %c0_363 = arith.constant 0 : index
    %c0_364 = arith.constant 0 : index
    %777 = vector.load %arg26[%c2_362, %c0_363, %c0_364] : memref<3x4x32xf32, #tpu.memory_space<vmem>>, vector<1x4x32xf32>
    %778 = vector.shape_cast %777 : vector<1x4x32xf32> to vector<4x32xf32>
    %779 = arith.addf %776, %778 : vector<4x32xf32>
    %c2_365 = arith.constant 2 : index
    %c0_366 = arith.constant 0 : index
    %c0_367 = arith.constant 0 : index
    %780 = vector.load %arg27[%c2_365, %c0_366, %c0_367] : memref<3x32x32xf32, #tpu.memory_space<vmem>>, vector<1x32x32xf32>
    %781 = vector.shape_cast %780 : vector<1x32x32xf32> to vector<32x32xf32>
    %cst_368 = arith.constant dense<0.000000e+00> : vector<16x32xf32>
    %782 = tpu.matmul %157, %781, %cst_368 {dimension_numbers = #tpu.dot_dimension_numbers<[1], [0], [0], [1], [0, 0, 1, 1], [], []>} : vector<16x32xf32>, vector<32x32xf32>, vector<16x32xf32> -> vector<16x32xf32>
    %c2_369 = arith.constant 2 : index
    %c0_370 = arith.constant 0 : index
    %c0_371 = arith.constant 0 : index
    %783 = vector.load %arg28[%c2_369, %c0_370, %c0_371] : memref<3x32x64xf32, #tpu.memory_space<vmem>>, vector<1x32x64xf32>
    %784 = vector.shape_cast %783 : vector<1x32x64xf32> to vector<32x64xf32>
    %cst_372 = arith.constant dense<0.000000e+00> : vector<4x64xf32>
    %785 = tpu.matmul %779, %784, %cst_372 {dimension_numbers = #tpu.dot_dimension_numbers<[1], [0], [0], [1], [0, 0, 1, 1], [], []>} : vector<4x32xf32>, vector<32x64xf32>, vector<4x64xf32> -> vector<4x64xf32>
    %786 = vector.extract_strided_slice %785 {offsets = [0, 0], sizes = [4, 32], strides = [1, 1]} : vector<4x64xf32> to vector<4x32xf32>
    %787 = vector.extract_strided_slice %785 {offsets = [0, 32], sizes = [4, 32], strides = [1, 1]} : vector<4x64xf32> to vector<4x32xf32>
    %cst_373 = arith.constant 0.000000e+00 : f32
    %788 = vector.broadcast %cst_373 : f32 to vector<16x4xf32>
    %789 = vector.extract_strided_slice %782 {offsets = [0, 0], sizes = [16, 16], strides = [1, 1]} : vector<16x32xf32> to vector<16x16xf32>
    %790 = vector.extract_strided_slice %786 {offsets = [0, 0], sizes = [4, 16], strides = [1, 1]} : vector<4x32xf32> to vector<4x16xf32>
    "tpu.trace_start"() <{level = 10 : i32, message = "nd,sd->ns"}> : () -> ()
    %cst_374 = arith.constant dense<0.000000e+00> : vector<16x4xf32>
    %791 = tpu.matmul %789, %790, %cst_374 {dimension_numbers = #tpu.dot_dimension_numbers<[1], [1], [0], [0], [0, 0, 1, 0], [], []>} : vector<16x16xf32>, vector<4x16xf32>, vector<16x4xf32> -> vector<16x4xf32>
    "tpu.trace_stop"() : () -> ()
    %cst_375 = arith.constant 2.500000e-01 : f32
    %792 = vector.broadcast %cst_375 : f32 to vector<16x4xf32>
    %793 = arith.mulf %791, %792 : vector<16x4xf32>
    %cst_376 = arith.constant dense<0xFF800000> : vector<16xf32>
    %794 = vector.multi_reduction <maximumf>, %793, %cst_376 [1] : vector<16x4xf32> to vector<16xf32>
    %795 = vector.shape_cast %794 : vector<16xf32> to vector<16x1xf32>
    %796 = vector.broadcast %795 : vector<16x1xf32> to vector<16x4xf32>
    %797 = arith.subf %793, %796 : vector<16x4xf32>
    %798 = math.exp %797 : vector<16x4xf32>
    %cst_377 = arith.constant dense<0.000000e+00> : vector<16xf32>
    %799 = vector.multi_reduction <add>, %798, %cst_377 [1] : vector<16x4xf32> to vector<16xf32>
    %800 = vector.shape_cast %799 : vector<16xf32> to vector<16x1xf32>
    %801 = vector.broadcast %800 : vector<16x1xf32> to vector<16x4xf32>
    %802 = arith.divf %798, %801 : vector<16x4xf32>
    %cst_378 = arith.constant 5.000000e-01 : f32
    %803 = vector.broadcast %cst_378 : f32 to vector<16x4xf32>
    %804 = arith.mulf %802, %803 : vector<16x4xf32>
    %805 = arith.addf %788, %804 : vector<16x4xf32>
    %806 = vector.extract_strided_slice %787 {offsets = [0, 0], sizes = [4, 16], strides = [1, 1]} : vector<4x32xf32> to vector<4x16xf32>
    "tpu.trace_start"() <{level = 10 : i32, message = "ns,sd->nd"}> : () -> ()
    %cst_379 = arith.constant dense<0.000000e+00> : vector<16x16xf32>
    %807 = tpu.matmul %802, %806, %cst_379 {dimension_numbers = #tpu.dot_dimension_numbers<[1], [0], [0], [1], [0, 0, 1, 1], [], []>} : vector<16x4xf32>, vector<4x16xf32>, vector<16x16xf32> -> vector<16x16xf32>
    "tpu.trace_stop"() : () -> ()
    %808 = vector.extract_strided_slice %782 {offsets = [0, 16], sizes = [16, 16], strides = [1, 1]} : vector<16x32xf32> to vector<16x16xf32>
    %809 = vector.extract_strided_slice %786 {offsets = [0, 16], sizes = [4, 16], strides = [1, 1]} : vector<4x32xf32> to vector<4x16xf32>
    "tpu.trace_start"() <{level = 10 : i32, message = "nd,sd->ns"}> : () -> ()
    %cst_380 = arith.constant dense<0.000000e+00> : vector<16x4xf32>
    %810 = tpu.matmul %808, %809, %cst_380 {dimension_numbers = #tpu.dot_dimension_numbers<[1], [1], [0], [0], [0, 0, 1, 0], [], []>} : vector<16x16xf32>, vector<4x16xf32>, vector<16x4xf32> -> vector<16x4xf32>
    "tpu.trace_stop"() : () -> ()
    %cst_381 = arith.constant 2.500000e-01 : f32
    %811 = vector.broadcast %cst_381 : f32 to vector<16x4xf32>
    %812 = arith.mulf %810, %811 : vector<16x4xf32>
    %cst_382 = arith.constant dense<0xFF800000> : vector<16xf32>
    %813 = vector.multi_reduction <maximumf>, %812, %cst_382 [1] : vector<16x4xf32> to vector<16xf32>
    %814 = vector.shape_cast %813 : vector<16xf32> to vector<16x1xf32>
    %815 = vector.broadcast %814 : vector<16x1xf32> to vector<16x4xf32>
    %816 = arith.subf %812, %815 : vector<16x4xf32>
    %817 = math.exp %816 : vector<16x4xf32>
    %cst_383 = arith.constant dense<0.000000e+00> : vector<16xf32>
    %818 = vector.multi_reduction <add>, %817, %cst_383 [1] : vector<16x4xf32> to vector<16xf32>
    %819 = vector.shape_cast %818 : vector<16xf32> to vector<16x1xf32>
    %820 = vector.broadcast %819 : vector<16x1xf32> to vector<16x4xf32>
    %821 = arith.divf %817, %820 : vector<16x4xf32>
    %cst_384 = arith.constant 5.000000e-01 : f32
    %822 = vector.broadcast %cst_384 : f32 to vector<16x4xf32>
    %823 = arith.mulf %821, %822 : vector<16x4xf32>
    %824 = arith.addf %805, %823 : vector<16x4xf32>
    %825 = vector.extract_strided_slice %787 {offsets = [0, 16], sizes = [4, 16], strides = [1, 1]} : vector<4x32xf32> to vector<4x16xf32>
    "tpu.trace_start"() <{level = 10 : i32, message = "ns,sd->nd"}> : () -> ()
    %cst_385 = arith.constant dense<0.000000e+00> : vector<16x16xf32>
    %826 = tpu.matmul %821, %825, %cst_385 {dimension_numbers = #tpu.dot_dimension_numbers<[1], [0], [0], [1], [0, 0, 1, 1], [], []>} : vector<16x4xf32>, vector<4x16xf32>, vector<16x16xf32> -> vector<16x16xf32>
    "tpu.trace_stop"() : () -> ()
    %827 = tpu.concatenate %807, %826 in 1 : vector<16x16xf32>, vector<16x16xf32> -> vector<16x32xf32>
    %c2_386 = arith.constant 2 : index
    %c0_387 = arith.constant 0 : index
    %c0_388 = arith.constant 0 : index
    %828 = vector.load %arg29[%c2_386, %c0_387, %c0_388] : memref<3x32x10xf32, #tpu.memory_space<vmem>>, vector<1x32x10xf32>
    %829 = vector.shape_cast %828 : vector<1x32x10xf32> to vector<32x10xf32>
    %cst_389 = arith.constant dense<0.000000e+00> : vector<16x10xf32>
    %830 = tpu.matmul %827, %829, %cst_389 {dimension_numbers = #tpu.dot_dimension_numbers<[1], [0], [0], [1], [0, 0, 1, 1], [], []>} : vector<16x32xf32>, vector<32x10xf32>, vector<16x10xf32> -> vector<16x10xf32>
    %c2_390 = arith.constant 2 : index
    %c0_391 = arith.constant 0 : index
    %c0_392 = arith.constant 0 : index
    %831 = vector.load %arg30[%c2_390, %c0_391, %c0_392] : memref<3x1x10xf32, #tpu.memory_space<vmem>>, vector<1x1x10xf32>
    %832 = vector.shape_cast %831 : vector<1x1x10xf32> to vector<1x10xf32>
    %833 = vector.broadcast %832 : vector<1x10xf32> to vector<16x10xf32>
    %834 = arith.addf %830, %833 : vector<16x10xf32>
    %cst_393 = arith.constant dense<0.000000e+00> : vector<10xf32>
    %835 = vector.multi_reduction <add>, %834, %cst_393 [0] : vector<16x10xf32> to vector<10xf32>
    %836 = vector.shape_cast %835 : vector<10xf32> to vector<1x10xf32>
    %cst_394 = arith.constant 1.600000e+01 : f32
    %837 = vector.broadcast %cst_394 : f32 to vector<1x10xf32>
    %838 = arith.divf %836, %837 : vector<1x10xf32>
    %c0_395 = arith.constant 0 : index
    %c2_396 = arith.constant 2 : index
    %c0_397 = arith.constant 0 : index
    %839 = vector.load %arg31[%c0_395, %c2_396, %c0_397] : memref<1x3x10xf32, #tpu.memory_space<vmem>>, vector<1x1x10xf32>
    %840 = vector.shape_cast %839 : vector<1x1x10xf32> to vector<1x10xf32>
    %841 = vector.shape_cast %838 : vector<1x10xf32> to vector<1x1x10xf32>
    tpu.vector_store %arg31[%c0_395, %c2_396, %c0_397], %841 {strides = array<i32>} : memref<1x3x10xf32, #tpu.memory_space<vmem>>, vector<1x1x10xf32>,
    %c0_398 = arith.constant 0 : index
    %c2_399 = arith.constant 2 : index
    %c0_400 = arith.constant 0 : index
    %c0_401 = arith.constant 0 : index
    %842 = vector.load %arg32[%c0_398, %c2_399, %c0_400, %c0_401] : memref<1x3x16x4xf32, #tpu.memory_space<vmem>>, vector<1x1x16x4xf32>
    %843 = vector.shape_cast %842 : vector<1x1x16x4xf32> to vector<16x4xf32>
    %844 = vector.shape_cast %824 : vector<16x4xf32> to vector<1x1x16x4xf32>
    tpu.vector_store %arg32[%c0_398, %c2_399, %c0_400, %c0_401], %844 {strides = array<i32>} : memref<1x3x16x4xf32, #tpu.memory_space<vmem>>, vector<1x1x16x4xf32>,
    return
  }
  func.func @transform_0(%arg0: i32) -> (i32, i32, i32) {
    %c0_i32 = arith.constant 0 : i32
    %c0_i32_0 = arith.constant 0 : i32
    %c0_i32_1 = arith.constant 0 : i32
    return %arg0, %c0_i32, %c0_i32_0 : i32, i32, i32
  }
  func.func @transform_1(%arg0: i32) -> (i32, i32) {
    %c0_i32 = arith.constant 0 : i32
    %c0_i32_0 = arith.constant 0 : i32
    %c0_i32_1 = arith.constant 0 : i32
    return %c0_i32, %c0_i32_0 : i32, i32
  }
  func.func @transform_2(%arg0: i32) -> (i32, i32) {
    %c0_i32 = arith.constant 0 : i32
    %c0_i32_0 = arith.constant 0 : i32
    %c0_i32_1 = arith.constant 0 : i32
    return %c0_i32, %c0_i32_0 : i32, i32
  }
  func.func @transform_3(%arg0: i32) -> (i32, i32) {
    %c0_i32 = arith.constant 0 : i32
    %c0_i32_0 = arith.constant 0 : i32
    %c0_i32_1 = arith.constant 0 : i32
    return %c0_i32, %c0_i32_0 : i32, i32
  }
  func.func @transform_4(%arg0: i32) -> (i32, i32) {
    %c0_i32 = arith.constant 0 : i32
    %c0_i32_0 = arith.constant 0 : i32
    %c0_i32_1 = arith.constant 0 : i32
    return %c0_i32, %c0_i32_0 : i32, i32
  }
  func.func @transform_5(%arg0: i32) -> (i32, i32) {
    %c0_i32 = arith.constant 0 : i32
    %c0_i32_0 = arith.constant 0 : i32
    %c0_i32_1 = arith.constant 0 : i32
    return %c0_i32, %c0_i32_0 : i32, i32
  }
  func.func @transform_6(%arg0: i32) -> (i32, i32) {
    %c0_i32 = arith.constant 0 : i32
    %c0_i32_0 = arith.constant 0 : i32
    %c0_i32_1 = arith.constant 0 : i32
    return %c0_i32, %c0_i32_0 : i32, i32
  }
  func.func @transform_7(%arg0: i32) -> (i32, i32) {
    %c0_i32 = arith.constant 0 : i32
    %c0_i32_0 = arith.constant 0 : i32
    %c0_i32_1 = arith.constant 0 : i32
    return %c0_i32, %c0_i32_0 : i32, i32
  }
  func.func @transform_8(%arg0: i32) -> (i32, i32) {
    %c0_i32 = arith.constant 0 : i32
    %c0_i32_0 = arith.constant 0 : i32
    %c0_i32_1 = arith.constant 0 : i32
    return %c0_i32, %c0_i32_0 : i32, i32
  }
  func.func @transform_9(%arg0: i32) -> (i32, i32) {
    %c0_i32 = arith.constant 0 : i32
    %c0_i32_0 = arith.constant 0 : i32
    %c0_i32_1 = arith.constant 0 : i32
    return %c0_i32, %c0_i32_0 : i32, i32
  }
  func.func @transform_10(%arg0: i32) -> (i32, i32) {
    %c0_i32 = arith.constant 0 : i32
    %c0_i32_0 = arith.constant 0 : i32
    %c0_i32_1 = arith.constant 0 : i32
    return %c0_i32, %c0_i32_0 : i32, i32
  }
  func.func @transform_11(%arg0: i32) -> (i32, i32) {
    %c0_i32 = arith.constant 0 : i32
    %c0_i32_0 = arith.constant 0 : i32
    %c0_i32_1 = arith.constant 0 : i32
    return %c0_i32, %c0_i32_0 : i32, i32
  }
  func.func @transform_12(%arg0: i32) -> (i32, i32) {
    %c0_i32 = arith.constant 0 : i32
    %c0_i32_0 = arith.constant 0 : i32
    %c0_i32_1 = arith.constant 0 : i32
    return %c0_i32, %c0_i32_0 : i32, i32
  }
  func.func @transform_13(%arg0: i32) -> (i32, i32) {
    %c0_i32 = arith.constant 0 : i32
    %c0_i32_0 = arith.constant 0 : i32
    %c0_i32_1 = arith.constant 0 : i32
    return %c0_i32, %c0_i32_0 : i32, i32
  }
  func.func @transform_14(%arg0: i32) -> (i32, i32) {
    %c0_i32 = arith.constant 0 : i32
    %c0_i32_0 = arith.constant 0 : i32
    %c0_i32_1 = arith.constant 0 : i32
    return %c0_i32, %c0_i32_0 : i32, i32
  }
  func.func @transform_15(%arg0: i32) -> (i32, i32) {
    %c0_i32 = arith.constant 0 : i32
    %c0_i32_0 = arith.constant 0 : i32
    %c0_i32_1 = arith.constant 0 : i32
    return %c0_i32, %c0_i32_0 : i32, i32
  }
  func.func @transform_16(%arg0: i32) -> (i32, i32) {
    %c0_i32 = arith.constant 0 : i32
    %c0_i32_0 = arith.constant 0 : i32
    %c0_i32_1 = arith.constant 0 : i32
    return %c0_i32, %c0_i32_0 : i32, i32
  }
  func.func @transform_17(%arg0: i32) -> (i32, i32) {
    %c0_i32 = arith.constant 0 : i32
    %c0_i32_0 = arith.constant 0 : i32
    %c0_i32_1 = arith.constant 0 : i32
    return %c0_i32, %c0_i32_0 : i32, i32
  }
  func.func @transform_18(%arg0: i32) -> (i32, i32, i32) {
    %c0_i32 = arith.constant 0 : i32
    %c0_i32_0 = arith.constant 0 : i32
    %c0_i32_1 = arith.constant 0 : i32
    %c0_i32_2 = arith.constant 0 : i32
    return %c0_i32, %c0_i32_0, %c0_i32_1 : i32, i32, i32
  }
  func.func @transform_19(%arg0: i32) -> (i32, i32, i32, i32) {
    %c0_i32 = arith.constant 0 : i32
    %c0_i32_0 = arith.constant 0 : i32
    %c0_i32_1 = arith.constant 0 : i32
    %c0_i32_2 = arith.constant 0 : i32
    %c0_i32_3 = arith.constant 0 : i32
    return %c0_i32, %c0_i32_0, %c0_i32_1, %c0_i32_2 : i32, i32, i32, i32
  }
  func.func @transform_20(%arg0: i32) -> (i32, i32, i32) {
    %c0_i32 = arith.constant 0 : i32
    %c0_i32_0 = arith.constant 0 : i32
    %c0_i32_1 = arith.constant 0 : i32
    %c0_i32_2 = arith.constant 0 : i32
    return %c0_i32, %c0_i32_0, %c0_i32_1 : i32, i32, i32
  }
  func.func @transform_21(%arg0: i32) -> (i32, i32, i32, i32) {
    %c0_i32 = arith.constant 0 : i32
    %c0_i32_0 = arith.constant 0 : i32
    %c0_i32_1 = arith.constant 0 : i32
    %c0_i32_2 = arith.constant 0 : i32
    %c0_i32_3 = arith.constant 0 : i32
    return %c0_i32, %c0_i32_0, %c0_i32_1, %c0_i32_2 : i32, i32, i32, i32
  }
  func.func @transform_22(%arg0: i32) -> (i32, i32, i32) {
    %c0_i32 = arith.constant 0 : i32
    %c0_i32_0 = arith.constant 0 : i32
    %c0_i32_1 = arith.constant 0 : i32
    %c0_i32_2 = arith.constant 0 : i32
    return %c0_i32, %c0_i32_0, %c0_i32_1 : i32, i32, i32
  }
  func.func @transform_23(%arg0: i32) -> (i32, i32, i32, i32) {
    %c0_i32 = arith.constant 0 : i32
    %c0_i32_0 = arith.constant 0 : i32
    %c0_i32_1 = arith.constant 0 : i32
    %c0_i32_2 = arith.constant 0 : i32
    %c0_i32_3 = arith.constant 0 : i32
    return %c0_i32, %c0_i32_0, %c0_i32_1, %c0_i32_2 : i32, i32, i32, i32
  }
  func.func @transform_24(%arg0: i32) -> (i32, i32, i32) {
    %c0_i32 = arith.constant 0 : i32
    %c0_i32_0 = arith.constant 0 : i32
    %c0_i32_1 = arith.constant 0 : i32
    %c0_i32_2 = arith.constant 0 : i32
    return %c0_i32, %c0_i32_0, %c0_i32_1 : i32, i32, i32
  }
  func.func @transform_25(%arg0: i32) -> (i32, i32, i32) {
    %c0_i32 = arith.constant 0 : i32
    %c0_i32_0 = arith.constant 0 : i32
    %c0_i32_1 = arith.constant 0 : i32
    %c0_i32_2 = arith.constant 0 : i32
    return %c0_i32, %c0_i32_0, %c0_i32_1 : i32, i32, i32
  }
  func.func @transform_26(%arg0: i32) -> (i32, i32, i32) {
    %c0_i32 = arith.constant 0 : i32
    %c0_i32_0 = arith.constant 0 : i32
    %c0_i32_1 = arith.constant 0 : i32
    %c0_i32_2 = arith.constant 0 : i32
    return %c0_i32, %c0_i32_0, %c0_i32_1 : i32, i32, i32
  }
  func.func @transform_27(%arg0: i32) -> (i32, i32, i32) {
    %c0_i32 = arith.constant 0 : i32
    %c0_i32_0 = arith.constant 0 : i32
    %c0_i32_1 = arith.constant 0 : i32
    %c0_i32_2 = arith.constant 0 : i32
    return %c0_i32, %c0_i32_0, %c0_i32_1 : i32, i32, i32
  }
  func.func @transform_28(%arg0: i32) -> (i32, i32, i32) {
    %c0_i32 = arith.constant 0 : i32
    %c0_i32_0 = arith.constant 0 : i32
    %c0_i32_1 = arith.constant 0 : i32
    %c0_i32_2 = arith.constant 0 : i32
    return %c0_i32, %c0_i32_0, %c0_i32_1 : i32, i32, i32
  }
  func.func @transform_29(%arg0: i32) -> (i32, i32, i32) {
    %c0_i32 = arith.constant 0 : i32
    %c0_i32_0 = arith.constant 0 : i32
    %c0_i32_1 = arith.constant 0 : i32
    %c0_i32_2 = arith.constant 0 : i32
    return %c0_i32, %c0_i32_0, %c0_i32_1 : i32, i32, i32
  }
  func.func @transform_30(%arg0: i32) -> (i32, i32, i32) {
    %c0_i32 = arith.constant 0 : i32
    %c0_i32_0 = arith.constant 0 : i32
    %c0_i32_1 = arith.constant 0 : i32
    return %arg0, %c0_i32, %c0_i32_0 : i32, i32, i32
  }
  func.func @transform_31(%arg0: i32) -> (i32, i32, i32, i32) {
    %c0_i32 = arith.constant 0 : i32
    %c0_i32_0 = arith.constant 0 : i32
    %c0_i32_1 = arith.constant 0 : i32
    %c0_i32_2 = arith.constant 0 : i32
    return %arg0, %c0_i32, %c0_i32_0, %c0_i32_1 : i32, i32, i32, i32
  }
}

</mosaic_0001>

<bundles_post_ra>
// kernel: slot_cswin_sa_forward.1
= control target key start
LH: loop header
LB: loop body
LE: loop exit
PB: predicated region body
PF: predicated region fallthrough
CT: control target
= control target key end

     0   :  { %s8719_s6 = smov 1   ;;  %s8720_s10 = smov 2   ;;  %s9930_s0 = inlined_call_operand.smem [shape: u32[32], index: -1, kind: input, shape index: {}] }
   0x1   :  { %s8768_s5 = sld [smem:[%s9930_s0]]   ;;  %s8721_s14 = smov 3  }
   0x2   :  { %s8773_s9 = sld [smem:[%s9930_s0 + %s8719_s6]]   ;;  %s8722_s18 = smov 4  }
   0x3   :  { %s8778_s13 = sld [smem:[%s9930_s0 + %s8720_s10]]   ;;  %s8723_s22 = smov 5  }
   0x4   :  { %s8783_s17 = sld [smem:[%s9930_s0 + %s8721_s14]]   ;;  %s8724_s26 = smov 6  }
   0x5   :  { %s8788_s21 = sld [smem:[%s9930_s0 + %s8722_s18]]   ;;  %s8725_s30 = smov 7  }
   0x6   :  { %s8793_s25 = sld [smem:[%s9930_s0 + %s8723_s22]]   ;;  %s8726_s4 = smov 8  }
   0x7   :  { %9960 = sst [smem:[#allocation2_spill]] %s8768_s5  ;;  %s8727_s10 = smov 9  }
   0x8   :  { %9961 = sst [smem:[#allocation3_spill]] %s8773_s9  ;;  %s8728_s15 = smov 10  }
   0x9   :  { %s8798_s29 = sld [smem:[%s9930_s0 + %s8724_s26]]   ;;  %s8729_s20 = smov 11  }
   0xa   :  { %s8803_s3 = sld [smem:[%s9930_s0 + %s8725_s30]]   ;;  %s8730_s26 = smov 12  }
   0xb   :  { %s8808_s8 = sld [smem:[%s9930_s0 + %s8726_s4]]   ;;  %s8731_s1 = smov 13  }
   0xc   :  { %s8813_s14 = sld [smem:[%s9930_s0 + %s8727_s10]]   ;;  %s8732_s7 = smov 14  }
   0xd   :  { %s8818_s19 = sld [smem:[%s9930_s0 + %s8728_s15]]   ;;  %s8733_s15 = smov 15  }
   0xe   :  { %s8823_s24 = sld [smem:[%s9930_s0 + %s8729_s20]]   ;;  %s8734_s22 = smov 16  }
   0xf   :  { %s8828_s30 = sld [smem:[%s9930_s0 + %s8730_s26]]   ;;  %s8735_s28 = smov 17  }
  0x10   :  { %9962 = sst [smem:[#allocation4_spill]] %s8803_s3 }
  0x11   :  { %9963 = sst [smem:[#allocation5_spill]] %s8808_s8 }
  0x12   :  { %s8833_s6 = sld [smem:[%s9930_s0 + %s8731_s1]]  }
  0x13   :  { %s8838_s12 = sld [smem:[%s9930_s0 + %s8732_s7]]   ;;  %s8736_s7 = smov 18  }
  0x14   :  { %s8843_s20 = sld [smem:[%s9930_s0 + %s8733_s15]]   ;;  %s8737_s15 = smov 19  }
  0x15   :  { %s8848_s27 = sld [smem:[%s9930_s0 + %s8734_s22]]   ;;  %s8738_s22 = smov 20  }
  0x16   :  { %s8853_s4 = sld [smem:[%s9930_s0 + %s8735_s28]]   ;;  %s8739_s28 = smov 21  }
  0x18   :  { %9964 = sst [smem:[#allocation6_spill]] %s8833_s6 }
  0x19   :  { %9965 = sst [smem:[#allocation7_spill]] %s8838_s12 }
  0x1a   :  { %9966 = sst [smem:[#allocation8_spill]] %s8843_s20 }
  0x1b   :  { %9967 = sst [smem:[#allocation9_spill]] %s8848_s27 }
  0x1c   :  { %9968 = sst [smem:[#allocation10_spill]] %s8853_s4 }
  0x1d   :  { %s8858_s12 = sld [smem:[%s9930_s0 + %s8736_s7]]   ;;  %s8740_s7 = smov 22  }
  0x1e   :  { %s8863_s20 = sld [smem:[%s9930_s0 + %s8737_s15]]   ;;  %s8741_s15 = smov 23  }
  0x1f   :  { %s8868_s27 = sld [smem:[%s9930_s0 + %s8738_s22]]   ;;  %s8742_s22 = smov 24  }
  0x20   :  { %s8873_s4 = sld [smem:[%s9930_s0 + %s8739_s28]]   ;;  %s8743_s28 = smov 25  }
  0x23   :  { %9969 = sst [smem:[#allocation11_spill]] %s8858_s12 }
  0x24   :  { %9970 = sst [smem:[#allocation12_spill]] %s8863_s20 }
  0x25   :  { %9971 = sst [smem:[#allocation13_spill]] %s8868_s27 }
  0x26   :  { %9972 = sst [smem:[#allocation14_spill]] %s8873_s4 }
  0x27   :  { %s8878_s12 = sld [smem:[%s9930_s0 + %s8740_s7]]   ;;  %s8744_s7 = smov 26  }
  0x28   :  { %s8883_s20 = sld [smem:[%s9930_s0 + %s8741_s15]]   ;;  %s8745_s15 = smov 27  }
  0x29   :  { %s8888_s27 = sld [smem:[%s9930_s0 + %s8742_s22]]   ;;  %s8746_s22 = smov 28  }
  0x2a   :  { %s8893_s4 = sld [smem:[%s9930_s0 + %s8743_s28]]   ;;  %s8747_s28 = smov 29  }
  0x2d   :  { %9973 = sst [smem:[#allocation15_spill]] %s8878_s12 }
  0x2e   :  { %9974 = sst [smem:[#allocation16_spill]] %s8883_s20 }
  0x2f   :  { %9975 = sst [smem:[#allocation17_spill]] %s8888_s27 }
  0x30   :  { %9976 = sst [smem:[#allocation18_spill]] %s8893_s4 }
  0x31   :  { %s8898_s12 = sld [smem:[%s9930_s0 + %s8744_s7]]   ;;  %s8748_s7 = smov 30  }
  0x32   :  { %s8903_s20 = sld [smem:[%s9930_s0 + %s8745_s15]]   ;;  %s8749_s15 = smov 31  }
  0x33   :  { %s8908_s27 = sld [smem:[%s9930_s0 + %s8746_s22]]   ;;  %s8925_s22 = smov 0  }
  0x34   :  { %s8913_s4 = sld [smem:[%s9930_s0 + %s8747_s28]]  }
  0x37   :  { %9977 = sst [smem:[#allocation19_spill]] %s8898_s12 }
  0x38   :  { %9978 = sst [smem:[#allocation20_spill]] %s8903_s20 }
  0x39   :  { %s8918_s12 = sld [smem:[%s9930_s0 + %s8748_s7]]  }
  0x3a   :  { %s8923_s20 = sld [smem:[%s9930_s0 + %s8749_s15]]  }
  0x3f   :  { %9979 = sst [smem:[#allocation21_spill]] %s8918_s12 }
  0x40 LB: > { %s9980_s9 = sld [smem:[#allocation3_spill]]  ;;  %s9981_s6 = sld [smem:[#allocation6_spill]]  ;;  %s8717_s22 = sphi %s8925_s22, %s74_s22  }
  0x41   : > { %s9982_s3 = sld [smem:[#allocation4_spill]]  ;;  %s7091_s23 = sadd.s32 4294967295, %s8717_s22  }
  0x42   : > { %p7095_p0 = scmp.ge.s32.totalorder %s8717_s22, 1  ;;  %p872_p1 = scmp.lt.s32.totalorder %s8717_s22, 3 }
  0x44   : > { %p873_p2 = pnand %p7095_p0, %p872_p1 }
  0x45   : > { %s9983_s5 = sld [smem:[#allocation2_spill]] (!%p873_p2)  ;;  %p956_p3 = scmp.lt.s32.totalorder (!%p873_p2), %s7091_s23, 1  ;;  %vm991_vm0 = vcmask (!%p873_p2), 392192   ;;  %v7100_v19 = vld [vmem:[%s8778_s13] ss:$0 sm:$0xff] (!%p873_p2)  ;;  %vm1123_vm1 = vcmask (!%p873_p2), 261120  }
  0x46   : > { %876 = sbr.rel (%p873_p2) target bundleno = 16469 (0x4055), region = 140  ;;  %v978_v0 = vld [vmem:[%s9980_s9] sm:$0xff] (!%p873_p2)  ;;  %v979_v1 = vld [vmem:[%s9980_s9 + $0x8] sm:$0xff] (!%p873_p2)  ;;  %v980_v2 = vld [vmem:[%s9980_s9 + $0x10] sm:$0xff] (!%p873_p2)  ;;  %s9945_s28 = smov (!%p873_p2), 32   ;;  %vm1301_vm2 = vcmask (!%p873_p2), 523264  }
  0x47   : > { %v8102_v3 = vpack.c.bf16 (!%p873_p2), %v979_v1, %v978_v0  ;;  %v981_v4 = vld [vmem:[%s9980_s9 + $0x18] sm:$0xff] (!%p873_p2)  ;;  %v982_v6 = vld [vmem:[%s9980_s9 + $0x20] sm:$0xff] (!%p873_p2)  ;;  %v983_v7 = vld [vmem:[%s9980_s9 + $0x28] sm:$0xff] (!%p873_p2)  ;;  %s9943_s1 = smov (!%p873_p2), 64   ;;  %s9947_s2 = smov (!%p873_p2), 96   ;;  %vm1304_vm3 = vcmask (!%p873_p2), 785408  }
  0x48   : > { %v8106_v5 = vpack.c.bf16 (!%p873_p2), %v981_v4, %v980_v2  ;;  %v8110_v8 = vpack.c.bf16 (!%p873_p2), %v983_v7, %v982_v6  ;;  %vm1467_vm4 = vcmask (!%p873_p2), 1043456   ;;  %s9984_s8 = sld [smem:[#allocation5_spill]] (!%p873_p2)  ;;  %vm1722_vm5 = vcmask (!%p873_p2), 1040384   ;;  %s9985_s7 = sld [smem:[#allocation7_spill]] (!%p873_p2) }
  0x49   : > { %8103 = vmatprep.subr.bf16.mxu0 (!%p873_p2), %v8102_v3  ;;  %s9986_s10 = sld [smem:[#allocation8_spill]] (!%p873_p2)  ;;  %s9987_s11 = sld [smem:[#allocation9_spill]] (!%p873_p2)  ;;  %vm2052_vm6 = vcmask (!%p873_p2), 64512   ;;  %vm2027_vm7 = vcmask (!%p873_p2), 1041408   ;;  %vm2029_vm8 = vcmask (!%p873_p2), 1042432   ;;  %vm2032_vm9 = vcmask (!%p873_p2), 1044480  }
  0x4a   : > { %8105 = vmatpush3.bf16.msra.mxu0 (!%p873_p2), %v8102_v3  ;;  %s9988_s15 = sld [smem:[#allocation10_spill]] (!%p873_p2)  ;;  %vm2034_vm10 = vcmask (!%p873_p2), 1045504   ;;  %s9989_s16 = sld [smem:[#allocation13_spill]] (!%p873_p2)  ;;  %vm2036_vm11 = vcmask (!%p873_p2), 1046528   ;;  %vm2342_vm12 = vcmask (!%p873_p2), 257024   ;;  %vm8755_vm13 = vmmov (!%p873_p2), 0  }
  0x4b   : > { %8107 = vmatprep.subr.bf16.mxu0 (!%p873_p2), %v8106_v5  ;;  %s9990_s18 = sld [smem:[#allocation12_spill]] (!%p873_p2)  ;;  %vm2529_vm14 = vcmask (!%p873_p2), 31744   ;;  %vm2598_vm15 = vcmask (!%p873_p2), 130048   ;;  %s10001_s12 = sld [smem:[#allocation21_spill]] (!%p873_p2) }
  0x4d   : > { %s10007_s23 = smov (!%p956_p3, %s7091_s23), 1 }
  0x4e   : > { %s7325_s0 = sshll.u32 %s10007_s23, 6  ;;  %8109 = vmatpush3.bf16.msra.mxu0 %v8106_v5 }
  0x4f   : > { %s960_s26 = scalar_lea.vmem %s9983_s5, %s7325_s0  ;;  %8111 = vmatprep.subr.bf16.mxu0 %v8110_v8  ;;  %s9991_s0 = sld [smem:[#allocation11_spill]] }
  0x50   : > { %v970_v9 = vld [vmem:[%s960_s26] sm:$0xff]  ;;  %v971_v10 = vld [vmem:[%s960_s26 + $0x8] sm:$0xff]  ;;  %v972_v11 = vld [vmem:[%s960_s26 + $0x10] sm:$0xff]  ;;  %s9999_s5 = smov 32  }
  0x51   : > { %7624 = vmatprep.mubr.msk.f32.mxu0 %vm991_vm0, %v970_v9  ;;  %v973_v12 = vld [vmem:[%s960_s26 + $0x18] sm:$0xff]  ;;  %v974_v13 = vld [vmem:[%s960_s26 + $0x20] sm:$0xff]  ;;  %v975_v14 = vld [vmem:[%s960_s26 + $0x28] sm:$0xff] }
  0x52   : > { %8113 = vmatpush3.bf16.msra.mxu0 %v8110_v8  ;;  %v976_v15 = vld [vmem:[%s960_s26 + $0x30] sm:$0xff]  ;;  %v977_v16 = vld [vmem:[%s960_s26 + $0x38] sm:$0xff]  ;;  %s9992_s26 = sld [smem:[#allocation14_spill]] }
  0x55   : > { %7625 = vmatmul.mubr.msk.f32.vlgmr.msra.gmra.mrb[0].mxu0 %vm991_vm0, %v971_v10 }
  0x56   : > { %7627 = vmatprep.mubr.msk.f32.mxu0 %vm991_vm0, %v972_v11 }
  0x59   : > { %7628 = vmatmul.mubr.msk.f32.gmra.mrb[2].mxu0 %vm991_vm0, %v973_v12 }
  0x5a   : > { %7630 = vmatprep.mubr.msk.f32.mxu0 %vm991_vm0, %v974_v13 }
  0x5d   : > { %7631 = vmatmul.mubr.msk.f32.gmra.mrb[4].mxu0 %vm991_vm0, %v975_v14 }
  0x5e   : > { %7633 = vmatprep.mubr.msk.f32.mxu0 %vm991_vm0, %v976_v15 }
  0x61   : > { %7634 = vmatmul.mubr.msk.f32.gmra.mrb[6].mxu0 %vm991_vm0, %v977_v16  ;;  %vm3748_vm0 = vcmask 80896  }
 0x128   : > { %v7626_v17 = vpop.f32.mrb[0].mxu0 }
 0x129   : > { %v1082_v18 = vpop.f32.mrb[1].mxu0  ;;  %v1088_v39 = vadd.f32 %v7626_v17, %v7100_v19 }
 0x12a   : > { %v1083_v36 = vadd.f32 %v7100_v19, %v1082_v18 }
 0x12b   : > { %v1127_v41 = vsel %vm1123_vm1, %v1088_v39, 0.0 }
 0x12c   : > { %v7629_v20 = vpop.f32.mrb[2].mxu0  ;;  %v1124_v40 = vsel %vm1123_vm1, %v1083_v36, 0.0 }
 0x12d   : > { %v1098_v21 = vadd.f32 %v7629_v20, %v7100_v19  ;;  %v1092_v22 = vpop.f32.mrb[3].mxu0 }
 0x12e   : > { %v1093_v23 = vadd.f32 %v7100_v19, %v1092_v22 }
 0x12f   : > { %v1133_v24 = vsel %vm1123_vm1, %v1098_v21, 0.0 }
 0x130   : > { %1134 = vadd.xlane.f32.xlu0 %v1133_v24  ;;  %v7632_v25 = vpop.f32.mrb[4].mxu0  ;;  %v1130_v30 = vsel %vm1123_vm1, %v1093_v23, 0.0 }
 0x131   : > { %v1108_v26 = vadd.f32 %v7632_v25, %v7100_v19  ;;  %v1102_v27 = vpop.f32.mrb[5].mxu0 }
 0x132   : > { %v1103_v28 = vadd.f32 %v7100_v19, %v1102_v27 }
 0x133   : > { %v1139_v29 = vsel %vm1123_vm1, %v1108_v26, 0.0 }
 0x134   : > { %1140 = vadd.xlane.f32.xlu1 %v1139_v29  ;;  %v7635_v31 = vpop.f32.mrb[6].mxu0  ;;  %1131 = vadd.xlane.f32.xlu0 %v1130_v30  ;;  %v1136_v35 = vsel %vm1123_vm1, %v1103_v28, 0.0 }
 0x135   : > { %v1118_v32 = vadd.f32 %v7635_v31, %v7100_v19  ;;  %v1112_v33 = vpop.f32.mrb[7].mxu0 }
 0x136   : > { %v1113_v34 = vadd.f32 %v7100_v19, %v1112_v33 }
 0x137   : > { %v1145_v38 = vsel %vm1123_vm1, %v1118_v32, 0.0 }
 0x138   : > { %1137 = vadd.xlane.f32.xlu1 %v1136_v35  ;;  %v1142_v37 = vsel %vm1123_vm1, %v1113_v34, 0.0 }
 0x139   : > { %1143 = vadd.xlane.f32.xlu0 %v1142_v37  ;;  %v7109_v37 = vld [vmem:[%s8783_s17] ss:$0 sm:$0xff] }
 0x13c   : > { %1146 = vadd.xlane.f32.xlu1 %v1145_v38 }
 0x13d   : > { %1125 = vadd.xlane.f32.xlu0 %v1124_v40 }
 0x140   : > { %1128 = vadd.xlane.f32.xlu1 %v1127_v41 }
 0x1bd   : > { %v1135_v42 = vpop.xlane.xlu0 %1134 }
 0x1be   : > { %v1152_v43 = vmul.f32 0.03125, %v1135_v42 }
 0x1c0   : > { %v8960_v44 = vsub.f32 %v1098_v21, %v1152_v43  ;;  %v7110_v43 = vld [vmem:[%s8788_s21] ss:$0 sm:$0xff] }
 0x1c1   : > { %v1141_v45 = vpop.xlane.xlu1 %1140  ;;  %v1132_v46 = vpop.xlane.xlu0 %1131 }
 0x1c2   : > { %v1154_v47 = vmul.f32 0.03125, %v1141_v45  ;;  %v1151_v48 = vmul.f32 0.03125, %v1132_v46  ;;  %v1168_v49 = vmul.f32 %v8960_v44, %v8960_v44 }
 0x1c4   : > { %v8964_v50 = vsub.f32 %v1108_v26, %v1154_v47  ;;  %v8966_v51 = vsub.f32 %v1093_v23, %v1151_v48  ;;  %v1182_v52 = vsel %vm1123_vm1, %v1168_v49, 0.0 }
 0x1c5   : > { %1183 = vadd.xlane.f32.xlu1 %v1182_v52  ;;  %v1138_v53 = vpop.xlane.xlu1 %1137 }
 0x1c6   : > { %v1153_v54 = vmul.f32 0.03125, %v1138_v53  ;;  %v1144_v55 = vpop.xlane.xlu0 %1143  ;;  %v1170_v56 = vmul.f32 %v8964_v50, %v8964_v50  ;;  %v1167_v57 = vmul.f32 %v8966_v51, %v8966_v51 }
 0x1c7   : > { %v1155_v58 = vmul.f32 0.03125, %v1144_v55 }
 0x1c8   : > { %v8973_v59 = vsub.f32 %v1103_v28, %v1153_v54  ;;  %v1188_v60 = vsel %vm1123_vm1, %v1170_v56, 0.0  ;;  %v1179_v61 = vsel %vm1123_vm1, %v1167_v57, 0.0 }
 0x1c9   : > { %v8977_v62 = vsub.f32 %v1113_v34, %v1155_v58  ;;  %1189 = vadd.xlane.f32.xlu1 %v1188_v60  ;;  %v1147_v63 = vpop.xlane.xlu1 %1146  ;;  %1180 = vadd.xlane.f32.xlu0 %v1179_v61 }
 0x1ca   : > { %v1156_v0 = vmul.f32 0.03125, %v1147_v63  ;;  %v1126_v1 = vpop.xlane.xlu0 %1125  ;;  %v1169_v2 = vmul.f32 %v8973_v59, %v8973_v59 }
 0x1cb   : > { %v1149_v3 = vmul.f32 0.03125, %v1126_v1  ;;  %v1171_v6 = vmul.f32 %v8977_v62, %v8977_v62 }
 0x1cc   : > { %v8981_v4 = vsub.f32 %v1118_v32, %v1156_v0  ;;  %v1185_v5 = vsel %vm1123_vm1, %v1169_v2, 0.0 }
 0x1cd   : > { %v8986_v7 = vsub.f32 %v1083_v36, %v1149_v3  ;;  %v1129_v8 = vpop.xlane.xlu1 %1128  ;;  %1186 = vadd.xlane.f32.xlu0 %v1185_v5  ;;  %v1191_v13 = vsel %vm1123_vm1, %v1171_v6, 0.0 }
 0x1ce   : > { %v1150_v9 = vmul.f32 0.03125, %v1129_v8  ;;  %v1172_v10 = vmul.f32 %v8981_v4, %v8981_v4 }
 0x1cf   : > { %v1165_v14 = vmul.f32 %v8986_v7, %v8986_v7 }
 0x1d0   : > { %v8990_v11 = vsub.f32 %v1088_v39, %v1150_v9  ;;  %v1194_v12 = vsel %vm1123_vm1, %v1172_v10, 0.0 }
 0x1d1   : > { %1195 = vadd.xlane.f32.xlu1 %v1194_v12  ;;  %1192 = vadd.xlane.f32.xlu0 %v1191_v13  ;;  %v1173_v17 = vsel %vm1123_vm1, %v1165_v14, 0.0 }
 0x1d2   : > { %v1166_v15 = vmul.f32 %v8990_v11, %v8990_v11 }
 0x1d4   : > { %v1176_v16 = vsel %vm1123_vm1, %v1166_v15, 0.0 }
 0x1d5   : > { %1177 = vadd.xlane.f32.xlu1 %v1176_v16  ;;  %1174 = vadd.xlane.f32.xlu0 %v1173_v17 }
 0x252   : > { %v1184_v18 = vpop.xlane.xlu1 %1183 }
 0x253   : > { %v1200_v19 = vmul.f32 0.03125, %v1184_v18 }
 0x255   : > { %v1208_v20 = vadd.f32 1e-05, %v1200_v19 }
 0x256   : > { %v1190_v21 = vpop.xlane.xlu1 %1189  ;;  %v1181_v22 = vpop.xlane.xlu0 %1180 }
 0x257   : > { %8573 = vrsqrt.f32 %v1208_v20  ;;  %v1202_v23 = vmul.f32 0.03125, %v1190_v21  ;;  %v1199_v24 = vmul.f32 0.03125, %v1181_v22 }
 0x259   : > { %v1210_v25 = vadd.f32 1e-05, %v1202_v23  ;;  %v1207_v26 = vadd.f32 1e-05, %v1199_v24  ;;  %v1259_v24 = vld [vmem:[%s9982_s3] sm:$0xff] }
 0x25a   : > { %v1187_v27 = vpop.xlane.xlu0 %1186 }
 0x25b   : > { %8575 = vrsqrt.f32 %v1210_v25  ;;  %v1201_v28 = vmul.f32 0.03125, %v1187_v27  ;;  %v1260_v25 = vld [vmem:[%s9982_s3 + $0x8] sm:$0xff] }
 0x25c   : > { %8577 = vrsqrt.f32 %v1207_v26  ;;  %v1261_v26 = vld [vmem:[%s9982_s3 + $0x10] sm:$0xff]  ;;  %v8114_v27 = vpack.c.bf16 %v1260_v25, %v1259_v24  ;;  %v1442_v25 = vld [vmem:[%s8818_s19 + $0x98] sm:$0xff] }
 0x25d   : > { %v1209_v29 = vadd.f32 1e-05, %v1201_v28  ;;  %v1262_v28 = vld [vmem:[%s9982_s3 + $0x18] sm:$0xff]  ;;  %v1441_v24 = vld [vmem:[%s8818_s19 + $0x90] sm:$0xff] }
 0x25e   : > { %v1196_v30 = vpop.xlane.xlu1 %1195  ;;  %v1193_v31 = vpop.xlane.xlu0 %1192  ;;  %8115 = vmatprep.subr.bf16.mxu1 %v8114_v27 }
 0x25f   : > { %8579 = vrsqrt.f32 %v1209_v29  ;;  %v1204_v32 = vmul.f32 0.03125, %v1196_v30  ;;  %v1203_v33 = vmul.f32 0.03125, %v1193_v31  ;;  %v8118_v29 = vpack.c.bf16 %v1262_v28, %v1261_v26  ;;  %8117 = vmatpush3.bf16.msra.mxu1 %v8114_v27  ;;  %v1425_v28 = vld [vmem:[%s8818_s19 + $0x10] sm:$0xff] }
 0x260   : > { %v8150_v27 = vpack.c.bf16 %v1442_v25, %v1441_v24 }
 0x261   : > { %v8574_v34 = vpop.eup %8573  ;;  %v1212_v35 = vadd.f32 1e-05, %v1204_v32  ;;  %v1211_v36 = vadd.f32 1e-05, %v1203_v33  ;;  %8119 = vmatprep.subr.bf16.mxu1 %v8118_v29 }
 0x262   : > { %v1178_v38 = vpop.xlane.xlu1 %1177  ;;  %v1175_v39 = vpop.xlane.xlu0 %1174  ;;  %v1224_v40 = vmul.f32 %v8574_v34, %v8960_v44 }
 0x263   : > { %8581 = vrsqrt.f32 %v1212_v35  ;;  %v1198_v41 = vmul.f32 0.03125, %v1178_v38  ;;  %v1197_v42 = vmul.f32 0.03125, %v1175_v39  ;;  %8121 = vmatpush3.bf16.msra.mxu1 %v8118_v29  ;;  %v1263_v38 = vld [vmem:[%s9982_s3 + $0x20] sm:$0xff]  ;;  %v1264_v39 = vld [vmem:[%s9982_s3 + $0x28] sm:$0xff]  ;;  %v1426_v29 = vld [vmem:[%s8818_s19 + $0x18] sm:$0xff] }
 0x264   : > { %8583 = vrsqrt.f32 %v1211_v36  ;;  %v1238_v45 = vmul.f32 %v7109_v37, %v1224_v40  ;;  %v8122_v40 = vpack.c.bf16 %v1264_v39, %v1263_v38 }
 0x265   : > { %v8576_v46 = vpop.eup %8575  ;;  %v1206_v47 = vadd.f32 1e-05, %v1198_v41  ;;  %v1205_v48 = vadd.f32 1e-05, %v1197_v42  ;;  %v1265_v41 = vld [vmem:[%s9982_s3 + $0x30] sm:$0xff]  ;;  %v1266_v42 = vld [vmem:[%s9982_s3 + $0x38] sm:$0xff] }
 0x266   : > { %v8578_v49 = vpop.eup %8577  ;;  %v1252_v52 = vadd.f32 %v7110_v43, %v1238_v45  ;;  %v1226_v53 = vmul.f32 %v8576_v46, %v8964_v50  ;;  %8123 = vmatprep.subr.bf16.mxu1 %v8122_v40  ;;  %v1267_v45 = vld [vmem:[%s9982_s3 + $0x40] sm:$0xff]  ;;  %v1268_v46 = vld [vmem:[%s9982_s3 + $0x48] sm:$0xff] }
 0x267   : > { %8585 = vrsqrt.f32 %v1206_v47  ;;  %v1223_v54 = vmul.f32 %v8578_v49, %v8966_v51  ;;  %8125 = vmatpush3.bf16.msra.mxu1 %v8122_v40  ;;  %v8130_v47 = vpack.c.bf16 %v1268_v46, %v1267_v45  ;;  %v1270_v49 = vld [vmem:[%s9982_s3 + $0x58] sm:$0xff] }
 0x268   : > { %8587 = vrsqrt.f32 %v1205_v48  ;;  %1279 = vrot.lane.b32.xlu1 %v1252_v52, %s9945_s28  ;;  %v1240_v44 = vmul.f32 %v7109_v37, %v1226_v53  ;;  %v1269_v48 = vld [vmem:[%s9982_s3 + $0x50] sm:$0xff]  ;;  %v1271_v52 = vld [vmem:[%s9982_s3 + $0x60] sm:$0xff] }
 0x269   : > { %v8580_v55 = vpop.eup %8579  ;;  %v1237_v56 = vmul.f32 %v7109_v37, %v1223_v54  ;;  %v8134_v53 = vpack.c.bf16 %v1270_v49, %v1269_v48  ;;  %v1272_v54 = vld [vmem:[%s9982_s3 + $0x68] sm:$0xff]  ;;  %v1446_v48 = vld [vmem:[%s8818_s19 + $0xb8] sm:$0xff] }
 0x26a   : > { %v1254_v57 = vadd.f32 %v7110_v43, %v1240_v44  ;;  %v1225_v58 = vmul.f32 %v8580_v55, %v8973_v59  ;;  %v8138_v44 = vpack.c.bf16 %v1272_v54, %v1271_v52  ;;  %v1273_v55 = vld [vmem:[%s9982_s3 + $0x70] sm:$0xff] }
 0x26b   : > { %v1251_v60 = vadd.f32 %v7110_v43, %v1237_v56  ;;  %v1274_v56 = vld [vmem:[%s9982_s3 + $0x78] sm:$0xff]  ;;  %v1429_v52 = vld [vmem:[%s8818_s19 + $0x30] sm:$0xff]  ;;  %s9998_s3 = sld [smem:[#allocation20_spill]] }
 0x26c   : > { %1287 = vrot.lane.b32.xlu1 %v1254_v57, %s9943_s1  ;;  %v1239_v61 = vmul.f32 %v7109_v37, %v1225_v58  ;;  %v8142_v57 = vpack.c.bf16 %v1274_v56, %v1273_v55  ;;  %v1448_v55 = vld [vmem:[%s8818_s19 + $0xc8] sm:$0xff] }
 0x26d   : > { %v8582_v63 = vpop.eup %8581  ;;  %1277 = vrot.lane.b32.xlu0 %v1251_v60, %s9945_s28 }
 0x26e   : > { %v8584_v50 = vpop.eup %8583  ;;  %v1253_v51 = vadd.f32 %v7110_v43, %v1239_v61  ;;  %v1228_v0 = vmul.f32 %v8582_v63, %v8981_v4 }
 0x26f   : > { %v1227_v1 = vmul.f32 %v8584_v50, %v8977_v62 }
 0x270   : > { %1285 = vrot.lane.b32.xlu1 %v1253_v51, %s9943_s1  ;;  %v1242_v2 = vmul.f32 %v7109_v37, %v1228_v0 }
 0x271   : > { %v8586_v3 = vpop.eup %8585  ;;  %v1241_v5 = vmul.f32 %v7109_v37, %v1227_v1  ;;  %v7111_v1 = vld [vmem:[%s8793_s25] ss:$0 sm:$0xff] }
 0x272   : > { %v8588_v59 = vpop.eup %8587  ;;  %v1256_v6 = vadd.f32 %v7110_v43, %v1242_v2  ;;  %v1222_v8 = vmul.f32 %v8586_v3, %v8990_v11  ;;  %v7112_v3 = vld [vmem:[%s8798_s29] ss:$0 sm:$0xff] }
 0x273   : > { %v1255_v9 = vadd.f32 %v7110_v43, %v1241_v5  ;;  %v1221_v10 = vmul.f32 %v8588_v59, %v8986_v7 }
 0x274   : > { %1295 = vrot.lane.b32.xlu1 %v1256_v6, %s9947_s2  ;;  %v1236_v12 = vmul.f32 %v7109_v37, %v1222_v8 }
 0x275   : > { %1293 = vrot.lane.b32.xlu0 %v1255_v9, %s9947_s2  ;;  %v1235_v4 = vmul.f32 %v7109_v37, %v1221_v10 }
 0x276   : > { %v1250_v62 = vadd.f32 %v7110_v43, %v1236_v12 }
 0x277   : > { %v1249_v13 = vadd.f32 %v7110_v43, %v1235_v4  ;;  %v8126_v43 = vpack.c.bf16 %v1266_v42, %v1265_v41 }
 0x279   : > { %8127 = vmatprep.subr.bf16.mxu1 %v8126_v43 }
 0x27a   : > { %8129 = vmatpush3.bf16.msra.mxu1 %v8126_v43 }
 0x27b   : > { %8131 = vmatprep.subr.bf16.mxu1 %v8130_v47 }
 0x27e   : > { %8133 = vmatpush3.bf16.msra.mxu1 %v8130_v47  ;;  %v1445_v47 = vld [vmem:[%s8818_s19 + $0xb0] sm:$0xff] }
 0x27f   : > { %8135 = vmatprep.subr.bf16.mxu1 %v8134_v53  ;;  %v8158_v49 = vpack.c.bf16 %v1446_v48, %v1445_v47  ;;  %v1590_v47 = vld [vmem:[%s9981_s6 + $0x18] sm:$0xff]  ;;  %v1587_v48 = vld [vmem:[%s9981_s6] sm:$0xff] }
 0x282   : > { %8137 = vmatpush3.bf16.msra.mxu1 %v8134_v53  ;;  %v1430_v53 = vld [vmem:[%s8818_s19 + $0x38] sm:$0xff] }
 0x283   : > { %8139 = vmatprep.subr.bf16.mxu1 %v8138_v44  ;;  %v8160_v54 = vpack.c.bf16 %v1430_v53, %v1429_v52  ;;  %v1589_v52 = vld [vmem:[%s9981_s6 + $0x10] sm:$0xff]  ;;  %v1592_v53 = vld [vmem:[%s9981_s6 + $0x28] sm:$0xff] }
 0x286   : > { %8141 = vmatpush3.bf16.msra.mxu1 %v8138_v44  ;;  %v1447_v44 = vld [vmem:[%s8818_s19 + $0xc0] sm:$0xff] }
 0x287   : > { %8143 = vmatprep.subr.bf16.mxu1 %v8142_v57  ;;  %v8162_v56 = vpack.c.bf16 %v1448_v55, %v1447_v44  ;;  %v8180_v44 = vpack.c.bf16 %v1589_v52, %v1587_v48  ;;  %v1628_v48 = vld [vmem:[%s9981_s6 + $0x148] sm:$0xff] }
 0x28a   : > { %8145 = vmatpush3.bf16.msra.mxu1 %v8142_v57  ;;  %v1431_v57 = vld [vmem:[%s8818_s19 + $0x40] sm:$0xff] }
 0x2da   : > { %v1280_v14 = vpop.permute.xlu1 %1279 }
 0x2db   : > { %v1300_v7 = vsel %vm1123_vm1, %v1250_v62, %v1280_v14 }
 0x2de   : > { %v1288_v15 = vpop.permute.xlu1 %1287 }
 0x2df   : > { %v1278_v11 = vpop.permute.xlu0 %1277  ;;  %v1303_v17 = vsel %vm1301_vm2, %v1300_v7, %v1288_v15 }
 0x2e0   : > { %v1299_v18 = vsel %vm1123_vm1, %v1249_v13, %v1278_v11 }
 0x2e2   : > { %v1286_v16 = vpop.permute.xlu1 %1285 }
 0x2e3   : > { %v1302_v20 = vsel %vm1301_vm2, %v1299_v18, %v1286_v16 }
 0x2e6   : > { %v1296_v19 = vpop.permute.xlu1 %1295 }
 0x2e7   : > { %v1294_v21 = vpop.permute.xlu0 %1293  ;;  %v1306_v22 = vsel %vm1304_vm3, %v1303_v17, %v1296_v19  ;;  %v1439_v19 = vld [vmem:[%s8818_s19 + $0x80] sm:$0xff] }
 0x2e8   : > { %1309 = vadd.xlane.f32.xlu1 %v1306_v22  ;;  %v1305_v23 = vsel %vm1304_vm3, %v1302_v20, %v1294_v21  ;;  %v1440_v20 = vld [vmem:[%s8818_s19 + $0x88] sm:$0xff]  ;;  %v1423_v21 = vld [vmem:[%s8818_s19] sm:$0xff] }
 0x2e9   : > { %1307 = vadd.xlane.f32.xlu0 %v1305_v23 }
 0x375   : > { %v1310_v30 = vpop.xlane.xlu1 %1309 }
 0x376   : > { %v1308_v31 = vpop.xlane.xlu0 %1307  ;;  %v1313_v32 = vmul.f32 0.0078125, %v1310_v30  ;;  %v1443_v30 = vld [vmem:[%s8818_s19 + $0xa0] sm:$0xff] }
 0x377   : > { %v1312_v33 = vmul.f32 0.0078125, %v1308_v31  ;;  %v1444_v31 = vld [vmem:[%s8818_s19 + $0xa8] sm:$0xff] }
 0x378   : > { %v1315_v36 = vsub.f32 %v1306_v22, %v1313_v32  ;;  %v8146_v22 = vpack.c.bf16 %v1440_v20, %v1439_v19  ;;  %v8152_v32 = vpack.c.bf16 %v1426_v29, %v1425_v28  ;;  %v1421_v19 = vld [vmem:[%s9984_s8] sm:$0x3]  ;;  %s9951_s8 = smov 112  }
 0x379   : > { %v1314_v34 = vsub.f32 %v1305_v23, %v1312_v33  ;;  %v1424_v23 = vld [vmem:[%s8818_s19 + $0x8] sm:$0xff]  ;;  %v8154_v33 = vpack.c.bf16 %v1444_v31, %v1443_v30  ;;  %v1422_v20 = vld [vmem:[%s8813_s14] sm:$0x3] }
 0x37a   : > { %v1317_v37 = vmul.f32 %v1315_v36, %v1315_v36  ;;  %v8148_v26 = vpack.c.bf16 %v1424_v23, %v1423_v21  ;;  %8147 = vmatprep.subr.bf16.mxu0 %v8146_v22 }
 0x37b   : > { %v1316_v35 = vmul.f32 %v1314_v34, %v1314_v34 }
 0x37c   : > { %8149 = vmatpush3.bf16.msra.mxu0 %v8148_v26 }
 0x37d   : > { %1318 = vadd.xlane.f32.xlu0 %v1316_v35  ;;  %8151 = vmatprep.subr.bf16.mxu0 %v8150_v27  ;;  %v1428_v35 = vld [vmem:[%s8818_s19 + $0x28] sm:$0xff] }
 0x380   : > { %8153 = vmatpush3.bf16.msra.mxu0 %v8152_v32 }
 0x381   : > { %1320 = vadd.xlane.f32.xlu0 %v1317_v37  ;;  %8155 = vmatprep.subr.bf16.mxu0 %v8154_v33 }
 0x40a   : > { %v1319_v58 = vpop.xlane.xlu0 %1318 }
 0x40b   : > { %v1322_v60 = vmul.f32 0.0078125, %v1319_v58  ;;  %v1432_v58 = vld [vmem:[%s8818_s19 + $0x48] sm:$0xff] }
 0x40d   : > { %v1324_v61 = vadd.f32 1e-05, %v1322_v60  ;;  %v8164_v60 = vpack.c.bf16 %v1432_v58, %v1431_v57  ;;  %v1593_v57 = vld [vmem:[%s9981_s6 + $0x30] sm:$0xff]  ;;  %v1596_v58 = vld [vmem:[%s9981_s6 + $0x48] sm:$0xff] }
 0x40e   : > { %v1321_v63 = vpop.xlane.xlu0 %1320 }
 0x40f   : > { %8589 = vrsqrt.f32 %v1324_v61  ;;  %v1323_v50 = vmul.f32 0.0078125, %v1321_v63  ;;  %v1449_v61 = vld [vmem:[%s8818_s19 + $0xd0] sm:$0xff]  ;;  %v1450_v63 = vld [vmem:[%s8818_s19 + $0xd8] sm:$0xff] }
 0x411   : > { %v1325_v51 = vadd.f32 1e-05, %v1323_v50  ;;  %v8166_v50 = vpack.c.bf16 %v1450_v63, %v1449_v61 }
 0x413   : > { %8591 = vrsqrt.f32 %v1325_v51  ;;  %v1433_v51 = vld [vmem:[%s8818_s19 + $0x50] sm:$0xff] }
 0x419   : > { %v8590_v0 = vpop.eup %8589 }
 0x41a   : > { %v1328_v2 = vmul.f32 %v8590_v0, %v1314_v34  ;;  %v1427_v34 = vld [vmem:[%s8818_s19 + $0x20] sm:$0xff]  ;;  %v1434_v0 = vld [vmem:[%s8818_s19 + $0x58] sm:$0xff] }
 0x41c   : > { %v1336_v5 = vmul.f32 %v7111_v1, %v1328_v2  ;;  %v1451_v2 = vld [vmem:[%s8818_s19 + $0xe0] sm:$0xff] }
 0x41d   : > { %v8592_v59 = vpop.eup %8591 }
 0x41e   : > { %v1329_v6 = vmul.f32 %v8592_v59, %v1315_v36  ;;  %v1344_v8 = vadd.f32 %v7112_v3, %v1336_v5  ;;  %v8156_v36 = vpack.c.bf16 %v1428_v35, %v1427_v34  ;;  %v1435_v59 = vld [vmem:[%s8818_s19 + $0x60] sm:$0xff] }
 0x420   : > { %v1337_v9 = vmul.f32 %v7111_v1, %v1329_v6  ;;  %7668 = vmatprep.mubr.f32.mxu1 %v1344_v8  ;;  %8157 = vmatpush3.bf16.msra.mxu0 %v8156_v36  ;;  %v8168_v1 = vpack.c.bf16 %v1434_v0, %v1433_v51  ;;  %v1436_v6 = vld [vmem:[%s8818_s19 + $0x68] sm:$0xff]  ;;  %v1597_v51 = vld [vmem:[%s9981_s6 + $0x50] sm:$0xff] }
 0x421   : > { %8159 = vmatprep.subr.bf16.mxu0 %v8158_v49  ;;  %v8172_v8 = vpack.c.bf16 %v1436_v6, %v1435_v59  ;;  %v1600_v0 = vld [vmem:[%s9981_s6 + $0x68] sm:$0xff]  ;;  %v1601_v59 = vld [vmem:[%s9981_s6 + $0x70] sm:$0xff] }
 0x422   : > { %v1345_v10 = vadd.f32 %v7112_v3, %v1337_v9  ;;  %v1452_v3 = vld [vmem:[%s8818_s19 + $0xe8] sm:$0xff]  ;;  %v1453_v9 = vld [vmem:[%s8818_s19 + $0xf0] sm:$0xff] }
 0x423   : > { %v8170_v5 = vpack.c.bf16 %v1452_v3, %v1451_v2  ;;  %v1604_v6 = vld [vmem:[%s9981_s6 + $0x88] sm:$0xff] }
 0x424   : > { %7669 = vmatmul.mubr.f32.vlgmr.msra.gmra.mrb[0].mxu1 %v1345_v10  ;;  %8161 = vmatpush3.bf16.msra.mxu0 %v8160_v54  ;;  %v1454_v10 = vld [vmem:[%s8818_s19 + $0xf8] sm:$0xff] }
 0x425   : > { %8163 = vmatprep.subr.bf16.mxu0 %v8162_v56  ;;  %v1594_v54 = vld [vmem:[%s9981_s6 + $0x38] sm:$0xff]  ;;  %v1591_v56 = vld [vmem:[%s9981_s6 + $0x20] sm:$0xff] }
 0x426   : > { %v8182_v55 = vpack.c.bf16 %v1594_v54, %v1592_v53  ;;  %v8184_v61 = vpack.c.bf16 %v1593_v57, %v1591_v56  ;;  %v1627_v54 = vld [vmem:[%s9981_s6 + $0x140] sm:$0xff] }
 0x428   : > { %8165 = vmatpush3.bf16.msra.mxu0 %v8164_v60  ;;  %v1598_v60 = vld [vmem:[%s9981_s6 + $0x58] sm:$0xff] }
 0x429   : > { %8167 = vmatprep.subr.bf16.mxu0 %v8166_v50  ;;  %v8186_v63 = vpack.c.bf16 %v1598_v60, %v1596_v58  ;;  %v1595_v50 = vld [vmem:[%s9981_s6 + $0x40] sm:$0xff] }
 0x42a   : > { %v8188_v2 = vpack.c.bf16 %v1597_v51, %v1595_v50 }
 0x42c   : > { %8169 = vmatpush3.bf16.msra.mxu0 %v8168_v1  ;;  %v1602_v1 = vld [vmem:[%s9981_s6 + $0x78] sm:$0xff] }
 0x42d   : > { %8171 = vmatprep.subr.bf16.mxu0 %v8170_v5  ;;  %v8190_v3 = vpack.c.bf16 %v1602_v1, %v1600_v0  ;;  %v1599_v5 = vld [vmem:[%s9981_s6 + $0x60] sm:$0xff] }
 0x430   : > { %8173 = vmatpush3.bf16.msra.mxu0 %v8172_v8  ;;  %v1606_v8 = vld [vmem:[%s9981_s6 + $0x98] sm:$0xff] }
 0x4f7   : > { %v7670_v12 = vpop.f32.mrb[0].mxu1 }
 0x4f8   : > { %v1461_v4 = vrot.slane %v7670_v12, 4  ;;  %v1412_v62 = vpop.f32.mrb[1].mxu1 }
 0x4f9   : > { %v1456_v13 = vrot.slane %v1412_v62, 4 }
 0x4fa   : > { %1462 = vrot.lane.b32.xlu1 %v1461_v4, %s9943_s1  ;;  %v8174_v4 = vpack.c.bf16 %v1454_v10, %v1453_v9  ;;  %v8192_v9 = vpack.c.bf16 %v1601_v59, %v1599_v5  ;;  %v8194_v10 = vpack.c.bf16 %v1606_v8, %v1604_v6  ;;  %v1632_v59 = vld [vmem:[%s9981_s6 + $0x168] sm:$0xff]  ;;  %v1634_v6 = vld [vmem:[%s9981_s6 + $0x178] sm:$0xff] }
 0x4fb   : > { %1457 = vrot.lane.b32.xlu0 %v1456_v13, %s9943_s1  ;;  %v8222_v8 = vpack.c.bf16 %v1634_v6, %v1632_v59  ;;  %v1656_v6 = vld [vmem:[%s9981_s6 + $0x228] sm:$0xff] }
 0x4fc   : > { %8175 = vmatprep.subr.bf16.mxu0 %v8174_v4  ;;  %v1605_v4 = vld [vmem:[%s9981_s6 + $0x90] sm:$0xff] }
 0x56c   : > { %v1463_v14 = vpop.permute.xlu1 %1462 }
 0x56d   : > { %v1466_v15 = vsel %vm1301_vm2, %v7670_v12, %v1463_v14  ;;  %v1458_v16 = vpop.permute.xlu0 %1457  ;;  %v1437_v12 = vld [vmem:[%s8818_s19 + $0x70] sm:$0xff] }
 0x56e   : > { %v1465_v11 = vsel %vm1301_vm2, %v1412_v62, %v1458_v16  ;;  %v1469_v7 = vsel %vm1467_vm4, %v1466_v15, 0.0  ;;  %v1438_v62 = vld [vmem:[%s8818_s19 + $0x78] sm:$0xff]  ;;  %v1490_v16 = vlaneseq  ;;  %vm3760_vm2 = vcmask 73728  }
 0x56f   : > { %v1468_v17 = vsel %vm1467_vm4, %v1465_v11, 0.0  ;;  %v8176_v13 = vpack.c.bf16 %v1438_v62, %v1437_v12  ;;  %v1603_v12 = vld [vmem:[%s9981_s6 + $0x80] sm:$0xff]  ;;  %v1608_v62 = vld [vmem:[%s9981_s6 + $0xa8] sm:$0xff] }
 0x570   : > { %v1470_v18 = vadd.f32 %v1469_v7, %v1468_v17  ;;  %v9078_v7 = vshrl.u32 %v1490_v16, 7  ;;  %v1607_v16 = vld [vmem:[%s9981_s6 + $0xa0] sm:$0xff] }
 0x571   : > { %8177 = vmatpush3.bf16.msra.mxu0 %v8176_v13  ;;  %v1610_v13 = vld [vmem:[%s9981_s6 + $0xb8] sm:$0xff] }
 0x572   : > { %1471 = vadd.xlane.f32.xlu1 %v1470_v18  ;;  %v9081_v17 = vsub.s32 0, %v9078_v7  ;;  %v9084_v18 = vsub.s32 1, %v9078_v7 }
 0x574   : > { %v1493_v21 = vrot.slane %v1421_v19, %v9081_v17  ;;  %v1497_v22 = vrot.slane %v1421_v19, %v9084_v18  ;;  %v1506_v26 = vrot.slane %v1422_v20, %v9081_v17  ;;  %v1510_v27 = vrot.slane %v1422_v20, %v9084_v18  ;;  %v1612_v19 = vld [vmem:[%s9981_s6 + $0xc8] sm:$0xff]  ;;  %v1614_v20 = vld [vmem:[%s9981_s6 + $0xd8] sm:$0xff] }
 0x5ff   : > { %v1472_v37 = vpop.xlane.xlu1 %1471 }
 0x600   : > { %v1474_v38 = vmul.f32 0.00390625, %v1472_v37 }
 0x602   : > { %v1475_v39 = vsub.f32 %v1465_v11, %v1474_v38  ;;  %v1476_v40 = vsub.f32 %v1466_v15, %v1474_v38 }
 0x604   : > { %v1477_v41 = vmul.f32 %v1475_v39, %v1475_v39  ;;  %v1478_v42 = vmul.f32 %v1476_v40, %v1476_v40 }
 0x606   : > { %v1479_v43 = vsel %vm1467_vm4, %v1477_v41, 0.0  ;;  %v1480_v45 = vsel %vm1467_vm4, %v1478_v42, 0.0 }
 0x607   : > { %v1481_v46 = vadd.f32 %v1480_v45, %v1479_v43 }
 0x609   : > { %1482 = vadd.xlane.f32.xlu0 %v1481_v46  ;;  %v1588_v46 = vld [vmem:[%s9981_s6 + $0x8] sm:$0xff] }
 0x60a   : > { %v8178_v49 = vpack.c.bf16 %v1590_v47, %v1588_v46  ;;  %v1623_v46 = vld [vmem:[%s9981_s6 + $0x120] sm:$0xff]  ;;  %v1625_v47 = vld [vmem:[%s9981_s6 + $0x130] sm:$0xff] }
 0x60b   : > { %v8216_v52 = vpack.c.bf16 %v1625_v47, %v1623_v46  ;;  %v9202_v47 = vsub.s32 3, %v9078_v7 }
 0x60c   : > { %8179 = vmatprep.subr.bf16.mxu1 %v8178_v49  ;;  %v1630_v49 = vld [vmem:[%s9981_s6 + $0x158] sm:$0xff] }
 0x60d   : > { %8181 = vmatpush1.bf16.msra.mxu1 %v8180_v44  ;;  %v8218_v53 = vpack.c.bf16 %v1630_v49, %v1628_v48  ;;  %v1629_v44 = vld [vmem:[%s9981_s6 + $0x150] sm:$0xff]  ;;  %v9205_v48 = vsub.s32 2, %v9078_v7  ;;  %v1585_v49 = vld [vmem:[%s8823_s24] sm:$0xf] }
 0x60e   : > { %8183 = vmatprep.subr.bf16.mxu1 %v8182_v55  ;;  %v8220_v55 = vpack.c.bf16 %v1629_v44, %v1627_v54  ;;  %v1762_v54 = vrot.slane %v1585_v49, %v9081_v17  ;;  %v1774_v44 = vrot.slane %v1585_v49, %v9202_v47 }
 0x611   : > { %8185 = vmatpush1.bf16.msra.mxu1 %v8184_v61 }
 0x612   : > { %8187 = vmatprep.subr.bf16.mxu1 %v8186_v63 }
 0x615   : > { %8189 = vmatpush1.bf16.msra.mxu1 %v8188_v2 }
 0x616   : > { %8191 = vmatprep.subr.bf16.mxu1 %v8190_v3 }
 0x619   : > { %8193 = vmatpush1.bf16.msra.mxu1 %v8192_v9  ;;  %v1631_v9 = vld [vmem:[%s9981_s6 + $0x160] sm:$0xff] }
 0x61a   : > { %8195 = vmatprep.subr.bf16.mxu1 %v8194_v10  ;;  %v1633_v10 = vld [vmem:[%s9981_s6 + $0x170] sm:$0xff] }
 0x696   : > { %v1483_v14 = vpop.xlane.xlu0 %1482 }
 0x697   : > { %v1484_v15 = vmul.f32 0.00390625, %v1483_v14  ;;  %v8196_v14 = vpack.c.bf16 %v1605_v4, %v1603_v12  ;;  %v8224_v12 = vpack.c.bf16 %v1633_v10, %v1631_v9  ;;  %v1636_v4 = vld [vmem:[%s9981_s6 + $0x188] sm:$0xff] }
 0x699   : > { %v1485_v11 = vadd.f32 1e-05, %v1484_v15  ;;  %v8198_v15 = vpack.c.bf16 %v1610_v13, %v1608_v62  ;;  %8197 = vmatpush1.bf16.msra.mxu1 %v8196_v14  ;;  %v1638_v62 = vld [vmem:[%s9981_s6 + $0x198] sm:$0xff]  ;;  %v1635_v14 = vld [vmem:[%s9981_s6 + $0x180] sm:$0xff] }
 0x69a   : > { %v8226_v13 = vpack.c.bf16 %v1638_v62, %v1636_v4  ;;  %v1657_v4 = vld [vmem:[%s9981_s6 + $0x230] sm:$0xff] }
 0x69b   : > { %8593 = vrsqrt.f32 %v1485_v11  ;;  %v1609_v11 = vld [vmem:[%s9981_s6 + $0xb0] sm:$0xff]  ;;  %8199 = vmatprep.subr.bf16.mxu1 %v8198_v15 }
 0x69c   : > { %v1637_v15 = vld [vmem:[%s9981_s6 + $0x190] sm:$0xff] }
 0x6a5   : > { %v8594_v23 = vpop.eup %8593 }
 0x6a6   : > { %v1487_v24 = vmul.f32 %v8594_v23, %v1475_v39  ;;  %v1488_v25 = vmul.f32 %v8594_v23, %v1476_v40  ;;  %v1611_v23 = vld [vmem:[%s9981_s6 + $0xc0] sm:$0xff] }
 0x6a8   : > { %v1500_v28 = vmul.f32 %v1493_v21, %v1487_v24  ;;  %v1501_v29 = vmul.f32 %v1497_v22, %v1488_v25  ;;  %v8200_v21 = vpack.c.bf16 %v1609_v11, %v1607_v16  ;;  %v8202_v22 = vpack.c.bf16 %v1614_v20, %v1612_v19  ;;  %v1613_v24 = vld [vmem:[%s9981_s6 + $0xd0] sm:$0xff]  ;;  %v1616_v25 = vld [vmem:[%s9981_s6 + $0xe8] sm:$0xff]  ;;  %v1642_v19 = vld [vmem:[%s9981_s6 + $0x1b8] sm:$0xff] }
 0x6a9   : > { %v8228_v16 = vpack.c.bf16 %v1637_v15, %v1635_v14  ;;  %v1640_v11 = vld [vmem:[%s9981_s6 + $0x1a8] sm:$0xff]  ;;  %v1639_v20 = vld [vmem:[%s9981_s6 + $0x1a0] sm:$0xff]  ;;  %v1662_v14 = vld [vmem:[%s9981_s6 + $0x258] sm:$0xff] }
 0x6aa   : > { %v1513_v30 = vadd.f32 %v1506_v26, %v1500_v28  ;;  %v1514_v31 = vadd.f32 %v1510_v27, %v1501_v29  ;;  %v1618_v26 = vld [vmem:[%s9981_s6 + $0xf8] sm:$0xff]  ;;  %8201 = vmatpush1.bf16.msra.mxu1 %v8200_v21  ;;  %v8204_v27 = vpack.c.bf16 %v1613_v24, %v1611_v23  ;;  %v1615_v29 = vld [vmem:[%s9981_s6 + $0xe0] sm:$0xff]  ;;  %v8230_v21 = vpack.c.bf16 %v1642_v19, %v1640_v11  ;;  %v1644_v23 = vld [vmem:[%s9981_s6 + $0x1c8] sm:$0xff] }
 0x6ab   : > { %8203 = vmatprep.subr.bf16.mxu1 %v8202_v22  ;;  %v8206_v28 = vpack.c.bf16 %v1618_v26, %v1616_v25  ;;  %v1641_v22 = vld [vmem:[%s9981_s6 + $0x1b0] sm:$0xff]  ;;  %v1646_v24 = vld [vmem:[%s9981_s6 + $0x1d8] sm:$0xff]  ;;  %v1659_v11 = vld [vmem:[%s9981_s6 + $0x240] sm:$0xff] }
 0x6ac   : > { %1579 = vmatprep.mubr.f32.mxu0 %v1514_v31  ;;  %v1620_v31 = vld [vmem:[%s9981_s6 + $0x108] sm:$0xff]  ;;  %v8232_v25 = vpack.c.bf16 %v1641_v22, %v1639_v20  ;;  %v8234_v26 = vpack.c.bf16 %v1646_v24, %v1644_v23  ;;  %v1661_v19 = vld [vmem:[%s9981_s6 + $0x250] sm:$0xff]  ;;  %v1663_v24 = vld [vmem:[%s9981_s6 + $0x260] sm:$0xff] }
 0x6ad   : > { %1580 = vmatmul.mubr.f32.vlgmr.msra.gmra.mrb[8].mxu0 %v1513_v30  ;;  %v1617_v30 = vld [vmem:[%s9981_s6 + $0xf0] sm:$0xff]  ;;  %v1664_v20 = vld [vmem:[%s9981_s6 + $0x268] sm:$0xff]  ;;  %v8252_v22 = vpack.c.bf16 %v1661_v19, %v1659_v11 }
 0x6ae   : > { %8205 = vmatpush1.bf16.msra.mxu1 %v8204_v27  ;;  %v1643_v27 = vld [vmem:[%s9981_s6 + $0x1c0] sm:$0xff] }
 0x6af   : > { %8207 = vmatprep.subr.bf16.mxu1 %v8206_v28  ;;  %v1645_v28 = vld [vmem:[%s9981_s6 + $0x1d0] sm:$0xff] }
 0x780   : > { %v7390_v32 = vpop.f32.mrb[8].mxu0 }
 0x781   : > { %v7391_v33 = vpop.f32.mrb[9].mxu0 }
 0x782   : > { %v9092_v34 = vadd.f32 %v7391_v33, %v7390_v32  ;;  %v1622_v32 = vld [vmem:[%s9981_s6 + $0x118] sm:$0xff]  ;;  %v8208_v33 = vpack.c.bf16 %v1617_v30, %v1615_v29  ;;  %v1648_v29 = vld [vmem:[%s9981_s6 + $0x1e8] sm:$0xff] }
 0x783   : > { %v1650_v30 = vld [vmem:[%s9981_s6 + $0x1f8] sm:$0xff] }
 0x784   : > { %v1716_v35 = vrot.slane %v9092_v34, 1  ;;  %v1718_v36 = vrot.slane %v9092_v34, 2  ;;  %v1720_v37 = vrot.slane %v9092_v34, 3  ;;  %v1723_v38 = vsel %vm1722_vm5, %v9092_v34, 0.0  ;;  %8209 = vmatpush1.bf16.msra.mxu1 %v8208_v33  ;;  %v1647_v33 = vld [vmem:[%s9981_s6 + $0x1e0] sm:$0xff] }
 0x786   : > { %v1724_v39 = vsel %vm1722_vm5, %v1716_v35, 0.0  ;;  %v1726_v41 = vsel %vm1722_vm5, %v1718_v36, 0.0  ;;  %v1728_v43 = vsel %vm1722_vm5, %v1720_v37, 0.0 }
 0x787   : > { %v1725_v40 = vadd.f32 %v1724_v39, %v1723_v38  ;;  %v8210_v38 = vpack.c.bf16 %v1622_v32, %v1620_v31  ;;  %v1619_v39 = vld [vmem:[%s9981_s6 + $0x100] sm:$0xff]  ;;  %v8236_v31 = vpack.c.bf16 %v1645_v28, %v1643_v27  ;;  %v8238_v32 = vpack.c.bf16 %v1650_v30, %v1648_v29  ;;  %v1670_v27 = vld [vmem:[%s9981_s6 + $0x298] sm:$0xff] }
 0x788   : > { %v1667_v30 = vld [vmem:[%s9981_s6 + $0x280] sm:$0xff] }
 0x789   : > { %v1727_v42 = vadd.f32 %v1726_v41, %v1725_v40  ;;  %v1621_v40 = vld [vmem:[%s9981_s6 + $0x110] sm:$0xff]  ;;  %v1624_v41 = vld [vmem:[%s9981_s6 + $0x128] sm:$0xff]  ;;  %8211 = vmatprep.subr.bf16.mxu1 %v8210_v38 }
 0x78a   : > { %v1649_v38 = vld [vmem:[%s9981_s6 + $0x1f0] sm:$0xff] }
 0x78b   : > { %v1729_v45 = vadd.f32 %v1728_v43, %v1727_v42  ;;  %v1626_v42 = vld [vmem:[%s9981_s6 + $0x138] sm:$0xff]  ;;  %v8212_v43 = vpack.c.bf16 %v1621_v40, %v1619_v39  ;;  %v8240_v39 = vpack.c.bf16 %v1649_v38, %v1647_v33  ;;  %v1652_v40 = vld [vmem:[%s9981_s6 + $0x208] sm:$0xff] }
 0x78c   : > { %v1674_v33 = vld [vmem:[%s9981_s6 + $0x2b8] sm:$0xff] }
 0x78d   : > { %1730 = vadd.xlane.f32.xlu0 %v1729_v45  ;;  %v8214_v45 = vpack.c.bf16 %v1626_v42, %v1624_v41  ;;  %8213 = vmatpush1.bf16.msra.mxu1 %v8212_v43  ;;  %v1654_v41 = vld [vmem:[%s9981_s6 + $0x218] sm:$0xff] }
 0x78e   : > { %v8242_v42 = vpack.c.bf16 %v1654_v41, %v1652_v40  ;;  %v1671_v40 = vld [vmem:[%s9981_s6 + $0x2a0] sm:$0xff]  ;;  %v1673_v41 = vld [vmem:[%s9981_s6 + $0x2b0] sm:$0xff] }
 0x78f   : > { %8215 = vmatprep.subr.bf16.mxu1 %v8214_v45 }
 0x791   : > { %8217 = vmatpush1.bf16.msra.mxu1 %v8216_v52  ;;  %v1586_v52 = vld [vmem:[%s8828_s30] sm:$0xf] }
 0x792   : > { %8219 = vmatprep.subr.bf16.mxu1 %v8218_v53  ;;  %v1766_v53 = vrot.slane %v1585_v49, %v9084_v18 }
 0x795   : > { %8221 = vmatpush1.bf16.msra.mxu1 %v8220_v55  ;;  %v1770_v55 = vrot.slane %v1585_v49, %v9205_v48  ;;  %v1675_v49 = vld [vmem:[%s9981_s6 + $0x2c0] sm:$0xff] }
 0x796   : > { %8223 = vmatprep.subr.bf16.mxu1 %v8222_v8  ;;  %v1658_v8 = vld [vmem:[%s9981_s6 + $0x238] sm:$0xff] }
 0x799   : > { %8225 = vmatpush1.bf16.msra.mxu1 %v8224_v12  ;;  %v1655_v12 = vld [vmem:[%s9981_s6 + $0x220] sm:$0xff] }
 0x79a   : > { %8227 = vmatprep.subr.bf16.mxu1 %v8226_v13  ;;  %v1660_v13 = vld [vmem:[%s9981_s6 + $0x248] sm:$0xff]  ;;  %v8248_v15 = vpack.c.bf16 %v1657_v4, %v1655_v12  ;;  %v1698_v12 = vld [vmem:[%s9981_s6 + $0x378] sm:$0xff] }
 0x79d   : > { %8229 = vmatpush1.bf16.msra.mxu1 %v8228_v16  ;;  %v8250_v16 = vpack.c.bf16 %v1662_v14, %v1660_v13  ;;  %v1695_v13 = vld [vmem:[%s9981_s6 + $0x360] sm:$0xff]  ;;  %v1697_v14 = vld [vmem:[%s9981_s6 + $0x370] sm:$0xff] }
 0x79e   : > { %8231 = vmatprep.subr.bf16.mxu1 %v8230_v21  ;;  %v1666_v21 = vld [vmem:[%s9981_s6 + $0x278] sm:$0xff]  ;;  %v8288_v11 = vpack.c.bf16 %v1697_v14, %v1695_v13  ;;  %v2038_v13 = vld [vmem:[%s9987_s11] sm:$0xff] }
 0x79f   : > { %v8254_v23 = vpack.c.bf16 %v1666_v21, %v1664_v20  ;;  %v1699_v20 = vld [vmem:[%s9981_s6 + $0x380] sm:$0xff]  ;;  %v1701_v21 = vld [vmem:[%s9981_s6 + $0x390] sm:$0xff] }
 0x7a1   : > { %8233 = vmatpush1.bf16.msra.mxu1 %v8232_v25  ;;  %v1665_v25 = vld [vmem:[%s9981_s6 + $0x270] sm:$0xff] }
 0x7a2   : > { %8235 = vmatprep.subr.bf16.mxu1 %v8234_v26  ;;  %v1668_v26 = vld [vmem:[%s9981_s6 + $0x288] sm:$0xff]  ;;  %v8256_v28 = vpack.c.bf16 %v1665_v25, %v1663_v24  ;;  %v8292_v24 = vpack.c.bf16 %v1701_v21, %v1699_v20 }
 0x7a3   : > { %v8258_v29 = vpack.c.bf16 %v1670_v27, %v1668_v26  ;;  %v1703_v26 = vld [vmem:[%s9981_s6 + $0x3a0] sm:$0xff]  ;;  %v1705_v27 = vld [vmem:[%s9981_s6 + $0x3b0] sm:$0xff]  ;;  %v2041_v21 = vld [vmem:[%s9988_s15 + $0x8] sm:$0xff] }
 0x7a5   : > { %8237 = vmatpush1.bf16.msra.mxu1 %v8236_v31  ;;  %v1669_v31 = vld [vmem:[%s9981_s6 + $0x290] sm:$0xff] }
 0x7a6   : > { %8239 = vmatprep.subr.bf16.mxu1 %v8238_v32  ;;  %v1672_v32 = vld [vmem:[%s9981_s6 + $0x2a8] sm:$0xff]  ;;  %v8260_v38 = vpack.c.bf16 %v1669_v31, %v1667_v30  ;;  %v8296_v30 = vpack.c.bf16 %v1705_v27, %v1703_v26 }
 0x7a9   : > { %8241 = vmatpush1.bf16.msra.mxu1 %v8240_v39  ;;  %v8262_v39 = vpack.c.bf16 %v1674_v33, %v1672_v32  ;;  %v1707_v32 = vld [vmem:[%s9981_s6 + $0x3c0] sm:$0xff]  ;;  %v1709_v33 = vld [vmem:[%s9981_s6 + $0x3d0] sm:$0xff] }
 0x7aa   : > { %8243 = vmatprep.subr.bf16.mxu1 %v8242_v42  ;;  %v1676_v42 = vld [vmem:[%s9981_s6 + $0x2c8] sm:$0xff] }
 0x81a   : > { %v1731_v56 = vpop.xlane.xlu0 %1730 }
 0x81b   : > { %v1733_v57 = vmul.f32 0.001953125, %v1731_v56 }
 0x81d   : > { %v9153_v58 = vsub.f32 %v9092_v34, %v1733_v57  ;;  %v9157_v60 = vsub.f32 %v1716_v35, %v1733_v57  ;;  %v9161_v61 = vsub.f32 %v1718_v36, %v1733_v57  ;;  %v9165_v63 = vsub.f32 %v1720_v37, %v1733_v57 }
 0x81e   : > { %v1791_v57 = vrot.slane %v1586_v52, %v9084_v18 }
 0x81f   : > { %v1738_v50 = vmul.f32 %v9153_v58, %v9153_v58  ;;  %v1739_v51 = vmul.f32 %v9157_v60, %v9157_v60  ;;  %v1740_v35 = vmul.f32 %v9161_v61, %v9161_v61  ;;  %v1741_v0 = vmul.f32 %v9165_v63, %v9165_v63 }
 0x821   : > { %v1742_v36 = vsel %vm1722_vm5, %v1738_v50, 0.0  ;;  %v1743_v34 = vsel %vm1722_vm5, %v1739_v51, 0.0  ;;  %v1745_v1 = vsel %vm1722_vm5, %v1740_v35, 0.0  ;;  %v1747_v3 = vsel %vm1722_vm5, %v1741_v0, 0.0 }
 0x822   : > { %v1744_v37 = vadd.f32 %v1743_v34, %v1742_v36  ;;  %v1787_v50 = vrot.slane %v1586_v52, %v9081_v17  ;;  %v1795_v51 = vrot.slane %v1586_v52, %v9205_v48 }
 0x824   : > { %v1746_v2 = vadd.f32 %v1745_v1, %v1744_v37  ;;  %v1651_v37 = vld [vmem:[%s9981_s6 + $0x200] sm:$0xff]  ;;  %v1653_v1 = vld [vmem:[%s9981_s6 + $0x210] sm:$0xff] }
 0x826   : > { %v1748_v5 = vadd.f32 %v1747_v3, %v1746_v2  ;;  %v1799_v2 = vrot.slane %v1586_v52, %v9202_v47  ;;  %v1677_v52 = vld [vmem:[%s9981_s6 + $0x2d0] sm:$0xff] }
 0x828   : > { %1749 = vadd.xlane.f32.xlu1 %v1748_v5 }
 0x8b5   : > { %v1750_v43 = vpop.xlane.xlu1 %1749 }
 0x8b6   : > { %v1751_v45 = vmul.f32 0.001953125, %v1750_v43  ;;  %v1678_v43 = vld [vmem:[%s9981_s6 + $0x2d8] sm:$0xff] }
 0x8b8   : > { %v1752_v46 = vadd.f32 1e-05, %v1751_v45  ;;  %v8264_v45 = vpack.c.bf16 %v1673_v41, %v1671_v40  ;;  %v8300_v40 = vpack.c.bf16 %v1709_v33, %v1707_v32 }
 0x8ba   : > { %8595 = vrsqrt.f32 %v1752_v46  ;;  %v8266_v46 = vpack.c.bf16 %v1678_v43, %v1676_v42  ;;  %v1711_v42 = vld [vmem:[%s9981_s6 + $0x3e0] sm:$0xff]  ;;  %v1713_v43 = vld [vmem:[%s9981_s6 + $0x3f0] sm:$0xff] }
 0x8c4   : > { %v8596_v56 = vpop.eup %8595 }
 0x8c5   : > { %v1755_v35 = vmul.f32 %v8596_v56, %v9157_v60  ;;  %v1754_v0 = vmul.f32 %v8596_v56, %v9153_v58  ;;  %v1757_v36 = vmul.f32 %v8596_v56, %v9165_v63  ;;  %v1756_v34 = vmul.f32 %v8596_v56, %v9161_v61  ;;  %v1679_v56 = vld [vmem:[%s9981_s6 + $0x2e0] sm:$0xff] }
 0x8c6   : > { %v8244_v63 = vpack.c.bf16 %v1653_v1, %v1651_v37  ;;  %v8246_v61 = vpack.c.bf16 %v1658_v8, %v1656_v6  ;;  %v1688_v37 = vld [vmem:[%s9981_s6 + $0x328] sm:$0xff]  ;;  %v1690_v1 = vld [vmem:[%s9981_s6 + $0x338] sm:$0xff] }
 0x8c7   : > { %v1780_v3 = vmul.f32 %v1766_v53, %v1755_v35  ;;  %v1779_v5 = vmul.f32 %v1762_v54, %v1754_v0  ;;  %v1782_v59 = vmul.f32 %v1774_v44, %v1757_v36  ;;  %v1781_v60 = vmul.f32 %v1770_v55, %v1756_v34  ;;  %v1680_v53 = vld [vmem:[%s9981_s6 + $0x2e8] sm:$0xff]  ;;  %v1682_v54 = vld [vmem:[%s9981_s6 + $0x2f8] sm:$0xff]  ;;  %v1683_v36 = vld [vmem:[%s9981_s6 + $0x300] sm:$0xff] }
 0x8c8   : > { %v8268_v44 = vpack.c.bf16 %v1677_v52, %v1675_v49  ;;  %v8270_v55 = vpack.c.bf16 %v1682_v54, %v1680_v53  ;;  %v1685_v34 = vld [vmem:[%s9981_s6 + $0x310] sm:$0xff]  ;;  %v1692_v6 = vld [vmem:[%s9981_s6 + $0x348] sm:$0xff]  ;;  %v1694_v8 = vld [vmem:[%s9981_s6 + $0x358] sm:$0xff] }
 0x8c9   : > { %v1805_v9 = vadd.f32 %v1791_v57, %v1780_v3  ;;  %v1804_v58 = vadd.f32 %v1787_v50, %v1779_v5  ;;  %v9225_v10 = vadd.f32 %v1795_v51, %v1781_v60  ;;  %v1807_v62 = vadd.f32 %v1799_v2, %v1782_v59  ;;  %v1681_v57 = vld [vmem:[%s9981_s6 + $0x2f0] sm:$0xff]  ;;  %v1684_v50 = vld [vmem:[%s9981_s6 + $0x308] sm:$0xff]  ;;  %v1686_v51 = vld [vmem:[%s9981_s6 + $0x318] sm:$0xff] }
 0x8ca   : > { %v8272_v35 = vpack.c.bf16 %v1681_v57, %v1679_v56  ;;  %v8274_v0 = vpack.c.bf16 %v1686_v51, %v1684_v50  ;;  %v8276_v2 = vpack.c.bf16 %v1685_v34, %v1683_v36  ;;  %v8278_v3 = vpack.c.bf16 %v1690_v1, %v1688_v37  ;;  %v1687_v5 = vld [vmem:[%s9981_s6 + $0x320] sm:$0xff]  ;;  %v1689_v59 = vld [vmem:[%s9981_s6 + $0x330] sm:$0xff] }
 0x8cb   : > { %1872 = vmatprep.mubr.f32.mxu1 %v1805_v9  ;;  %v8280_v60 = vpack.c.bf16 %v1689_v59, %v1687_v5  ;;  %v8282_v9 = vpack.c.bf16 %v1694_v8, %v1692_v6  ;;  %v1950_v1 = vld [vmem:[%s9985_s7] sm:$0x3]  ;;  %s9993_s7 = sld [smem:[#allocation15_spill]] }
 0x8cc   : > { %1873 = vmatmul.mubr.f32.vlgmr.msra.gmra.mrb[2].mxu1 %v1804_v58  ;;  %v1691_v58 = vld [vmem:[%s9981_s6 + $0x340] sm:$0xff]  ;;  %v1980_v5 = vrot.slane %v1950_v1, %v9084_v18 }
 0x8cd   : > { %8245 = vmatpush1.bf16.msra.mxu1 %v8244_v63  ;;  %1943 = vmatprep.mubr.f32.mxu1 %v1807_v62  ;;  %v1693_v63 = vld [vmem:[%s9981_s6 + $0x350] sm:$0xff] }
 0x8ce   : > { %8247 = vmatprep.subr.bf16.mxu1 %v8246_v61  ;;  %v1696_v61 = vld [vmem:[%s9981_s6 + $0x368] sm:$0xff]  ;;  %v8284_v4 = vpack.c.bf16 %v1693_v63, %v1691_v58 }
 0x8cf   : > { %v8286_v62 = vpack.c.bf16 %v1698_v12, %v1696_v61 }
 0x8d1   : > { %8249 = vmatpush1.bf16.msra.mxu1 %v8248_v15  ;;  %v1700_v15 = vld [vmem:[%s9981_s6 + $0x388] sm:$0xff] }
 0x8d2   : > { %8251 = vmatprep.subr.bf16.mxu1 %v8250_v16  ;;  %v1702_v16 = vld [vmem:[%s9981_s6 + $0x398] sm:$0xff] }
 0x8d3   : > { %v8290_v19 = vpack.c.bf16 %v1702_v16, %v1700_v15  ;;  %v8753_v16 = vmov 0  }
 0x8d4   : > { %8572 = vset.pattern.permute.xlu1 %v8753_v16  ;;  %8571 = vset.pattern.permute.xlu0 %v8753_v16 }
 0x8d5   : > { %8253 = vmatpush1.bf16.msra.mxu1 %v8252_v22  ;;  %v1704_v22 = vld [vmem:[%s9981_s6 + $0x3a8] sm:$0xff] }
 0x8d6   : > { %8255 = vmatprep.subr.bf16.mxu1 %v8254_v23  ;;  %v1706_v23 = vld [vmem:[%s9981_s6 + $0x3b8] sm:$0xff] }
 0x8d7   : > { %v8294_v25 = vpack.c.bf16 %v1706_v23, %v1704_v22 }
 0x8d9   : > { %8257 = vmatpush1.bf16.msra.mxu1 %v8256_v28  ;;  %v1708_v28 = vld [vmem:[%s9981_s6 + $0x3c8] sm:$0xff] }
 0x8da   : > { %8259 = vmatprep.subr.bf16.mxu1 %v8258_v29  ;;  %v1710_v29 = vld [vmem:[%s9981_s6 + $0x3d8] sm:$0xff] }
 0x8db   : > { %v8298_v31 = vpack.c.bf16 %v1710_v29, %v1708_v28 }
 0x8dd   : > { %8261 = vmatpush1.bf16.msra.mxu1 %v8260_v38  ;;  %v1712_v38 = vld [vmem:[%s9981_s6 + $0x3e8] sm:$0xff] }
 0x8de   : > { %8263 = vmatprep.subr.bf16.mxu1 %v8262_v39  ;;  %v1714_v39 = vld [vmem:[%s9981_s6 + $0x3f8] sm:$0xff]  ;;  %s10000_s6 = smov 96  }
 0x8df   : > { %v8302_v41 = vpack.c.bf16 %v1714_v39, %v1712_v38 }
 0x8e1   : > { %8265 = vmatpush1.bf16.msra.mxu1 %v8264_v45  ;;  %v8304_v45 = vpack.c.bf16 %v1713_v43, %v1711_v42 }
 0x8e2   : > { %8267 = vmatprep.subr.bf16.mxu1 %v8266_v46 }
 0x8e5   : > { %8269 = vmatpush1.bf16.msra.mxu1 %v8268_v44 }
 0x8e6   : > { %8271 = vmatprep.subr.bf16.mxu1 %v8270_v55 }
 0x8e9   : > { %8273 = vmatpush1.bf16.msra.mxu1 %v8272_v35 }
 0x8ea   : > { %8275 = vmatprep.subr.bf16.mxu1 %v8274_v0 }
 0x8ed   : > { %8277 = vmatpush1.bf16.msra.mxu1 %v8276_v2  ;;  %v1951_v2 = vld [vmem:[%s9986_s10] sm:$0x3]  ;;  %s9994_s10 = sld [smem:[#allocation16_spill]] }
 0x8ee   : > { %8279 = vmatprep.subr.bf16.mxu1 %v8278_v3  ;;  %v1976_v3 = vrot.slane %v1950_v1, %v9081_v17  ;;  %v1993_v63 = vrot.slane %v1951_v2, %v9084_v18 }
 0x8f1   : > { %8281 = vmatpush1.bf16.msra.mxu1 %v8280_v60  ;;  %v1989_v60 = vrot.slane %v1951_v2, %v9081_v17 }
 0x8f2   : > { %8283 = vmatprep.subr.bf16.mxu1 %v8282_v9 }
 0x8f5   : > { %8285 = vmatpush1.bf16.msra.mxu1 %v8284_v4 }
 0x8f6   : > { %8287 = vmatprep.subr.bf16.mxu1 %v8286_v62 }
 0x8f9   : > { %8289 = vmatpush1.bf16.msra.mxu1 %v8288_v11  ;;  %v2040_v11 = vld [vmem:[%s9988_s15] sm:$0xff] }
 0x8fa   : > { %8291 = vmatprep.subr.bf16.mxu1 %v8290_v19 }
 0x8fd   : > { %8293 = vmatpush1.bf16.msra.mxu1 %v8292_v24 }
 0x8fe   : > { %8295 = vmatprep.subr.bf16.mxu1 %v8294_v25 }
 0x901   : > { %8297 = vmatpush1.bf16.msra.mxu1 %v8296_v30 }
 0x902   : > { %8299 = vmatprep.subr.bf16.mxu1 %v8298_v31 }
 0x905   : > { %8301 = vmatpush1.bf16.msra.mxu1 %v8300_v40  ;;  %v2039_v40 = vld [vmem:[%s9987_s11 + $0x8] sm:$0xff] }
 0x906   : > { %8303 = vmatprep.subr.bf16.mxu1 %v8302_v41 }
 0x909   : > { %8305 = vmatpush1.bf16.msra.mxu1 %v8304_v45 }
 0x90c   : > { %1944 = vmatmul.mubr.f32.vlgmr.msra.gmra.mrb[2].mxu1 %v9225_v10 }
 0x90d   : > { %7673 = vmatprep.mubr.msk.f32.mxu1 %vm2052_vm6, %v2038_v13 }
 0x9df   : > { %v1945_v46 = vpop.f32.mrb[2].mxu1 }
 0x9e0   : > { %v1952_v49 = vsel %vm1722_vm5, %v1945_v46, 0.0  ;;  %v1947_v52 = vpop.f32.mrb[3].mxu1 }
 0x9e1   : > { %v1953_v53 = vsel %vm1722_vm5, %v1947_v52, 0.0 }
 0x9e2   : > { %v1954_v54 = vadd.f32 %v1953_v53, %v1952_v49 }
 0x9e4   : > { %1955 = vadd.xlane.f32.xlu0 %v1954_v54 }
 0xa71   : > { %v1956_v44 = vpop.xlane.xlu0 %1955 }
 0xa72   : > { %v1957_v55 = vmul.f32 0.00390625, %v1956_v44 }
 0xa74   : > { %v1958_v56 = vsub.f32 %v1945_v46, %v1957_v55  ;;  %v1959_v57 = vsub.f32 %v1947_v52, %v1957_v55  ;;  %v9315_v52 = vld [vmem:[%s9989_s16] sm:$0xf] }
 0xa75   : > { %v2343_v44 = vsel %vm2342_vm12, %v9315_v52, 0.0 }
 0xa76   : > { %v1960_v50 = vmul.f32 %v1958_v56, %v1958_v56  ;;  %v1961_v51 = vmul.f32 %v1959_v57, %v1959_v57 }
 0xa78   : > { %v1962_v35 = vsel %vm1722_vm5, %v1960_v50, 0.0  ;;  %v1963_v10 = vsel %vm1722_vm5, %v1961_v51, 0.0 }
 0xa79   : > { %v1964_v0 = vadd.f32 %v1963_v10, %v1962_v35 }
 0xa7b   : > { %1965 = vadd.xlane.f32.xlu1 %v1964_v0 }
 0xb08   : > { %v1966_v36 = vpop.xlane.xlu1 %1965 }
 0xb09   : > { %v1967_v34 = vmul.f32 0.00390625, %v1966_v36 }
 0xb0b   : > { %v1968_v37 = vadd.f32 1e-05, %v1967_v34 }
 0xb0d   : > { %8597 = vrsqrt.f32 %v1968_v37 }
 0xb17   : > { %v8598_v59 = vpop.eup %8597 }
 0xb18   : > { %v1970_v6 = vmul.f32 %v8598_v59, %v1958_v56  ;;  %v1971_v8 = vmul.f32 %v8598_v59, %v1959_v57  ;;  %v7115_v59 = vld [vmem:[%s9990_s18 + $0x20] sm:$0xff] }
 0xb1a   : > { %v1983_v9 = vmul.f32 %v1976_v3, %v1970_v6  ;;  %v1984_v58 = vmul.f32 %v1980_v5, %v1971_v8  ;;  %v7116_v6 = vld [vmem:[%s9990_s18 + $0x28] sm:$0xff] }
 0xb1b   : > { %v8306_v8 = vpack.c.bf16 %v7116_v6, %v7115_v59 }
 0xb1c   : > { %v1996_v61 = vadd.f32 %v1989_v60, %v1983_v9  ;;  %v1997_v62 = vadd.f32 %v1993_v63, %v1984_v58  ;;  %v7117_v60 = vld [vmem:[%s9990_s18 + $0x30] sm:$0xff]  ;;  %v7118_v9 = vld [vmem:[%s9990_s18 + $0x38] sm:$0xff]  ;;  %v7121_v63 = vld [vmem:[%s9990_s18 + $0x40] sm:$0xff] }
 0xb1d   : > { %8307 = vmatprep.subr.bf16.mxu0 %v8306_v8  ;;  %v8310_v58 = vpack.c.bf16 %v7118_v9, %v7117_v60 }
 0xb1e   : > { %v2003_v12 = vrot.slane %v1996_v61, 6  ;;  %v1999_v4 = vrot.slane %v1996_v61, 7  ;;  %v2007_v14 = vrot.slane %v1996_v61, 5  ;;  %v2018_v15 = vrot.slane %v1997_v62, 2  ;;  %8309 = vmatpush3.bf16.msra.mxu0 %v8306_v8 }
 0xb1f   : > { %v2014_v19 = vrot.slane %v1997_v62, 3  ;;  %v2022_v20 = vrot.slane %v1997_v62, 1  ;;  %v2012_v28 = vrot.slane %v1997_v62, 4  ;;  %8311 = vmatprep.subr.bf16.mxu0 %v8310_v58  ;;  %v8756_v62 = vmov 0.0  }
 0xb20   : > { %2004 = vrot.lane.b32.xlu1 %v2003_v12, %s9943_s1  ;;  %2000 = vrot.lane.b32.xlu0 %v1999_v4, %s9947_s2  ;;  %v8754_v4 = vmov 0.0|0.0  }
 0xb22   : > { %8313 = vmatpush3.bf16.msra.mxu0 %v8310_v58 }
 0xb24   : > { %2008 = vrot.lane.b32.xlu1 %v2007_v14, %s9945_s28  ;;  %2019 = vrot.lane.b32.xlu0 %v2018_v15, %s9943_s1 }
 0xb28   : > { %2015 = vrot.lane.b32.xlu1 %v2014_v19, %s9947_s2  ;;  %2044 = vperm.xlu0 %8571, %v2040_v11  }
 0xb2c   : > { %2023 = vrot.lane.b32.xlu1 %v2022_v20, %s9945_s28 }
 0xb30   : > { %2049 = vperm.xlu1 %8572, %v2041_v21  }
 0xb92   : > { %v2005_v22 = vpop.permute.xlu1 %2004  ;;  %v2001_v23 = vpop.permute.xlu0 %2000 }
 0xb93   : > { %v2026_v24 = vsel %vm1722_vm5, %v1996_v61, %v2001_v23  ;;  %v7122_v61 = vld [vmem:[%s9990_s18 + $0x48] sm:$0xff] }
 0xb94   : > { %v2028_v26 = vsel %vm2027_vm7, %v2026_v24, %v2005_v22  ;;  %v8314_v12 = vpack.c.bf16 %v7122_v61, %v7121_v63  ;;  %v9343_v22 = vld [vmem:[%s9991_s0] sm:$0x3f] }
 0xb95   : > { %v2167_v24 = vrot.slane %v9343_v22, %v9081_v17 }
 0xb96   : > { %v2009_v25 = vpop.permute.xlu1 %2008  ;;  %v2020_v32 = vpop.permute.xlu0 %2019  ;;  %8315 = vmatprep.subr.bf16.mxu0 %v8314_v12 }
 0xb97   : > { %v2030_v27 = vsel %vm2029_vm8, %v2028_v26, %v2009_v25 }
 0xb98   : > { %v2031_v30 = vsel %vm1467_vm4, %v2030_v27, %v2012_v28 }
 0xb9a   : > { %v2016_v29 = vpop.permute.xlu1 %2015 }
 0xb9b   : > { %v2033_v31 = vsel %vm2032_vm9, %v2031_v30, %v2016_v29  ;;  %v2173_v29 = vrot.slane %v9343_v22, %v9084_v18 }
 0xb9c   : > { %v2035_v38 = vsel %vm2034_vm10, %v2033_v31, %v2020_v32  ;;  %v7123_v32 = vld [vmem:[%s9990_s18 + $0x50] sm:$0xff] }
 0xb9e   : > { %v2024_v33 = vpop.permute.xlu1 %2023 }
 0xb9f   : > { %v2037_v39 = vsel %vm2036_vm11, %v2035_v38, %v2024_v33  ;;  %v7124_v33 = vld [vmem:[%s9990_s18 + $0x58] sm:$0xff] }
 0xba0   : > { %7671 = vmatprep.subr.mxu1 %v2037_v39 }
 0xba1   : > { %7672 = vmatpush3.msra.mxu1 %v2037_v39 }
 0xba2   : > { %7674 = vmatmul.mubr.msk.f32.vlgmr.msra.gmra.mrb[4].mxu1 %vm2052_vm6, %v2039_v40  ;;  %8393 = vmatprep.subr.bf16.mxu1 %v8754_v4  ;;  %v8318_v40 = vpack.c.bf16 %v7124_v33, %v7123_v32 }
 0xba3   : > { %7848 = vmatprep.mubr.msk.f32.mxu1 %vm8755_vm13, %v8756_v62 }
 0xba7   : > { %v2045_v42 = vpop.permute.xlu0 %2044 }
 0xbaf   : > { %v2050_v41 = vpop.permute.xlu1 %2049 }
 0xc75   : > { %v7675_v43 = vpop.f32.mrb[4].mxu1 }
 0xc76   : > { %v9310_v45 = vadd.f32 %v7675_v43, %v2050_v41  ;;  %v2125_v46 = vpop.f32.mrb[5].mxu1  ;;  %v2366_v41 = vld [vmem:[%s9990_s18] sm:$0xff] }
 0xc77   : > { %v9312_v49 = vadd.f32 %v2125_v46, %v2045_v42  ;;  %v2367_v42 = vld [vmem:[%s9990_s18 + $0x8] sm:$0xff] }
 0xc78   : > { %v2141_v53 = vsel %vm1123_vm1, %v9310_v45, 0.0  ;;  %v8323_v46 = vpack.c.bf16 %v2367_v42, %v2366_v41 }
 0xc79   : > { %2142 = vadd.xlane.f32.xlu0 %v2141_v53  ;;  %v2138_v54 = vsel %vm1123_vm1, %v9312_v49, 0.0 }
 0xc7a   : > { %2139 = vadd.xlane.f32.xlu1 %v2138_v54  ;;  %v2368_v54 = vld [vmem:[%s9990_s18 + $0x10] sm:$0xff] }
 0xc7d   : > { %2344 = vadd.xlane.f32.xlu0 %v2343_v44  ;;  %v2369_v44 = vld [vmem:[%s9990_s18 + $0x18] sm:$0xff] }
 0xd06   : > { %v2143_v55 = vpop.xlane.xlu0 %2142 }
 0xd07   : > { %v2145_v56 = vmul.f32 0.03125, %v2143_v55  ;;  %v2140_v57 = vpop.xlane.xlu1 %2139  ;;  %v2359_v55 = vrot.slane %v9343_v22, %v9205_v48 }
 0xd08   : > { %v2144_v50 = vmul.f32 0.03125, %v2140_v57 }
 0xd09   : > { %v2147_v51 = vsub.f32 %v9310_v45, %v2145_v56  ;;  %v8326_v56 = vpack.c.bf16 %v2369_v44, %v2368_v54  ;;  %v2673_v54 = vld [vmem:[%s9992_s26 + $0x8] sm:$0xff] }
 0xd0a   : > { %v2146_v35 = vsub.f32 %v9312_v49, %v2144_v50  ;;  %v2345_v10 = vpop.xlane.xlu0 %2344  ;;  %v2364_v50 = vrot.slane %v9343_v22, %v9202_v47 }
 0xd0b   : > { %v2346_v0 = vmul.f32 0.03125, %v2345_v10  ;;  %v2149_v36 = vmul.f32 %v2147_v51, %v2147_v51 }
 0xd0c   : > { %v2148_v34 = vmul.f32 %v2146_v35, %v2146_v35 }
 0xd0d   : > { %v9326_v37 = vsub.f32 %v9315_v52, %v2346_v0  ;;  %v2153_v1 = vsel %vm1123_vm1, %v2149_v36, 0.0 }
 0xd0e   : > { %2154 = vadd.xlane.f32.xlu1 %v2153_v1  ;;  %v2150_v2 = vsel %vm1123_vm1, %v2148_v34, 0.0 }
 0xd0f   : > { %2151 = vadd.xlane.f32.xlu0 %v2150_v2  ;;  %v2348_v3 = vmul.f32 %v9326_v37, %v9326_v37 }
 0xd11   : > { %v2349_v5 = vsel %vm2342_vm12, %v2348_v3, 0.0 }
 0xd13   : > { %2350 = vadd.xlane.f32.xlu0 %v2349_v5 }
 0xd9b   : > { %v2155_v13 = vpop.xlane.xlu1 %2154 }
 0xd9c   : > { %v2157_v14 = vmul.f32 0.03125, %v2155_v13  ;;  %v2152_v15 = vpop.xlane.xlu0 %2151 }
 0xd9d   : > { %v2156_v16 = vmul.f32 0.03125, %v2152_v15 }
 0xd9e   : > { %v2159_v11 = vadd.f32 1e-05, %v2157_v14 }
 0xd9f   : > { %v2158_v19 = vadd.f32 1e-05, %v2156_v16 }
 0xda0   : > { %8599 = vrsqrt.f32 %v2159_v11  ;;  %v2351_v20 = vpop.xlane.xlu0 %2350 }
 0xda1   : > { %8601 = vrsqrt.f32 %v2158_v19  ;;  %v2352_v21 = vmul.f32 0.03125, %v2351_v20 }
 0xda3   : > { %v2353_v23 = vadd.f32 1e-05, %v2352_v21 }
 0xda5   : > { %8603 = vrsqrt.f32 %v2353_v23 }
 0xdaa   : > { %v8600_v25 = vpop.eup %8599 }
 0xdab   : > { %v8602_v26 = vpop.eup %8601  ;;  %v9347_v27 = vmul.f32 %v8600_v25, %v2147_v51 }
 0xdac   : > { %v9349_v28 = vmul.f32 %v8602_v26, %v2146_v35 }
 0xdad   : > { %v2169_v30 = vmul.f32 %v2167_v24, %v9347_v27 }
 0xdae   : > { %v2168_v31 = vmul.f32 %v2167_v24, %v9349_v28 }
 0xdaf   : > { %v2175_v39 = vadd.f32 %v2173_v29, %v2169_v30  ;;  %v8604_v43 = vpop.eup %8603 }
 0xdb0   : > { %v2174_v38 = vadd.f32 %v2173_v29, %v2168_v31  ;;  %v2355_v53 = vmul.f32 %v8604_v43, %v9326_v37 }
 0xdb2   : > { %7684 = vmatprep.mubr.msk.f32.mxu0 %vm1123_vm1, %v2174_v38  ;;  %v2360_v57 = vmul.f32 %v2359_v55, %v2355_v53  ;;  %v2672_v53 = vld [vmem:[%s9992_s26] sm:$0xff]  ;;  %v2674_v55 = vld [vmem:[%s9992_s26 + $0x10] sm:$0xff] }
 0xdb3   : > { %7685 = vmatmul.mubr.msk.f32.vlgmr.msra.gmra.mrb[10].mxu0 %vm1123_vm1, %v2175_v39  ;;  %v8332_v44 = vpack.c.bf16 %v2673_v54, %v2672_v53  ;;  %v2903_v53 = vld [vmem:[%s9994_s10] sm:$0xff]  ;;  %v2904_v54 = vld [vmem:[%s9994_s10 + $0x8] sm:$0xff] }
 0xdb4   : > { %8317 = vmatpush3.bf16.msra.mxu0 %v8314_v12  ;;  %7695 = vmatprep.mubr.msk.f32.mxu0 %vm1123_vm1, %v2174_v38  ;;  %v2365_v51 = vadd.f32 %v2364_v50, %v2360_v57 }
 0xdb5   : > { %8319 = vmatprep.subr.bf16.mxu0 %v8318_v40 }
 0xdb8   : > { %8321 = vmatpush3.bf16.msra.mxu0 %v8318_v40 }
 0xdb9   : > { %8322 = vmatprep.subr.bf16.mxu0 %v8754_v4 }
 0xdbb   : > { %7696 = vmatmul.mubr.msk.f32.vlgmr.msra.gmra.mrb[12].mxu0 %vm1123_vm1, %v2175_v39 }
 0xdbc   : > { %8324 = vmatpush3.bf16.msra.mxu0 %v8323_v46  ;;  %7706 = vmatprep.mubr.msk.f32.mxu0 %vm8755_vm13, %v8756_v62 }
 0xdbd   : > { %8325 = vmatprep.subr.bf16.mxu0 %v8754_v4 }
 0xdc0   : > { %8327 = vmatpush3.bf16.msra.mxu0 %v8326_v56  ;;  %v2675_v56 = vld [vmem:[%s9992_s26 + $0x18] sm:$0xff] }
 0xdc1   : > { %v8335_v50 = vpack.c.bf16 %v2675_v56, %v2674_v55  ;;  %v8344_v55 = vpack.c.bf16 %v2904_v54, %v2903_v53  ;;  %v2906_v56 = vld [vmem:[%s9994_s10 + $0x18] sm:$0xff] }
 0xdc3   : > { %7707 = vmatmul.mubr.msk.f32.vlgmr.msra.gmra.mrb[14].mxu0 %vm1123_vm1, %v2365_v51  ;;  %v7133_v51 = vld [vmem:[%s9992_s26 + $0x20] sm:$0xff] }
 0xe86   : > { %v7686_v35 = vpop.f32.mrb[10].mxu0 }
 0xe87   : > { %v2253_v10 = vpop.f32.mrb[11].mxu0 }
 0xe88   : > { %7711 = vmatprep.mubr.msk.f32.mxu0 %vm1123_vm1, %v2253_v10 }
 0xe8e   : > { %v7697_v0 = vpop.f32.mrb[12].mxu0 }
 0xe8f   : > { %v2333_v36 = vpop.f32.mrb[13].mxu0 }
 0xe90   : > { %v8329_v34 = vpack.c.bf16 %v7697_v0, %v2333_v36  ;;  %v7135_v0 = vld [vmem:[%s9992_s26 + $0x30] sm:$0xff]  ;;  %v7136_v36 = vld [vmem:[%s9992_s26 + $0x38] sm:$0xff] }
 0xe96   : > { %v2439_v37 = vpop.f32.mrb[14].mxu0 }
 0xe97   : > { %v7708_v1 = vpop.f32.mrb[15].mxu0  ;;  %7709 = vmatprep.subr.msk.mxu0 %vm1123_vm1, %v2439_v37 }
 0xe98   : > { %7710 = vmatpush3.xpose.msk.msra.mxu0 %vm1123_vm1, %v2439_v37  ;;  %v8341_v1 = vpack.c.bf16 %v7136_v36, %v7135_v0 }
 0xe99   : > { %8328 = vmatprep.subr.bf16.mxu0 %v8754_v4 }
 0xe9b   : > { %7712 = vmatmul.mubr.msk.f32.vlgmr.msra.gmra.mrb[16].mxu0 %vm1123_vm1, %v7686_v35  ;;  %v7134_v35 = vld [vmem:[%s9992_s26 + $0x28] sm:$0xff] }
 0xe9c   : > { %8330 = vmatpush3.bf16.msra.mxu0 %v8329_v34  ;;  %7718 = vmatprep.mubr.msk.f32.mxu0 %vm8755_vm13, %v8756_v62  ;;  %v8338_v10 = vpack.c.bf16 %v7134_v35, %v7133_v51 }
 0xe9d   : > { %8331 = vmatprep.subr.bf16.mxu0 %v8754_v4 }
 0xf6e   : > { %v7713_v2 = vpop.f32.mrb[16].mxu0 }
 0xf6f   : > { %v2528_v3 = vmul.f32 0.17677669, %v7713_v2  ;;  %v2518_v5 = vpop.f32.mrb[17].mxu0 }
 0xf70   : > { %v2527_v59 = vmul.f32 0.17677669, %v2518_v5  ;;  %v2136_v5 = vld [vmem:[%s9993_s7] sm:$0x3] }
 0xf71   : > { %v2533_v6 = vsel %vm2529_vm14, %v2528_v3, -inf }
 0xf72   : > { %2534 = vmax.xlane.f32.xlu0 %v2533_v6  ;;  %v2530_v8 = vsel %vm2529_vm14, %v2527_v59, -inf }
 0xf73   : > { %2531 = vmax.xlane.f32.xlu1 %v2530_v8 }
 0xfff   : > { %v2535_v60 = vpop.xlane.xlu0 %2534 }
0x1000   : > { %v2537_v9 = vsub.f32 %v2528_v3, %v2535_v60  ;;  %v2532_v58 = vpop.xlane.xlu1 %2531 }
0x1001   : > { %v2536_v63 = vsub.f32 %v2527_v59, %v2532_v58  ;;  %v2761_v59 = vrot.slane %v2136_v5, %v9084_v18 }
0x1002   : > { %v2540_v61 = vmul.f32 1.442695, %v2537_v9  ;;  %v2679_v9 = vrot.slane %v2136_v5, %v9081_v17  ;;  %v7142_v5 = vld [vmem:[%s9994_s10 + $0x30] sm:$0xff] }
0x1003   : > { %v2538_v12 = vmul.f32 1.442695, %v2536_v63 }
0x1004   : > { %8605 = vpow2.f32 %v2540_v61 }
0x1005   : > { %8607 = vpow2.f32 %v2538_v12 }
0x100e   : > { %v8606_v13 = vpop.eup %8605 }
0x100f   : > { %v8608_v14 = vpop.eup %8607  ;;  %v2545_v15 = vsel %vm2529_vm14, %v8606_v13, 0.0 }
0x1010   : > { %2546 = vadd.xlane.f32.xlu0 %v2545_v15  ;;  %v2542_v16 = vsel %vm2529_vm14, %v8608_v14, 0.0 }
0x1011   : > { %2543 = vadd.xlane.f32.xlu1 %v2542_v16 }
0x109d   : > { %v2547_v11 = vpop.xlane.xlu0 %2546 }
0x109e   : > { %8609 = vrcp.f32 %v2547_v11  ;;  %v2544_v19 = vpop.xlane.xlu1 %2543 }
0x109f   : > { %8611 = vrcp.f32 %v2544_v19 }
0x10a8   : > { %v8610_v20 = vpop.eup %8609 }
0x10a9   : > { %v8612_v21 = vpop.eup %8611  ;;  %v2551_v23 = vmul.f32 %v8610_v20, %v8606_v13 }
0x10aa   : > { %v2549_v24 = vmul.f32 %v8612_v21, %v8608_v14 }
0x10ab   : > { %v2553_v25 = vadd.f32 1e-08, %v2551_v23 }
0x10ac   : > { %v2552_v26 = vadd.f32 1e-08, %v2549_v24 }
0x10ad   : > { %v2555_v29 = vsel %vm2529_vm14, %v2553_v25, 0.0 }
0x10ae   : > { %v2554_v30 = vsel %vm2529_vm14, %v2552_v26, 0.0 }
0x10af   : > { %v2556_v31 = vadd.f32 %v2555_v29, %v2554_v30 }
0x10b1   : > { %v2557_v32 = vrot.slane %v2556_v31, 4 }
0x10b3   : > { %v2558_v33 = vadd.f32 %v2557_v32, %v2556_v31 }
0x10b5   : > { %v2559_v38 = vrot.slane %v2558_v33, 2 }
0x10b7   : > { %v2560_v39 = vadd.f32 %v2559_v38, %v2558_v33 }
0x10b9   : > { %v2561_v40 = vrot.slane %v2560_v39, 1 }
0x10bb   : > { %v2562_v41 = vadd.f32 %v2561_v40, %v2560_v39  ;;  %v9427_v39 = vsub.s32 5, %v9078_v7 }
0x10bd   : > { %8613 = vrcp.f32 %v2562_v41  ;;  %v2897_v40 = vrot.slane %v9343_v22, %v9427_v39 }
0x10c7   : > { %v8614_v42 = vpop.eup %8613 }
0x10c8   : > { %v2564_v43 = vmul.f32 %v8614_v42, %v2552_v26  ;;  %v2565_v46 = vmul.f32 %v8614_v42, %v2553_v25 }
0x10ca   : > { %2566 = vxpose.xlu1.b32.start [1/2] (short) (narrow) %v2564_v43, 8  ;;  %v9434_v43 = vsub.s32 4, %v9078_v7 }
0x10ce   : > { %2567 = vxpose.xlu1.b32.end [2/2] (short) (narrow) %v2565_v46, 8  ;;  %v2888_v46 = vrot.slane %v9343_v22, %v9434_v43 }
0x114a   : > { %v2582_v57 = vpop.trf.xlu1 }
0x114b   : > { %7719 = vmatmul.mubr.msk.f32.vlgmr.msra.gmra.mrb[18].mxu0 %vm2598_vm15, %v2582_v57 }
0x114c   : > { %8333 = vmatpush3.bf16.msra.mxu0 %v8332_v44  ;;  %7729 = vmatprep.mubr.msk.f32.mxu0 %vm8755_vm13, %v8756_v62  ;;  %v2905_v44 = vld [vmem:[%s9994_s10 + $0x10] sm:$0xff] }
0x114d   : > { %8334 = vmatprep.subr.bf16.mxu0 %v8754_v4  ;;  %v8347_v57 = vpack.c.bf16 %v2906_v56, %v2905_v44 }
0x1150   : > { %8336 = vmatpush3.bf16.msra.mxu0 %v8335_v50 }
0x1151   : > { %8337 = vmatprep.subr.bf16.mxu0 %v8754_v4 }
0x121e   : > { %v2668_v34 = vpop.f32.mrb[18].mxu0 }
0x121f   : > { %7730 = vmatmul.mubr.msk.f32.vlgmr.msra.gmra.mrb[20].mxu0 %vm1123_vm1, %v2668_v34  ;;  %v7720_v37 = vpop.f32.mrb[19].mxu0 }
0x1220   : > { %8339 = vmatpush3.bf16.msra.mxu0 %v8338_v10  ;;  %7740 = vmatprep.mubr.msk.f32.mxu0 %vm8755_vm13, %v8756_v62  ;;  %v7140_v37 = vld [vmem:[%s9994_s10 + $0x20] sm:$0xff] }
0x1221   : > { %8340 = vmatprep.subr.bf16.mxu0 %v8754_v4 }
0x1224   : > { %8342 = vmatpush3.bf16.msra.mxu0 %v8341_v1  ;;  %v7141_v1 = vld [vmem:[%s9994_s10 + $0x28] sm:$0xff] }
0x1225   : > { %8343 = vmatprep.subr.bf16.mxu0 %v8754_v4 }
0x1227   : > { %7741 = vmatmul.mubr.msk.f32.vlgmr.msra.gmra.mrb[22].mxu0 %vm1123_vm1, %v9315_v52 }
0x1228   : > { %7751 = vmatprep.mubr.msk.f32.mxu0 %vm8755_vm13, %v8756_v62  ;;  %8345 = vmatpush3.bf16.msra.mxu0 %v8344_v55 }
0x1229   : > { %8346 = vmatprep.subr.bf16.mxu0 %v8754_v4 }
0x122c   : > { %8348 = vmatpush3.bf16.msra.mxu0 %v8347_v57 }
0x122d   : > { %8349 = vmatprep.subr.bf16.mxu0 %v8754_v4 }
0x12f2   : > { %v2749_v2 = vpop.f32.mrb[20].mxu0 }
0x12f3   : > { %v7731_v3 = vpop.f32.mrb[21].mxu0  ;;  %v2750_v58 = vadd.f32 %v2749_v2, %v2679_v9  ;;  %v8350_v2 = vpack.c.bf16 %v7141_v1, %v7140_v37 }
0x12fa   : > { %v2831_v6 = vpop.f32.mrb[22].mxu0 }
0x12fb   : > { %v2832_v8 = vadd.f32 %v2831_v6, %v2761_v59  ;;  %v7742_v60 = vpop.f32.mrb[23].mxu0  ;;  %v7143_v59 = vld [vmem:[%s9994_s10 + $0x38] sm:$0xff] }
0x12fc   : > { %v8353_v6 = vpack.c.bf16 %v7143_v59, %v7142_v5 }
0x12fd   : > { %2843 = vrot.lane.b32.xlu0 %v2832_v8, %s9943_s1  ;;  %v2835_v63 = vadd.f32 %v2832_v8, %v2750_v58 }
0x12ff   : > { %v7138_v61 = vmul.f32 -1.442695, %v2835_v63 }
0x1301   : > { %8615 = vpow2.f32 %v7138_v61 }
0x130b   : > { %v8616_v12 = vpop.eup %8615 }
0x130c   : > { %v2839_v13 = vadd.f32 1.0, %v8616_v12 }
0x130e   : > { %8617 = vrcp.f32 %v2839_v13 }
0x1318   : > { %v8618_v14 = vpop.eup %8617 }
0x1319   : > { %v2853_v23 = vsub.f32 1.0, %v8618_v14 }
0x136f   : > { %v2844_v15 = vpop.permute.xlu0 %2843 }
0x1370   : > { %v2846_v16 = vmul.f32 %v8618_v14, %v2844_v15 }
0x1372   : > { %2848 = vrot.lane.b32.xlu0 %v2846_v16, %s9943_s1  ;;  %s9995_s1 = sld [smem:[#allocation19_spill]] }
0x1378   : > { %v3085_v8 = vld [vmem:[%s9995_s1] sm:$0xff]  ;;  %v3086_v60 = vld [vmem:[%s9995_s1 + $0x8] sm:$0xff]  ;;  %v3087_v12 = vld [vmem:[%s9995_s1 + $0x10] sm:$0xff] }
0x1379   : > { %v8355_v9 = vpack.c.bf16 %v3086_v60, %v3085_v8  ;;  %v3088_v13 = vld [vmem:[%s9995_s1 + $0x18] sm:$0xff] }
0x13e4   : > { %v2849_v11 = vpop.permute.xlu0 %2848 }
0x13e5   : > { %v2851_v19 = vadd.f32 %v2849_v11, %v2750_v58  ;;  %v8359_v11 = vpack.c.bf16 %v3088_v13, %v3087_v12 }
0x13e7   : > { %8619 = vtanh.f32 %v2851_v19 }
0x13f1   : > { %v8620_v20 = vpop.eup %8619 }
0x13f2   : > { %2855 = vrot.lane.b32.xlu0 %v8620_v20, %s9947_s2  ;;  %v3170_v20 = vld [vmem:[%s9998_s3] sm:$0xff] }
0x13f6   : > { %2859 = vrot.lane.b32.xlu0 %v9315_v52, %s9945_s28 }
0x1464   : > { %v2856_v21 = vpop.permute.xlu0 %2855 }
0x1465   : > { %v2858_v25 = vmul.f32 %v2856_v21, %v2853_v23  ;;  %v3171_v21 = vld [vmem:[%s9998_s3 + $0x8] sm:$0xff]  ;;  %v3172_v23 = vld [vmem:[%s9998_s3 + $0x10] sm:$0xff] }
0x1468   : > { %v2860_v24 = vpop.permute.xlu0 %2859 }
0x1469   : > { %v2862_v26 = vmul.f32 %v8618_v14, %v2860_v24  ;;  %v8364_v24 = vpack.c.bf16 %v3171_v21, %v3170_v20 }
0x146b   : > { %v9419_v29 = vadd.f32 %v2862_v26, %v2858_v25  ;;  %v3173_v25 = vld [vmem:[%s9998_s3 + $0x18] sm:$0xff] }
0x146c   : > { %v8367_v26 = vpack.c.bf16 %v3173_v25, %v3172_v23 }
0x146d   : > { %2865 = vrot.lane.b32.xlu0 %v9419_v29, %s9947_s2 }
0x14df   : > { %v2866_v30 = vpop.permute.xlu0 %2865 }
0x14e0   : > { %v2868_v31 = vsel %vm2342_vm12, %v2866_v30, 0.0 }
0x14e1   : > { %2869 = vadd.xlane.f32.xlu0 %v2868_v31 }
0x156e   : > { %v2870_v32 = vpop.xlane.xlu0 %2869 }
0x156f   : > { %v2871_v33 = vmul.f32 0.03125, %v2870_v32 }
0x1571   : > { %v2872_v52 = vsub.f32 %v9419_v29, %v2871_v33 }
0x1573   : > { %v2873_v38 = vmul.f32 %v2872_v52, %v2872_v52 }
0x1575   : > { %2875 = vrot.lane.b32.xlu1 %v2873_v38, %s9947_s2 }
0x1579   : > { %2899 = vrot.lane.b32.xlu1 %v2897_v40, %s9945_s28 }
0x15e7   : > { %v2876_v41 = vpop.permute.xlu1 %2875 }
0x15e8   : > { %v2878_v42 = vsel %vm2342_vm12, %v2876_v41, 0.0 }
0x15e9   : > { %2879 = vadd.xlane.f32.xlu0 %v2878_v42 }
0x15eb   : > { %v2900_v0 = vpop.permute.xlu1 %2899 }
0x15ff   : > { %2890 = vrot.lane.b32.xlu0 %v2888_v46, %s9945_s28  ;;  %s9996_s28 = sld [smem:[#allocation17_spill]] }
0x1605   : > { %v2137_v58 = vld [vmem:[%s9996_s28] sm:$0x3] }
0x1606   : > { %v2910_v63 = vrot.slane %v2137_v58, %v9081_v17  ;;  %v3073_v32 = vrot.slane %v2137_v58, %v9084_v18 }
0x1676   : > { %v2880_v7 = vpop.xlane.xlu0 %2879 }
0x1677   : > { %v2881_v50 = vmul.f32 0.03125, %v2880_v7 }
0x1679   : > { %v2882_v51 = vadd.f32 1e-05, %v2881_v50 }
0x167a   : > { %v2891_v35 = vpop.permute.xlu0 %2890 }
0x167b   : > { %8621 = vrsqrt.f32 %v2882_v51 }
0x1685   : > { %v8622_v22 = vpop.eup %8621 }
0x1686   : > { %v2884_v10 = vmul.f32 %v8622_v22, %v2872_v52 }
0x1688   : > { %v2893_v36 = vmul.f32 %v2891_v35, %v2884_v10 }
0x168a   : > { %v2902_v34 = vadd.f32 %v2900_v0, %v2893_v36 }
0x168c   : > { %2912 = vrot.lane.b32.xlu1 %v2902_v34, %s9947_s2  ;;  %s9997_s2 = sld [smem:[#allocation18_spill]] }
0x1692   : > { %v3079_v19 = vld [vmem:[%s9997_s2] sm:$0xf] }
0x1693   : > { %3081 = vrot.lane.b32.xlu0 %v3079_v19, %s9999_s5 }
0x16fe   : > { %v2913_v3 = vpop.permute.xlu1 %2912 }
0x16ff   : > { %7752 = vmatmul.mubr.msk.f32.vlgmr.msra.gmra.mrb[24].mxu0 %vm1123_vm1, %v2913_v3 }
0x1700   : > { %8351 = vmatpush3.bf16.msra.mxu0 %v8350_v2  ;;  %7762 = vmatprep.mubr.msk.f32.mxu0 %vm8755_vm13, %v8756_v62 }
0x1701   : > { %8352 = vmatprep.subr.bf16.mxu0 %v8754_v4 }
0x1704   : > { %8354 = vmatpush3.bf16.msra.mxu0 %v8353_v6 }
0x1705   : > { %8356 = vmatprep.subr.bf16.mxu0 %v8355_v9  ;;  %v3082_v42 = vpop.permute.xlu0 %3081 }
0x17d2   : > { %v2982_v61 = vpop.f32.mrb[24].mxu0 }
0x17d3   : > { %v2983_v14 = vadd.f32 %v2982_v61, %v2910_v63  ;;  %v7753_v15 = vpop.f32.mrb[25].mxu0 }
0x17d5   : > { %v2986_v16 = vmax.f32 %v2983_v14, 0.0 }
0x17d7   : > { %7763 = vmatmul.mubr.msk.f32.vlgmr.msra.gmra.mrb[26].mxu0 %vm1123_vm1, %v2986_v16 }
0x17d8   : > { %8358 = vmatpush3.bf16.msra.mxu0 %v8355_v9  ;;  %7773 = vmatprep.mubr.msk.f32.mxu0 %vm1123_vm1, %v9312_v49 }
0x17d9   : > { %8360 = vmatprep.subr.bf16.mxu0 %v8359_v11 }
0x17dc   : > { %8362 = vmatpush3.bf16.msra.mxu0 %v8359_v11 }
0x17dd   : > { %8363 = vmatprep.subr.bf16.mxu0 %v8754_v4 }
0x17df   : > { %7774 = vmatmul.mubr.msk.f32.vlgmr.msra.gmra.mrb[28].mxu0 %vm1123_vm1, %v9310_v45 }
0x17e0   : > { %7784 = vmatprep.mubr.msk.f32.mxu0 %vm8755_vm13, %v8756_v62  ;;  %8365 = vmatpush3.bf16.msra.mxu0 %v8364_v24 }
0x17e1   : > { %8366 = vmatprep.subr.bf16.mxu0 %v8754_v4 }
0x17e4   : > { %8368 = vmatpush3.bf16.msra.mxu0 %v8367_v26 }
0x18aa   : > { %v3061_v30 = vpop.f32.mrb[26].mxu0 }
0x18ab   : > { %3066 = vrot.lane.b32.xlu1 %v3061_v30, %s9999_s5  ;;  %v7764_v31 = vpop.f32.mrb[27].mxu0 }
0x18af   : > { %3075 = vrot.lane.b32.xlu1 %v3073_v32, %s9999_s5 }
0x18b2   : > { %v7775_v33 = vpop.f32.mrb[28].mxu0 }
0x18b3   : > { %v3161_v52 = vpop.f32.mrb[29].mxu0 }
0x191d   : > { %v3067_v38 = vpop.permute.xlu1 %3066 }
0x191e   : > { %v3069_v40 = vadd.f32 %v3067_v38, %v9419_v29 }
0x1921   : > { %v3076_v41 = vpop.permute.xlu1 %3075 }
0x1922   : > { %v3078_v46 = vadd.f32 %v3076_v41, %v3069_v40  ;;  %v9512_v40 = vld [vmem:[%s9989_s16 + $0x4] sm:$0xf] }
0x1924   : > { %v3084_v53 = vadd.f32 %v3082_v42, %v3078_v46  ;;  %v3950_v42 = vsel %vm2342_vm12, %v9512_v40, 0.0 }
0x1926   : > { %3175 = vrot.lane.b32.xlu1 %v3084_v53, %s10000_s6 }
0x1998   : > { %v3176_v54 = vpop.permute.xlu1 %3175 }
0x1999   : > { %7785 = vmatmul.mubr.msk.f32.vlgmr.msra.gmra.mrb[30].mxu0 %vm1123_vm1, %v3176_v54 }
0x199a   : > { %7789 = vmatprep.mubr.msk.f32.mxu0 %vm2598_vm15, %v3161_v52 }
0x1a6c   : > { %v3245_v44 = vpop.f32.mrb[30].mxu0 }
0x1a6d   : > { %v7786_v55 = vpop.f32.mrb[31].mxu0  ;;  %7787 = vmatprep.subr.msk.mxu0 %vm2598_vm15, %v3245_v44 }
0x1a6e   : > { %7788 = vmatpush3.xpose.msk.msra.mxu0 %vm2598_vm15, %v3245_v44 }
0x1a71   : > { %7790 = vmatmul.mubr.msk.f32.vlgmr.msra.gmra.mrb[32].mxu0 %vm2598_vm15, %v7775_v33 }
0x1b44   : > { %v7791_v29 = vpop.f32.mrb[32].mxu0 }
0x1b45   : > { %v3334_v56 = vmul.f32 0.25, %v7791_v29  ;;  %v3324_v57 = vpop.f32.mrb[33].mxu0 }
0x1b46   : > { %v3333_v7 = vmul.f32 0.25, %v3324_v57 }
0x1b47   : > { %v3338_v50 = vsel %vm2529_vm14, %v3334_v56, -inf }
0x1b48   : > { %3339 = vmax.xlane.f32.xlu1 %v3338_v50  ;;  %v3335_v51 = vsel %vm2529_vm14, %v3333_v7, -inf }
0x1b49   : > { %3336 = vmax.xlane.f32.xlu0 %v3335_v51 }
0x1b59   : > { %3361 = vrot.lane.b32.xlu1 %v3245_v44, %s10000_s6 }
0x1b5d   : > { %3446 = vrot.lane.b32.xlu1 %v3161_v52, %s9951_s8 }
0x1b61   : > { %3448 = vrot.lane.b32.xlu1 %v7775_v33, %s9951_s8 }
0x1bd5   : > { %v3340_v22 = vpop.xlane.xlu1 %3339 }
0x1bd6   : > { %v3342_v35 = vsub.f32 %v3334_v56, %v3340_v22  ;;  %v3337_v10 = vpop.xlane.xlu0 %3336 }
0x1bd7   : > { %v3341_v0 = vsub.f32 %v3333_v7, %v3337_v10 }
0x1bd8   : > { %v3345_v36 = vmul.f32 1.442695, %v3342_v35 }
0x1bd9   : > { %v3343_v34 = vmul.f32 1.442695, %v3341_v0  ;;  %v3362_v37 = vpop.permute.xlu1 %3361 }
0x1bda   : > { %8623 = vpow2.f32 %v3345_v36  ;;  %7792 = vmatprep.subr.msk.mxu0 %vm1467_vm4, %v3362_v37 }
0x1bdb   : > { %7793 = vmatpush3.msk.msra.mxu0 %vm1467_vm4, %v3362_v37  ;;  %8625 = vpow2.f32 %v3343_v34  ;;  %v7179_v37 = vld [vmem:[%s9990_s18 + $0x60] sm:$0xff] }
0x1bdd   : > { %v3447_v58 = vpop.permute.xlu1 %3446 }
0x1be1   : > { %v3449_v12 = vpop.permute.xlu1 %3448 }
0x1be4   : > { %v8624_v1 = vpop.eup %8623 }
0x1be5   : > { %v3350_v2 = vsel %vm2529_vm14, %v8624_v1, 0.0  ;;  %v8626_v3 = vpop.eup %8625 }
0x1be6   : > { %3351 = vadd.xlane.f32.xlu0 %v3350_v2  ;;  %v3347_v5 = vsel %vm2529_vm14, %v8626_v3, 0.0  ;;  %v7181_v2 = vld [vmem:[%s9990_s18 + $0x70] sm:$0xff] }
0x1bea   : > { %3348 = vadd.xlane.f32.xlu0 %v3347_v5  ;;  %v7182_v5 = vld [vmem:[%s9990_s18 + $0x78] sm:$0xff] }
0x1c00   : > { %3450 = vrot.lane.b32.xlu0 %v3245_v44, %s9951_s8  ;;  %s9953_s8 = smov 80  }
0x1c73   : > { %v3352_v59 = vpop.xlane.xlu0 %3351 }
0x1c74   : > { %8627 = vrcp.f32 %v3352_v59  ;;  %v8397_v59 = vpack.c.bf16 %v7182_v5, %v7181_v2 }
0x1c77   : > { %v3349_v6 = vpop.xlane.xlu0 %3348 }
0x1c78   : > { %8629 = vrcp.f32 %v3349_v6  ;;  %v3656_v6 = vld [vmem:[%s8908_s27] sm:$0xff] }
0x1c7b   : > { %v3451_v8 = vpop.permute.xlu0 %3450 }
0x1c7c   : > { %7797 = vmatprep.subr.msk.mxu0 %vm2598_vm15, %v3451_v8 }
0x1c7e   : > { %v8628_v60 = vpop.eup %8627 }
0x1c7f   : > { %v3356_v61 = vmul.f32 %v8628_v60, %v8624_v1  ;;  %v7180_v1 = vld [vmem:[%s9990_s18 + $0x68] sm:$0xff]  ;;  %v3658_v60 = vld [vmem:[%s8908_s27 + $0x10] sm:$0xff] }
0x1c81   : > { %v3358_v0 = vmul.f32 0.5, %v3356_v61 }
0x1c82   : > { %v8630_v9 = vpop.eup %8629 }
0x1c83   : > { %v3354_v63 = vmul.f32 %v8630_v9, %v8626_v3  ;;  %v8394_v3 = vpack.c.bf16 %v7180_v1, %v7179_v37 }
0x1c85   : > { %7794 = vmatprep.mubr.msk.f32.mxu0 %vm2529_vm14, %v3354_v63  ;;  %v3357_v7 = vmul.f32 0.5, %v3354_v63  ;;  %8395 = vmatpush3.bf16.msra.mxu1 %v8394_v3 }
0x1c86   : > { %7795 = vmatmul.mubr.msk.f32.vlgmr.msra.gmra.mrb[34].mxu0 %vm2529_vm14, %v3356_v61  ;;  %8396 = vmatprep.subr.bf16.mxu1 %v8754_v4 }
0x1c87   : > { %7798 = vmatpush3.xpose.msk.msra.mxu0 %vm2598_vm15, %v3451_v8  ;;  %7799 = vmatprep.mubr.msk.f32.mxu0 %vm2598_vm15, %v3447_v58  ;;  %v3657_v8 = vld [vmem:[%s8908_s27 + $0x8] sm:$0xff]  ;;  %v3659_v58 = vld [vmem:[%s8908_s27 + $0x18] sm:$0xff] }
0x1c88   : > { %v8369_v9 = vpack.c.bf16 %v3657_v8, %v3656_v6  ;;  %v8373_v63 = vpack.c.bf16 %v3659_v58, %v3658_v60 }
0x1c89   : > { %8398 = vmatpush3.bf16.msra.mxu1 %v8397_v59 }
0x1c8a   : > { %7800 = vmatmul.mubr.msk.f32.vlgmr.msra.gmra.mrb[36].mxu0 %vm2598_vm15, %v3449_v12  ;;  %8399 = vmatprep.subr.bf16.mxu1 %v8754_v4 }
0x1d59   : > { %v9501_v13 = vpop.f32.mrb[34].mxu0 }
0x1d5a   : > { %v9503_v14 = vpop.f32.mrb[35].mxu0 }
0x1d5d   : > { %v7801_v15 = vpop.f32.mrb[36].mxu0 }
0x1d5e   : > { %v3534_v16 = vmul.f32 0.25, %v7801_v15  ;;  %v3524_v11 = vpop.f32.mrb[37].mxu0 }
0x1d5f   : > { %v3533_v19 = vmul.f32 0.25, %v3524_v11 }
0x1d60   : > { %v3538_v20 = vsel %vm2529_vm14, %v3534_v16, -inf }
0x1d61   : > { %3539 = vmax.xlane.f32.xlu1 %v3538_v20  ;;  %v3535_v21 = vsel %vm2529_vm14, %v3533_v19, -inf }
0x1d62   : > { %3536 = vmax.xlane.f32.xlu0 %v3535_v21 }
0x1d72   : > { %3561 = vrot.lane.b32.xlu1 %v3245_v44, %s9953_s8  ;;  %s8521_s8 = smul.u32 48, %s10007_s23 }
0x1d74   : > { %s9521_s9 = scalar_lea.vmem %s8923_s20, %s8521_s8  ;;  %s9956_s8 = smov 16  }
0x1dee   : > { %v3540_v23 = vpop.xlane.xlu1 %3539 }
0x1def   : > { %v3542_v24 = vsub.f32 %v3534_v16, %v3540_v23  ;;  %v3537_v25 = vpop.xlane.xlu0 %3536  ;;  %v9540_v16 = vld [vmem:[%s9991_s0 + $0x8] sm:$0x3f] }
0x1df0   : > { %v3541_v26 = vsub.f32 %v3533_v19, %v3537_v25  ;;  %v3966_v11 = vrot.slane %v9540_v16, %v9205_v48  ;;  %v3971_v21 = vrot.slane %v9540_v16, %v9202_v47  ;;  %v7167_v25 = vld [vmem:[%s9990_s18 + $0x80] sm:$0xff] }
0x1df1   : > { %v3545_v30 = vmul.f32 1.442695, %v3542_v24 }
0x1df2   : > { %v3543_v31 = vmul.f32 1.442695, %v3541_v26  ;;  %v3562_v32 = vpop.permute.xlu1 %3561  ;;  %v7168_v26 = vld [vmem:[%s9990_s18 + $0x88] sm:$0xff] }
0x1df3   : > { %7802 = vmatprep.subr.msk.mxu0 %vm1467_vm4, %v3562_v32 }
0x1df4   : > { %8631 = vpow2.f32 %v3543_v31  ;;  %7803 = vmatpush3.msk.msra.mxu0 %vm1467_vm4, %v3562_v32 }
0x1df5   : > { %8633 = vpow2.f32 %v3545_v30  ;;  %8370 = vmatprep.subr.bf16.mxu0 %v8369_v9  ;;  %v8377_v30 = vpack.c.bf16 %v7168_v26, %v7167_v25 }
0x1dfe   : > { %v8632_v33 = vpop.eup %8631 }
0x1dff   : > { %v3547_v52 = vsel %vm2529_vm14, %v8632_v33, 0.0  ;;  %v8634_v38 = vpop.eup %8633 }
0x1e00   : > { %3548 = vadd.xlane.f32.xlu0 %v3547_v52  ;;  %v3550_v41 = vsel %vm2529_vm14, %v8634_v38, 0.0 }
0x1e04   : > { %3551 = vadd.xlane.f32.xlu0 %v3550_v41  ;;  %v7169_v41 = vld [vmem:[%s9990_s18 + $0x90] sm:$0xff] }
0x1e08   : > { %3951 = vadd.xlane.f32.xlu0 %v3950_v42  ;;  %v7170_v42 = vld [vmem:[%s9990_s18 + $0x98] sm:$0xff] }
0x1e8d   : > { %v3549_v46 = vpop.xlane.xlu0 %3548 }
0x1e8e   : > { %8635 = vrcp.f32 %v3549_v46 }
0x1e91   : > { %v3552_v53 = vpop.xlane.xlu0 %3551 }
0x1e92   : > { %8637 = vrcp.f32 %v3552_v53 }
0x1e95   : > { %v3952_v54 = vpop.xlane.xlu0 %3951 }
0x1e96   : > { %v3953_v44 = vmul.f32 0.03125, %v3952_v54 }
0x1e98   : > { %v8636_v55 = vpop.eup %8635  ;;  %v3954_v29 = vsub.f32 %v9512_v40, %v3953_v44  ;;  %v8381_v44 = vpack.c.bf16 %v7170_v42, %v7169_v41 }
0x1e99   : > { %v3554_v56 = vmul.f32 %v8636_v55, %v8632_v33  ;;  %v3775_v33 = vrot.slane %v9540_v16, %v9081_v17 }
0x1e9a   : > { %v3955_v57 = vmul.f32 %v3954_v29, %v3954_v29 }
0x1e9b   : > { %v3557_v50 = vmul.f32 0.5, %v3554_v56  ;;  %7804 = vmatprep.mubr.msk.f32.mxu0 %vm2529_vm14, %v3554_v56  ;;  %v3776_v52 = vmul.f32 %v3775_v33, %v9349_v28  ;;  %v7173_v56 = vld [vmem:[%s9990_s18 + $0xa0] sm:$0xff] }
0x1e9c   : > { %v8638_v51 = vpop.eup %8637  ;;  %v3956_v22 = vsel %vm2342_vm12, %v3955_v57, 0.0  ;;  %v7174_v57 = vld [vmem:[%s9990_s18 + $0xa8] sm:$0xff] }
0x1e9d   : > { %v3556_v35 = vmul.f32 %v8638_v51, %v8634_v38  ;;  %v3559_v10 = vadd.f32 %v3557_v50, %v3357_v7  ;;  %3957 = vadd.xlane.f32.xlu0 %v3956_v22  ;;  %v3781_v38 = vrot.slane %v9540_v16, %v9084_v18  ;;  %v3777_v7 = vmul.f32 %v3775_v33, %v9347_v27  ;;  %v7175_v51 = vld [vmem:[%s9990_s18 + $0xb0] sm:$0xff] }
0x1e9e   : > { %v8385_v50 = vpack.c.bf16 %v7174_v57, %v7173_v56 }
0x1e9f   : > { %v3558_v36 = vmul.f32 0.5, %v3556_v35  ;;  %3762 = vst.msk [vmem:[%s9521_s9] sm:$0xff] %vm2529_vm14, %v3559_v10  ;;  %7805 = vmatmul.mubr.msk.f32.vlgmr.msra.gmra.mrb[38].mxu0 %vm2529_vm14, %v3556_v35  ;;  %v3783_v22 = vadd.f32 %v3781_v38, %v3777_v7 }
0x1ea0   : > { %8372 = vmatpush3.bf16.msra.mxu0 %v8369_v9 }
0x1ea1   : > { %v3560_v34 = vadd.f32 %v3558_v36, %v3358_v0  ;;  %8374 = vmatprep.subr.bf16.mxu0 %v8373_v63  ;;  %v7160_v0 = vld [vmem:[%s8913_s4] ss:$0 sm:$0xff] }
0x1ea3   : > { %3763 = vst.msk [vmem:[%s9521_s9 + $0x8] sm:$0xff] %vm2529_vm14, %v3560_v34 }
0x1ea4   : > { %8376 = vmatpush3.bf16.msra.mxu0 %v8373_v63 }
0x1ea5   : > { %8378 = vmatprep.subr.bf16.mxu0 %v8377_v30 }
0x1f2a   : > { %v3958_v61 = vpop.xlane.xlu0 %3957 }
0x1f2b   : > { %v3959_v12 = vmul.f32 0.03125, %v3958_v61 }
0x1f2d   : > { %v3960_v15 = vadd.f32 1e-05, %v3959_v12 }
0x1f2f   : > { %8639 = vrsqrt.f32 %v3960_v15 }
0x1f39   : > { %v8640_v19 = vpop.eup %8639 }
0x1f3a   : > { %v3962_v20 = vmul.f32 %v8640_v19, %v3954_v29  ;;  %v3782_v29 = vadd.f32 %v3781_v38, %v3776_v52 }
0x1f3c   : > { %v3967_v23 = vmul.f32 %v3966_v11, %v3962_v20 }
0x1f3e   : > { %v3972_v24 = vadd.f32 %v3971_v21, %v3967_v23 }
0x1f40   : > { %7849 = vmatmul.mubr.msk.f32.vlgmr.msra.gmra.mrb[6].mxu1 %vm1123_vm1, %v3972_v24 }
0x1f41   : > { %7860 = vmatprep.mubr.msk.f32.mxu1 %vm8755_vm13, %v8756_v62 }
0x1f72   : > { %v7806_v31 = vpop.f32.mrb[38].mxu0 }
0x1f73   : > { %3650 = vrot.lane.b32.xlu1 %v7806_v31, %s9956_s8  ;;  %v3637_v32 = vpop.f32.mrb[39].mxu0 }
0x1f74   : > { %3648 = vrot.lane.b32.xlu0 %v3637_v32, %s9956_s8  ;;  %s7098_s8 = sshll.u32 %s10007_s23, 2  ;;  %s10002_s23 = smov 64  }
0x1f75   : > { %s9587_s11 = scalar_lea.vmem %s10001_s12, %s7098_s8  ;;  %s10003_s8 = smov 112  }
0x1f76   : > { %s10004_s12 = smov 80  }
0x1fe5   : > { %v3651_v46 = vpop.permute.xlu1 %3650 }
0x1fe6   : > { %v3649_v53 = vpop.permute.xlu0 %3648  ;;  %v3655_v55 = vsel %vm2598_vm15, %v9501_v13, %v3651_v46 }
0x1fe7   : > { %v3654_v54 = vsel %vm2598_vm15, %v9503_v14, %v3649_v53  ;;  %v7176_v14 = vld [vmem:[%s9990_s18 + $0xb8] sm:$0xff] }
0x1fe8   : > { %7815 = vmatprep.mubr.msk.f32.mxu0 %vm1123_vm1, %v3654_v54  ;;  %v8389_v13 = vpack.c.bf16 %v7176_v14, %v7175_v51 }
0x1fe9   : > { %7816 = vmatmul.mubr.msk.f32.vlgmr.msra.gmra.mrb[40].mxu0 %vm1123_vm1, %v3655_v55 }
0x1fea   : > { %8380 = vmatpush3.bf16.msra.mxu0 %v8377_v30  ;;  %7826 = vmatprep.mubr.msk.f32.mxu0 %vm1123_vm1, %v3782_v29 }
0x1feb   : > { %8382 = vmatprep.subr.bf16.mxu0 %v8381_v44 }
0x1fee   : > { %8384 = vmatpush3.bf16.msra.mxu0 %v8381_v44 }
0x1fef   : > { %8386 = vmatprep.subr.bf16.mxu0 %v8385_v50 }
0x1ff1   : > { %7827 = vmatmul.mubr.msk.f32.vlgmr.msra.gmra.mrb[42].mxu0 %vm1123_vm1, %v3783_v22 }
0x1ff2   : > { %8388 = vmatpush3.bf16.msra.mxu0 %v8385_v50  ;;  %7837 = vmatprep.mubr.msk.f32.mxu0 %vm1123_vm1, %v3782_v29 }
0x1ff3   : > { %8390 = vmatprep.subr.bf16.mxu0 %v8389_v13 }
0x1ff6   : > { %8392 = vmatpush3.bf16.msra.mxu0 %v8389_v13 }
0x1ff9   : > { %7838 = vmatmul.mubr.msk.f32.vlgmr.msra.gmra.mrb[44].mxu0 %vm1123_vm1, %v3783_v22 }
0x2013   : > { %v4047_v35 = vpop.f32.mrb[6].mxu1 }
0x2014   : > { %v7850_v10 = vpop.f32.mrb[7].mxu1  ;;  %7851 = vmatprep.subr.msk.mxu0 %vm1123_vm1, %v4047_v35 }
0x2015   : > { %7852 = vmatpush3.xpose.msk.msra.mxu0 %vm1123_vm1, %v4047_v35 }
0x2016   : > { %8402 = vmatprep.subr.bf16.mxu0 %v8754_v4 }
0x20bc   : > { %v7817_v36 = vpop.f32.mrb[40].mxu0 }
0x20bd   : > { %v3745_v34 = vadd.f32 %v7817_v36, %v7160_v0  ;;  %v3739_v37 = vpop.f32.mrb[41].mxu0 }
0x20be   : > { %v3740_v1 = vadd.f32 %v7160_v0, %v3739_v37 }
0x20bf   : > { %v3750_v2 = vsel %vm3748_vm0, %v3745_v34, 0.0 }
0x20c0   : > { %v3749_v3 = vsel %vm3748_vm0, %v3740_v1, 0.0 }
0x20c1   : > { %v3751_v5 = vadd.f32 %v3750_v2, %v3749_v3  ;;  %v7188_v3 = vld [vmem:[%s9992_s26 + $0x40] sm:$0xff] }
0x20c3   : > { %v3752_v59 = vrot.slane %v3751_v5, 4 }
0x20c4   : > { %v7828_v6 = vpop.f32.mrb[42].mxu0 }
0x20c5   : > { %v3753_v8 = vadd.f32 %v3752_v59, %v3751_v5  ;;  %v3861_v60 = vpop.f32.mrb[43].mxu0  ;;  %v7189_v5 = vld [vmem:[%s9992_s26 + $0x48] sm:$0xff]  ;;  %v7190_v59 = vld [vmem:[%s9992_s26 + $0x50] sm:$0xff] }
0x20c6   : > { %7853 = vmatprep.mubr.msk.f32.mxu0 %vm1123_vm1, %v3861_v60 }
0x20c7   : > { %v3754_v9 = vrot.slane %v3753_v8, 2  ;;  %7854 = vmatmul.mubr.msk.f32.vlgmr.msra.gmra.mrb[46].mxu0 %vm1123_vm1, %v7828_v6  ;;  %v8403_v6 = vpack.c.bf16 %v7189_v5, %v7188_v3  ;;  %v7200_v3 = vld [vmem:[%s9994_s10 + $0x48] sm:$0xff]  ;;  %v7201_v5 = vld [vmem:[%s9994_s10 + $0x50] sm:$0xff] }
0x20c8   : > { %7871 = vmatprep.mubr.msk.f32.mxu0 %vm8755_vm13, %v8756_v62 }
0x20c9   : > { %v3755_v58 = vadd.f32 %v3754_v9, %v3753_v8  ;;  %v7191_v8 = vld [vmem:[%s9992_s26 + $0x58] sm:$0xff]  ;;  %8404 = vmatpush3.bf16.msra.mxu0 %v8403_v6  ;;  %v7193_v9 = vld [vmem:[%s9992_s26 + $0x60] sm:$0xff] }
0x20ca   : > { %v8406_v60 = vpack.c.bf16 %v7191_v8, %v7190_v59  ;;  %8405 = vmatprep.subr.bf16.mxu0 %v8754_v4  ;;  %v7202_v6 = vld [vmem:[%s9994_s10 + $0x58] sm:$0xff]  ;;  %v7210_v8 = vld [vmem:[%s9995_s1 + $0x20] sm:$0xff] }
0x20cb   : > { %v3756_v63 = vrot.slane %v3755_v58, 1 }
0x20cc   : > { %v7839_v61 = vpop.f32.mrb[44].mxu0 }
0x20cd   : > { %v3757_v12 = vadd.f32 %v3756_v63, %v3755_v58  ;;  %v3941_v15 = vpop.f32.mrb[45].mxu0  ;;  %8407 = vmatpush3.bf16.msra.mxu0 %v8406_v60  ;;  %v7194_v58 = vld [vmem:[%s9992_s26 + $0x68] sm:$0xff] }
0x20ce   : > { %v8400_v11 = vpack.c.bf16 %v7839_v61, %v3941_v15  ;;  %8414 = vmatprep.subr.bf16.mxu0 %v8754_v4  ;;  %v8409_v63 = vpack.c.bf16 %v7194_v58, %v7193_v9  ;;  %v7195_v61 = vld [vmem:[%s9992_s26 + $0x70] sm:$0xff]  ;;  %v7211_v60 = vld [vmem:[%s9995_s1 + $0x28] sm:$0xff]  ;;  %v8418_v9 = vpack.c.bf16 %v7202_v6, %v7201_v5 }
0x20cf   : > { %v3759_v19 = vmul.f32 0.0625, %v3757_v12  ;;  %v7196_v12 = vld [vmem:[%s9992_s26 + $0x78] sm:$0xff]  ;;  %v8426_v58 = vpack.c.bf16 %v7211_v60, %v7210_v8 }
0x20d0   : > { %8401 = vmatpush3.bf16.msra.mxu1 %v8400_v11  ;;  %v8412_v11 = vpack.c.bf16 %v7196_v12, %v7195_v61 }
0x20d1   : > { %3761 = vst.msk [vmem:[%s9587_s11] sm:$0x1] %vm3760_vm2, %v3759_v19  ;;  %8408 = vmatprep.subr.bf16.mxu1 %v8754_v4 }
0x219a   : > { %v7855_v20 = vpop.f32.mrb[46].mxu0 }
0x219b   : > { %v4136_v21 = vmul.f32 0.17677669, %v7855_v20  ;;  %v4126_v23 = vpop.f32.mrb[47].mxu0 }
0x219c   : > { %v4135_v24 = vmul.f32 0.17677669, %v4126_v23 }
0x219d   : > { %v4140_v25 = vsel %vm2529_vm14, %v4136_v21, -inf }
0x219e   : > { %4141 = vmax.xlane.f32.xlu0 %v4140_v25  ;;  %v4137_v26 = vsel %vm2529_vm14, %v4135_v24, -inf }
0x219f   : > { %4138 = vmax.xlane.f32.xlu1 %v4137_v26 }
0x222b   : > { %v4142_v30 = vpop.xlane.xlu0 %4141 }
0x222c   : > { %v4144_v31 = vsub.f32 %v4136_v21, %v4142_v30  ;;  %v4139_v32 = vpop.xlane.xlu1 %4138  ;;  %v7165_v21 = vld [vmem:[%s9993_s7 + $0x2] sm:$0x3] }
0x222d   : > { %v4143_v33 = vsub.f32 %v4135_v24, %v4139_v32  ;;  %v4368_v23 = vrot.slane %v7165_v21, %v9084_v18  ;;  %v4286_v30 = vrot.slane %v7165_v21, %v9081_v17  ;;  %v7205_v21 = vld [vmem:[%s9994_s10 + $0x68] sm:$0xff] }
0x222e   : > { %v4147_v52 = vmul.f32 1.442695, %v4144_v31 }
0x222f   : > { %v4145_v38 = vmul.f32 1.442695, %v4143_v33 }
0x2231   : > { %8641 = vpow2.f32 %v4145_v38 }
0x2232   : > { %8643 = vpow2.f32 %v4147_v52 }
0x223b   : > { %v8642_v41 = vpop.eup %8641 }
0x223c   : > { %v4149_v42 = vsel %vm2529_vm14, %v8642_v41, 0.0  ;;  %v8644_v46 = vpop.eup %8643 }
0x223d   : > { %4150 = vadd.xlane.f32.xlu1 %v4149_v42  ;;  %v4152_v53 = vsel %vm2529_vm14, %v8644_v46, 0.0 }
0x2241   : > { %4153 = vadd.xlane.f32.xlu1 %v4152_v53 }
0x22ca   : > { %v4151_v54 = vpop.xlane.xlu1 %4150 }
0x22cb   : > { %8645 = vrcp.f32 %v4151_v54 }
0x22ce   : > { %v4154_v44 = vpop.xlane.xlu1 %4153 }
0x22cf   : > { %8647 = vrcp.f32 %v4154_v44 }
0x22d5   : > { %v8646_v55 = vpop.eup %8645 }
0x22d6   : > { %v4156_v29 = vmul.f32 %v8646_v55, %v8642_v41 }
0x22d8   : > { %v4159_v7 = vadd.f32 1e-08, %v4156_v29 }
0x22d9   : > { %v8648_v56 = vpop.eup %8647 }
0x22da   : > { %v4158_v57 = vmul.f32 %v8648_v56, %v8644_v46  ;;  %v4161_v51 = vsel %vm2529_vm14, %v4159_v7, 0.0 }
0x22dc   : > { %v4160_v50 = vadd.f32 1e-08, %v4158_v57 }
0x22de   : > { %v4162_v14 = vsel %vm2529_vm14, %v4160_v50, 0.0 }
0x22df   : > { %v4163_v22 = vadd.f32 %v4162_v14, %v4161_v51 }
0x22e1   : > { %v4164_v13 = vrot.slane %v4163_v22, 4 }
0x22e3   : > { %v4165_v35 = vadd.f32 %v4164_v13, %v4163_v22 }
0x22e5   : > { %v4166_v10 = vrot.slane %v4165_v35, 2 }
0x22e7   : > { %v4167_v0 = vadd.f32 %v4166_v10, %v4165_v35 }
0x22e9   : > { %v4168_v36 = vrot.slane %v4167_v0, 1 }
0x22eb   : > { %v4169_v34 = vadd.f32 %v4168_v36, %v4167_v0  ;;  %v4504_v36 = vrot.slane %v9540_v16, %v9427_v39 }
0x22ed   : > { %8649 = vrcp.f32 %v4169_v34 }
0x22f7   : > { %v8650_v37 = vpop.eup %8649 }
0x22f8   : > { %v4171_v1 = vmul.f32 %v8650_v37, %v4159_v7  ;;  %v4172_v2 = vmul.f32 %v8650_v37, %v4160_v50 }
0x22fa   : > { %4173 = vxpose.xlu0.b32.start [1/2] (short) (narrow) %v4171_v1, 8  ;;  %v4495_v1 = vrot.slane %v9540_v16, %v9434_v43 }
0x22fe   : > { %4174 = vxpose.xlu0.b32.end [2/2] (short) (narrow) %v4172_v2, 8  ;;  %v7199_v2 = vld [vmem:[%s9994_s10 + $0x40] sm:$0xff] }
0x22ff   : > { %v8415_v59 = vpack.c.bf16 %v7200_v3, %v7199_v2 }
0x237a   : > { %v4189_v15 = vpop.trf.xlu0 }
0x237b   : > { %7861 = vmatmul.mubr.msk.f32.vlgmr.msra.gmra.mrb[8].mxu1 %vm2598_vm15, %v4189_v15 }
0x237c   : > { %8410 = vmatpush3.bf16.msra.mxu1 %v8409_v63  ;;  %7882 = vmatprep.mubr.msk.f32.mxu1 %vm8755_vm13, %v8756_v62 }
0x237d   : > { %8411 = vmatprep.subr.bf16.mxu1 %v8754_v4 }
0x2380   : > { %8413 = vmatpush3.bf16.msra.mxu1 %v8412_v11 }
0x2381   : > { %8420 = vmatprep.subr.bf16.mxu1 %v8754_v4 }
0x2383   : > { %7883 = vmatmul.mubr.msk.f32.vlgmr.msra.gmra.mrb[10].mxu1 %vm1123_vm1, %v9512_v40 }
0x2384   : > { %7904 = vmatprep.mubr.msk.f32.mxu1 %vm8755_vm13, %v8756_v62 }
0x244e   : > { %v4274_v19 = vpop.f32.mrb[8].mxu1 }
0x244f   : > { %7872 = vmatmul.mubr.msk.f32.vlgmr.msra.gmra.mrb[48].mxu0 %vm1123_vm1, %v4274_v19  ;;  %v7862_v20 = vpop.f32.mrb[9].mxu1 }
0x2450   : > { %7893 = vmatprep.mubr.msk.f32.mxu0 %vm8755_vm13, %v8756_v62  ;;  %8416 = vmatpush3.bf16.msra.mxu0 %v8415_v59  ;;  %v7204_v20 = vld [vmem:[%s9994_s10 + $0x60] sm:$0xff] }
0x2451   : > { %8417 = vmatprep.subr.bf16.mxu0 %v8754_v4 }
0x2454   : > { %8419 = vmatpush3.bf16.msra.mxu0 %v8418_v9 }
0x2455   : > { %8427 = vmatprep.subr.bf16.mxu0 %v8426_v58 }
0x2456   : > { %v4438_v24 = vpop.f32.mrb[10].mxu1 }
0x2457   : > { %v4439_v25 = vadd.f32 %v4438_v24, %v4368_v23  ;;  %v7884_v26 = vpop.f32.mrb[11].mxu1  ;;  %v8421_v24 = vpack.c.bf16 %v7205_v21, %v7204_v20 }
0x2458   : > { %v7212_v26 = vld [vmem:[%s9995_s1 + $0x30] sm:$0xff] }
0x2459   : > { %4450 = vrot.lane.b32.xlu1 %v4439_v25, %s10002_s23  ;;  %8422 = vmatpush3.bf16.msra.mxu1 %v8421_v24 }
0x245a   : > { %8423 = vmatprep.subr.bf16.mxu1 %v8754_v4 }
0x24cb   : > { %v4451_v46 = vpop.permute.xlu1 %4450 }
0x2522   : > { %v4356_v31 = vpop.f32.mrb[48].mxu0 }
0x2523   : > { %v4357_v32 = vadd.f32 %v4356_v31, %v4286_v30  ;;  %v7873_v33 = vpop.f32.mrb[49].mxu0  ;;  %v7213_v30 = vld [vmem:[%s9995_s1 + $0x38] sm:$0xff] }
0x2524   : > { %v8430_v31 = vpack.c.bf16 %v7213_v30, %v7212_v26  ;;  %v7206_v33 = vld [vmem:[%s9994_s10 + $0x70] sm:$0xff] }
0x2525   : > { %v4442_v52 = vadd.f32 %v4439_v25, %v4357_v32 }
0x2527   : > { %v7198_v38 = vmul.f32 -1.442695, %v4442_v52  ;;  %v7207_v52 = vld [vmem:[%s9994_s10 + $0x78] sm:$0xff] }
0x2529   : > { %8651 = vpow2.f32 %v7198_v38  ;;  %v8424_v38 = vpack.c.bf16 %v7207_v52, %v7206_v33 }
0x252b   : > { %8425 = vmatpush3.bf16.msra.mxu1 %v8424_v38 }
0x252c   : > { %8434 = vmatprep.subr.bf16.mxu1 %v8754_v4 }
0x2533   : > { %v8652_v41 = vpop.eup %8651 }
0x2534   : > { %v4446_v42 = vadd.f32 1.0, %v8652_v41  ;;  %v7166_v41 = vld [vmem:[%s9996_s28 + $0x2] sm:$0x3] }
0x2536   : > { %8653 = vrcp.f32 %v4446_v42  ;;  %v4681_v42 = vrot.slane %v7166_v41, %v9084_v18 }
0x2540   : > { %v8654_v53 = vpop.eup %8653 }
0x2541   : > { %v4453_v54 = vmul.f32 %v8654_v53, %v4451_v46  ;;  %v4460_v57 = vsub.f32 1.0, %v8654_v53  ;;  %v4518_v46 = vrot.slane %v7166_v41, %v9081_v17 }
0x2543   : > { %4455 = vrot.lane.b32.xlu1 %v4453_v54, %s10002_s23 }
0x25b5   : > { %v4456_v44 = vpop.permute.xlu1 %4455 }
0x25b6   : > { %v4458_v55 = vadd.f32 %v4456_v44, %v4357_v32 }
0x25b8   : > { %8655 = vtanh.f32 %v4458_v55 }
0x25c2   : > { %v8656_v29 = vpop.eup %8655 }
0x25c3   : > { %4462 = vrot.lane.b32.xlu1 %v8656_v29, %s10000_s6 }
0x25c7   : > { %4466 = vrot.lane.b32.xlu1 %v9512_v40, %s9999_s5 }
0x2635   : > { %v4463_v56 = vpop.permute.xlu1 %4462 }
0x2636   : > { %v4465_v50 = vmul.f32 %v4463_v56, %v4460_v57  ;;  %v7216_v57 = vld [vmem:[%s9998_s3 + $0x20] sm:$0xff] }
0x2639   : > { %v4467_v7 = vpop.permute.xlu1 %4466 }
0x263a   : > { %v4469_v51 = vmul.f32 %v8654_v53, %v4467_v7  ;;  %v7217_v7 = vld [vmem:[%s9998_s3 + $0x28] sm:$0xff] }
0x263c   : > { %v9628_v14 = vadd.f32 %v4469_v51, %v4465_v50  ;;  %v7218_v50 = vld [vmem:[%s9998_s3 + $0x30] sm:$0xff]  ;;  %v8435_v51 = vpack.c.bf16 %v7217_v7, %v7216_v57 }
0x263e   : > { %4472 = vrot.lane.b32.xlu1 %v9628_v14, %s10000_s6 }
0x26b0   : > { %v4473_v22 = vpop.permute.xlu1 %4472 }
0x26b1   : > { %v4475_v13 = vsel %vm2342_vm12, %v4473_v22, 0.0  ;;  %v7219_v22 = vld [vmem:[%s9998_s3 + $0x38] sm:$0xff] }
0x26b2   : > { %4476 = vadd.xlane.f32.xlu1 %v4475_v13 }
0x273f   : > { %v4477_v35 = vpop.xlane.xlu1 %4476 }
0x2740   : > { %v4478_v40 = vmul.f32 0.03125, %v4477_v35 }
0x2742   : > { %v4479_v10 = vsub.f32 %v9628_v14, %v4478_v40  ;;  %v8438_v40 = vpack.c.bf16 %v7219_v22, %v7218_v50 }
0x2744   : > { %v4480_v0 = vmul.f32 %v4479_v10, %v4479_v10 }
0x2746   : > { %4482 = vrot.lane.b32.xlu0 %v4480_v0, %s10000_s6 }
0x274a   : > { %4506 = vrot.lane.b32.xlu0 %v4504_v36, %s9999_s5 }
0x27b8   : > { %v4483_v34 = vpop.permute.xlu0 %4482 }
0x27b9   : > { %v4485_v37 = vsel %vm2342_vm12, %v4483_v34, 0.0 }
0x27ba   : > { %4486 = vadd.xlane.f32.xlu1 %v4485_v37 }
0x27bc   : > { %v4507_v19 = vpop.permute.xlu0 %4506 }
0x27cb   : > { %4497 = vrot.lane.b32.xlu1 %v4495_v1, %s9999_s5 }
0x2847   : > { %v4487_v63 = vpop.xlane.xlu1 %4486 }
0x2848   : > { %v4488_v16 = vmul.f32 0.03125, %v4487_v63 }
0x284a   : > { %v4489_v61 = vadd.f32 1e-05, %v4488_v16 }
0x284b   : > { %v4498_v15 = vpop.permute.xlu1 %4497 }
0x284c   : > { %8657 = vrsqrt.f32 %v4489_v61 }
0x2856   : > { %v8658_v12 = vpop.eup %8657 }
0x2857   : > { %v4491_v11 = vmul.f32 %v8658_v12, %v4479_v10  ;;  %v7209_v10 = vld [vmem:[%s9997_s2 + $0x4] sm:$0xf]  ;;  %v9695_v12 = vld [vmem:[%s9989_s16 + $0x8] sm:$0xf] }
0x2859   : > { %v4500_v23 = vmul.f32 %v4498_v15, %v4491_v11  ;;  %v5555_v15 = vsel %vm2342_vm12, %v9695_v12, 0.0 }
0x285b   : > { %v4509_v25 = vadd.f32 %v4507_v19, %v4500_v23 }
0x285d   : > { %4520 = vrot.lane.b32.xlu1 %v4509_v25, %s10000_s6 }
0x2861   : > { %4683 = vrot.lane.b32.xlu1 %v4681_v42, %s9999_s5 }
0x28cf   : > { %v4521_v32 = vpop.permute.xlu1 %4520 }
0x28d0   : > { %7894 = vmatmul.mubr.msk.f32.vlgmr.msra.gmra.mrb[50].mxu0 %vm1123_vm1, %v4521_v32 }
0x28d1   : > { %8429 = vmatpush3.bf16.msra.mxu0 %v8426_v58  ;;  %7915 = vmatprep.mubr.msk.f32.mxu0 %vm1123_vm1, %v9312_v49 }
0x28d2   : > { %8431 = vmatprep.subr.bf16.mxu0 %v8430_v31 }
0x28d3   : > { %v4684_v36 = vpop.permute.xlu1 %4683 }
0x28d5   : > { %8433 = vmatpush3.bf16.msra.mxu0 %v8430_v31 }
0x28d8   : > { %7916 = vmatmul.mubr.msk.f32.vlgmr.msra.gmra.mrb[52].mxu0 %vm1123_vm1, %v9310_v45 }
0x29a3   : > { %v4590_v53 = vpop.f32.mrb[50].mxu0 }
0x29a4   : > { %v4591_v54 = vadd.f32 %v4590_v53, %v4518_v46  ;;  %v7895_v44 = vpop.f32.mrb[51].mxu0 }
0x29a6   : > { %v4594_v55 = vmax.f32 %v4591_v54, 0.0 }
0x29a8   : > { %7905 = vmatmul.mubr.msk.f32.vlgmr.msra.gmra.mrb[12].mxu1 %vm1123_vm1, %v4594_v55 }
0x29a9   : > { %7926 = vmatprep.mubr.msk.f32.mxu1 %vm8755_vm13, %v8756_v62  ;;  %8436 = vmatpush3.bf16.msra.mxu1 %v8435_v51 }
0x29aa   : > { %8437 = vmatprep.subr.bf16.mxu1 %v8754_v4 }
0x29ab   : > { %v7917_v29 = vpop.f32.mrb[52].mxu0 }
0x29ac   : > { %v4765_v56 = vpop.f32.mrb[53].mxu0 }
0x29ad   : > { %7931 = vmatprep.mubr.msk.f32.mxu0 %vm2598_vm15, %v4765_v56  ;;  %8439 = vmatpush3.bf16.msra.mxu1 %v8438_v40 }
0x2a7b   : > { %v4669_v13 = vpop.f32.mrb[12].mxu1 }
0x2a7c   : > { %4674 = vrot.lane.b32.xlu0 %v4669_v13, %s9999_s5  ;;  %v7906_v35 = vpop.f32.mrb[13].mxu1 }
0x2a80   : > { %4690 = vrot.lane.b32.xlu0 %v7209_v10, %s9999_s5 }
0x2aee   : > { %v4675_v0 = vpop.permute.xlu0 %4674 }
0x2aef   : > { %v4677_v34 = vadd.f32 %v4675_v0, %v9628_v14 }
0x2af1   : > { %v4686_v37 = vadd.f32 %v4684_v36, %v4677_v34 }
0x2af2   : > { %v4691_v1 = vpop.permute.xlu0 %4690 }
0x2af3   : > { %v4693_v2 = vadd.f32 %v4691_v1, %v4686_v37 }
0x2af5   : > { %4780 = vrot.lane.b32.xlu1 %v4693_v2, %s10000_s6 }
0x2af9   : > { %5051 = vrot.lane.b32.xlu1 %v4765_v56, %s10003_s8 }
0x2b67   : > { %v4781_v3 = vpop.permute.xlu1 %4780 }
0x2b68   : > { %7927 = vmatmul.mubr.msk.f32.vlgmr.msra.gmra.mrb[14].mxu1 %vm1123_vm1, %v4781_v3 }
0x2b6b   : > { %v5052_v6 = vpop.permute.xlu1 %5051 }
0x2c3b   : > { %v4850_v5 = vpop.f32.mrb[14].mxu1 }
0x2c3c   : > { %5055 = vrot.lane.b32.xlu0 %v4850_v5, %s10003_s8  ;;  %v7928_v59 = vpop.f32.mrb[15].mxu1  ;;  %7929 = vmatprep.subr.msk.mxu0 %vm2598_vm15, %v4850_v5 }
0x2c3d   : > { %7930 = vmatpush3.xpose.msk.msra.mxu0 %vm2598_vm15, %v4850_v5  ;;  %v7248_v59 = vld [vmem:[%s9990_s18 + $0xe8] sm:$0xff] }
0x2c40   : > { %5053 = vrot.lane.b32.xlu0 %v7917_v29, %s10003_s8  ;;  %7932 = vmatmul.mubr.msk.f32.vlgmr.msra.gmra.mrb[54].mxu0 %vm2598_vm15, %v7917_v29 }
0x2c41   : > { %7941 = vmatprep.mubr.msk.f32.mxu0 %vm2598_vm15, %v5052_v6 }
0x2cae   : > { %v5056_v14 = vpop.permute.xlu0 %5055 }
0x2caf   : > { %7939 = vmatprep.subr.msk.mxu0 %vm2598_vm15, %v5056_v14 }
0x2cb0   : > { %7940 = vmatpush3.xpose.msk.msra.mxu0 %vm2598_vm15, %v5056_v14  ;;  %v9719_v14 = vld [vmem:[%s9991_s0 + $0x10] sm:$0x3f]  ;;  %s10005_s0 = smov 16  }
0x2cb2   : > { %v5054_v8 = vpop.permute.xlu0 %5053 }
0x2cb3   : > { %7942 = vmatmul.mubr.msk.f32.vlgmr.msra.gmra.mrb[56].mxu0 %vm2598_vm15, %v5054_v8 }
0x2d13   : > { %v7933_v60 = vpop.f32.mrb[54].mxu0 }
0x2d14   : > { %v4939_v9 = vmul.f32 0.25, %v7933_v60  ;;  %v4929_v58 = vpop.f32.mrb[55].mxu0 }
0x2d15   : > { %v4938_v63 = vmul.f32 0.25, %v4929_v58 }
0x2d16   : > { %v4943_v16 = vsel %vm2529_vm14, %v4939_v9, -inf }
0x2d17   : > { %4944 = vmax.xlane.f32.xlu0 %v4943_v16  ;;  %v4940_v61 = vsel %vm2529_vm14, %v4938_v63, -inf }
0x2d18   : > { %4941 = vmax.xlane.f32.xlu1 %v4940_v61  ;;  %v5386_v61 = vrot.slane %v9719_v14, %v9084_v18 }
0x2d1c   : > { %5556 = vadd.xlane.f32.xlu1 %v5555_v15  ;;  %v7249_v15 = vld [vmem:[%s9990_s18 + $0xf0] sm:$0xff] }
0x2d86   : > { %v7943_v11 = vpop.f32.mrb[56].mxu0 }
0x2d87   : > { %v5129_v19 = vpop.f32.mrb[57].mxu0  ;;  %v5139_v21 = vmul.f32 0.25, %v7943_v11  ;;  %v7250_v11 = vld [vmem:[%s9990_s18 + $0xf8] sm:$0xff] }
0x2d88   : > { %v5138_v20 = vmul.f32 0.25, %v5129_v19 }
0x2d89   : > { %v5143_v24 = vsel %vm2529_vm14, %v5139_v21, -inf }
0x2d8a   : > { %v5140_v23 = vsel %vm2529_vm14, %v5138_v20, -inf }
0x2d8b   : > { %5141 = vmax.xlane.f32.xlu0 %v5140_v23 }
0x2d8f   : > { %5144 = vmax.xlane.f32.xlu0 %v5143_v24 }
0x2da4   : > { %v4945_v25 = vpop.xlane.xlu0 %4944 }
0x2da5   : > { %v4947_v26 = vsub.f32 %v4939_v9, %v4945_v25  ;;  %v4942_v30 = vpop.xlane.xlu1 %4941  ;;  %v5380_v9 = vrot.slane %v9719_v14, %v9081_v17  ;;  %v8452_v25 = vpack.c.bf16 %v7250_v11, %v7249_v15 }
0x2da6   : > { %v4946_v31 = vsub.f32 %v4938_v63, %v4942_v30 }
0x2da7   : > { %v4950_v32 = vmul.f32 1.442695, %v4947_v26  ;;  %v5381_v16 = vmul.f32 %v5380_v9, %v9349_v28 }
0x2da8   : > { %v4948_v33 = vmul.f32 1.442695, %v4946_v31 }
0x2da9   : > { %8659 = vpow2.f32 %v4950_v32  ;;  %v5557_v35 = vpop.xlane.xlu1 %5556  ;;  %v9732_v26 = vadd.f32 %v5386_v61, %v5381_v16  ;;  %v5382_v32 = vmul.f32 %v5380_v9, %v9347_v27  ;;  %v7256_v9 = vld [vmem:[%s9990_s18 + $0x118] sm:$0xff] }
0x2daa   : > { %8661 = vpow2.f32 %v4948_v33  ;;  %v5558_v40 = vmul.f32 0.03125, %v5557_v35  ;;  %v7259_v33 = vld [vmem:[%s9990_s18 + $0xc0] sm:$0xff]  ;;  %v7236_v35 = vld [vmem:[%s8908_s27 + $0x38] sm:$0xff] }
0x2dac   : > { %v9709_v10 = vsub.f32 %v9695_v12, %v5558_v40 }
0x2dae   : > { %v5560_v0 = vmul.f32 %v9709_v10, %v9709_v10 }
0x2db0   : > { %v5561_v36 = vsel %vm2342_vm12, %v5560_v0, 0.0 }
0x2db3   : > { %v8660_v52 = vpop.eup %8659 }
0x2db4   : > { %v8662_v38 = vpop.eup %8661  ;;  %v4955_v41 = vsel %vm2529_vm14, %v8660_v52, 0.0 }
0x2db5   : > { %4956 = vadd.xlane.f32.xlu1 %v4955_v41  ;;  %v4952_v42 = vsel %vm2529_vm14, %v8662_v38, 0.0  ;;  %v5388_v41 = vadd.f32 %v5386_v61, %v5382_v32  ;;  %v7238_v61 = vld [vmem:[%s8913_s4 + $0x1] ss:$0 sm:$0xff] }
0x2db6   : > { %4953 = vadd.xlane.f32.xlu0 %v4952_v42  ;;  %v7261_v42 = vld [vmem:[%s9990_s18 + $0xd0] sm:$0xff] }
0x2e18   : > { %v5142_v46 = vpop.xlane.xlu0 %5141 }
0x2e19   : > { %v5146_v53 = vsub.f32 %v5138_v20, %v5142_v46  ;;  %v7262_v46 = vld [vmem:[%s9990_s18 + $0xd8] sm:$0xff] }
0x2e1b   : > { %v5148_v54 = vmul.f32 1.442695, %v5146_v53  ;;  %v8468_v53 = vpack.c.bf16 %v7262_v46, %v7261_v42 }
0x2e1c   : > { %v5145_v44 = vpop.xlane.xlu0 %5144 }
0x2e1d   : > { %8663 = vpow2.f32 %v5148_v54  ;;  %v5147_v55 = vsub.f32 %v5139_v21, %v5145_v44 }
0x2e1f   : > { %v5150_v29 = vmul.f32 1.442695, %v5147_v55  ;;  %v5571_v55 = vrot.slane %v9719_v14, %v9205_v48  ;;  %v7235_v48 = vld [vmem:[%s8908_s27 + $0x30] sm:$0xff] }
0x2e20   : > { %v8444_v40 = vpack.c.bf16 %v7236_v35, %v7235_v48 }
0x2e21   : > { %8665 = vpow2.f32 %v5150_v29 }
0x2e27   : > { %v8664_v56 = vpop.eup %8663 }
0x2e28   : > { %v5152_v57 = vsel %vm2529_vm14, %v8664_v56, 0.0 }
0x2e29   : > { %5153 = vadd.xlane.f32.xlu0 %v5152_v57  ;;  %v5576_v57 = vrot.slane %v9719_v14, %v9202_v47  ;;  %v7253_v47 = vld [vmem:[%s9990_s18 + $0x100] sm:$0xff] }
0x2e2b   : > { %v8666_v7 = vpop.eup %8665 }
0x2e2c   : > { %v5155_v50 = vsel %vm2529_vm14, %v8666_v7, 0.0 }
0x2e2d   : > { %5156 = vadd.xlane.f32.xlu1 %v5155_v50 }
0x2e3e   : > { %5166 = vrot.lane.b32.xlu1 %v4850_v5, %s10004_s12 }
0x2e3f   : > { %4966 = vrot.lane.b32.xlu0 %v4850_v5, %s10000_s6  ;;  %v7247_v5 = vld [vmem:[%s9990_s18 + $0xe0] sm:$0xff] }
0x2e40   : > { %v8448_v8 = vpack.c.bf16 %v7248_v59, %v7247_v5 }
0x2e42   : > { %v4957_v34 = vpop.xlane.xlu1 %4956 }
0x2e43   : > { %v4954_v51 = vpop.xlane.xlu0 %4953 }
0x2e44   : > { %8667 = vrcp.f32 %v4954_v51  ;;  %v7233_v51 = vld [vmem:[%s8908_s27 + $0x20] sm:$0xff] }
0x2e45   : > { %8669 = vrcp.f32 %v4957_v34 }
0x2e4e   : > { %v8668_v22 = vpop.eup %8667 }
0x2e4f   : > { %v4959_v13 = vmul.f32 %v8668_v22, %v8662_v38  ;;  %v8670_v1 = vpop.eup %8669  ;;  %v7234_v22 = vld [vmem:[%s8908_s27 + $0x28] sm:$0xff] }
0x2e50   : > { %v4961_v6 = vmul.f32 %v8670_v1, %v8660_v52  ;;  %v7260_v52 = vld [vmem:[%s9990_s18 + $0xc8] sm:$0xff] }
0x2e51   : > { %7936 = vmatprep.mubr.msk.f32.mxu1 %vm2529_vm14, %v4959_v13  ;;  %v4962_v19 = vmul.f32 0.5, %v4959_v13  ;;  %v8465_v38 = vpack.c.bf16 %v7260_v52, %v7259_v33  ;;  %v8440_v13 = vpack.c.bf16 %v7234_v22, %v7233_v51 }
0x2e52   : > { %v4963_v30 = vmul.f32 0.5, %v4961_v6 }
0x2e53   : > { %8441 = vmatprep.subr.bf16.mxu0 %v8440_v13 }
0x2e54   : > { %8443 = vmatpush3.bf16.msra.mxu0 %v8440_v13 }
0x2e55   : > { %8445 = vmatprep.subr.bf16.mxu0 %v8444_v40 }
0x2e58   : > { %8447 = vmatpush3.bf16.msra.mxu0 %v8444_v40 }
0x2e62   : > { %5562 = vadd.xlane.f32.xlu1 %v5561_v36  ;;  %v7254_v36 = vld [vmem:[%s9990_s18 + $0x108] sm:$0xff] }
0x2e63   : > { %v8456_v34 = vpack.c.bf16 %v7254_v36, %v7253_v47 }
0x2e65   : > { %8457 = vmatprep.subr.bf16.mxu0 %v8456_v34 }
0x2eb6   : > { %v5154_v37 = vpop.xlane.xlu0 %5153 }
0x2eb7   : > { %8671 = vrcp.f32 %v5154_v37 }
0x2eba   : > { %v4967_v2 = vpop.permute.xlu0 %4966  ;;  %v5157_v3 = vpop.xlane.xlu1 %5156 }
0x2ebb   : > { %8673 = vrcp.f32 %v5157_v3  ;;  %7934 = vmatprep.subr.msk.mxu1 %vm1467_vm4, %v4967_v2 }
0x2ebc   : > { %7935 = vmatpush3.msk.msra.mxu1 %vm1467_vm4, %v4967_v2 }
0x2ebd   : > { %7937 = vmatmul.mubr.msk.f32.vlgmr.msra.gmra.mrb[16].mxu1 %vm2529_vm14, %v4961_v6 }
0x2ebe   : > { %v5167_v60 = vpop.permute.xlu1 %5166 }
0x2ebf   : > { %7944 = vmatprep.subr.msk.mxu1 %vm1467_vm4, %v5167_v60 }
0x2ec0   : > { %7945 = vmatpush3.msk.msra.mxu1 %vm1467_vm4, %v5167_v60  ;;  %v7255_v60 = vld [vmem:[%s9990_s18 + $0x110] sm:$0xff] }
0x2ec1   : > { %v8672_v58 = vpop.eup %8671  ;;  %8449 = vmatprep.subr.bf16.mxu1 %v8448_v8 }
0x2ec2   : > { %v5159_v63 = vmul.f32 %v8672_v58, %v8664_v56 }
0x2ec4   : > { %v5162_v20 = vmul.f32 0.5, %v5159_v63  ;;  %7946 = vmatprep.mubr.msk.f32.mxu1 %vm2529_vm14, %v5159_v63  ;;  %v8460_v63 = vpack.c.bf16 %v7256_v9, %v7255_v60 }
0x2ec5   : > { %v8674_v21 = vpop.eup %8673 }
0x2ec6   : > { %v5161_v23 = vmul.f32 %v8674_v21, %v8666_v7  ;;  %v5164_v24 = vadd.f32 %v5162_v20, %v4962_v19 }
0x2ec8   : > { %v5163_v28 = vmul.f32 0.5, %v5161_v23  ;;  %7241 = vst.msk [vmem:[%s9521_s9 + $0x10] sm:$0xff] %vm2529_vm14, %v5164_v24  ;;  %7947 = vmatmul.mubr.msk.f32.vlgmr.msra.gmra.mrb[18].mxu1 %vm2529_vm14, %v5161_v23 }
0x2ec9   : > { %8451 = vmatpush3.bf16.msra.mxu1 %v8448_v8  ;;  %7968 = vmatprep.mubr.msk.f32.mxu1 %vm1123_vm1, %v9732_v26 }
0x2eca   : > { %v5165_v31 = vadd.f32 %v5163_v28, %v4963_v30  ;;  %8453 = vmatprep.subr.bf16.mxu1 %v8452_v25 }
0x2ecc   : > { %7242 = vst.msk [vmem:[%s9521_s9 + $0x18] sm:$0xff] %vm2529_vm14, %v5165_v31 }
0x2ecd   : > { %8455 = vmatpush3.bf16.msra.mxu1 %v8452_v25 }
0x2ece   : > { %8464 = vmatprep.subr.bf16.mxu1 %v8754_v4 }
0x2ed0   : > { %7969 = vmatmul.mubr.msk.f32.vlgmr.msra.gmra.mrb[20].mxu1 %vm1123_vm1, %v5388_v41 }
0x2ed1   : > { %8466 = vmatpush3.bf16.msra.mxu1 %v8465_v38  ;;  %7990 = vmatprep.mubr.msk.f32.mxu1 %vm8755_vm13, %v8756_v62 }
0x2ed2   : > { %8467 = vmatprep.subr.bf16.mxu1 %v8754_v4 }
0x2ed5   : > { %8469 = vmatpush3.bf16.msra.mxu1 %v8468_v53 }
0x2ed6   : > { %8470 = vmatprep.subr.bf16.mxu1 %v8754_v4 }
0x2eef   : > { %v5563_v27 = vpop.xlane.xlu1 %5562 }
0x2ef0   : > { %v5564_v54 = vmul.f32 0.03125, %v5563_v27 }
0x2ef2   : > { %v5565_v44 = vadd.f32 1e-05, %v5564_v54 }
0x2ef4   : > { %8675 = vrsqrt.f32 %v5565_v44 }
0x2efe   : > { %v8676_v29 = vpop.eup %8675 }
0x2eff   : > { %v5567_v56 = vmul.f32 %v8676_v29, %v9709_v10 }
0x2f01   : > { %v5572_v7 = vmul.f32 %v5571_v55, %v5567_v56 }
0x2f03   : > { %v5577_v50 = vadd.f32 %v5576_v57, %v5572_v7 }
0x2f05   : > { %7991 = vmatmul.mubr.msk.f32.vlgmr.msra.gmra.mrb[22].mxu1 %vm1123_vm1, %v5577_v50 }
0x2f06   : > { %8002 = vmatprep.mubr.msk.f32.mxu1 %vm8755_vm13, %v8756_v62 }
0x2f90   : > { %v7938_v10 = vpop.f32.mrb[16].mxu1 }
0x2f91   : > { %v5042_v0 = vpop.f32.mrb[17].mxu1 }
0x2f9b   : > { %v7948_v37 = vpop.f32.mrb[18].mxu1 }
0x2f9c   : > { %v5242_v1 = vpop.f32.mrb[19].mxu1 }
0x2f9d   : > { %5253 = vrot.lane.b32.xlu0 %v5242_v1, %s10005_s0 }
0x2fa1   : > { %5255 = vrot.lane.b32.xlu0 %v7948_v37, %s10005_s0 }
0x2fa3   : > { %v7970_v2 = vpop.f32.mrb[20].mxu1 }
0x2fa4   : > { %v5466_v3 = vpop.f32.mrb[21].mxu1 }
0x2fd8   : > { %v5652_v5 = vpop.f32.mrb[22].mxu1 }
0x2fd9   : > { %v7992_v59 = vpop.f32.mrb[23].mxu1 }
0x300f   : > { %v5254_v6 = vpop.permute.xlu0 %5253 }
0x3010   : > { %v5259_v8 = vsel %vm2598_vm15, %v5042_v0, %v5254_v6 }
0x3011   : > { %7957 = vmatprep.mubr.msk.f32.mxu0 %vm1123_vm1, %v5259_v8 }
0x3013   : > { %v5256_v58 = vpop.permute.xlu0 %5255 }
0x3014   : > { %v5260_v16 = vsel %vm2598_vm15, %v7938_v10, %v5256_v58 }
0x3015   : > { %7958 = vmatmul.mubr.msk.f32.vlgmr.msra.gmra.mrb[58].mxu0 %vm1123_vm1, %v5260_v16 }
0x3016   : > { %8459 = vmatpush3.bf16.msra.mxu0 %v8456_v34  ;;  %7979 = vmatprep.mubr.msk.f32.mxu0 %vm1123_vm1, %v9732_v26 }
0x3017   : > { %8461 = vmatprep.subr.bf16.mxu0 %v8460_v63 }
0x301a   : > { %8463 = vmatpush3.bf16.msra.mxu0 %v8460_v63 }
0x301b   : > { %7993 = vmatprep.subr.msk.mxu0 %vm1123_vm1, %v5652_v5 }
0x301d   : > { %7980 = vmatmul.mubr.msk.f32.vlgmr.msra.gmra.mrb[60].mxu0 %vm1123_vm1, %v5388_v41 }
0x301e   : > { %7995 = vmatprep.mubr.msk.f32.mxu0 %vm1123_vm1, %v5466_v3 }
0x3023   : > { %7994 = vmatpush3.xpose.msk.msra.mxu0 %vm1123_vm1, %v5652_v5 }
0x3024   : > { %8473 = vmatprep.subr.bf16.mxu0 %v8754_v4 }
0x3026   : > { %7996 = vmatmul.mubr.msk.f32.vlgmr.msra.gmra.mrb[62].mxu0 %vm1123_vm1, %v7970_v2 }
0x3027   : > { %8013 = vmatprep.mubr.msk.f32.mxu0 %vm8755_vm13, %v8756_v62 }
0x30e8   : > { %v7959_v15 = vpop.f32.mrb[58].mxu0 }
0x30e9   : > { %v5352_v11 = vadd.f32 %v7959_v15, %v7238_v61  ;;  %v5346_v19 = vpop.f32.mrb[59].mxu0  ;;  %v7269_v15 = vld [vmem:[%s9992_s26 + $0x88] sm:$0xff] }
0x30ea   : > { %v5347_v20 = vadd.f32 %v7238_v61, %v5346_v19  ;;  %v7268_v61 = vld [vmem:[%s9992_s26 + $0x80] sm:$0xff] }
0x30eb   : > { %v5356_v21 = vsel %vm3748_vm0, %v5352_v11, 0.0  ;;  %v7270_v11 = vld [vmem:[%s9992_s26 + $0x90] sm:$0xff]  ;;  %v8474_v19 = vpack.c.bf16 %v7269_v15, %v7268_v61  ;;  %v7290_v61 = vld [vmem:[%s9995_s1 + $0x40] sm:$0xff]  ;;  %v7291_v15 = vld [vmem:[%s9995_s1 + $0x48] sm:$0xff] }
0x30ec   : > { %v5355_v23 = vsel %vm3748_vm0, %v5347_v20, 0.0  ;;  %v7271_v20 = vld [vmem:[%s9992_s26 + $0x98] sm:$0xff] }
0x30ed   : > { %v5357_v24 = vadd.f32 %v5356_v21, %v5355_v23  ;;  %8475 = vmatpush3.bf16.msra.mxu0 %v8474_v19  ;;  %v8477_v21 = vpack.c.bf16 %v7271_v20, %v7270_v11  ;;  %v7273_v23 = vld [vmem:[%s9992_s26 + $0xa0] sm:$0xff]  ;;  %v8497_v11 = vpack.c.bf16 %v7291_v15, %v7290_v61 }
0x30ee   : > { %8476 = vmatprep.subr.bf16.mxu0 %v8754_v4 }
0x30ef   : > { %v5358_v25 = vrot.slane %v5357_v24, 4 }
0x30f0   : > { %v7981_v26 = vpop.f32.mrb[60].mxu0 }
0x30f1   : > { %v5359_v30 = vadd.f32 %v5358_v25, %v5357_v24  ;;  %v5546_v28 = vpop.f32.mrb[61].mxu0  ;;  %8478 = vmatpush3.bf16.msra.mxu0 %v8477_v21  ;;  %v7274_v24 = vld [vmem:[%s9992_s26 + $0xa8] sm:$0xff] }
0x30f2   : > { %v8471_v31 = vpack.c.bf16 %v7981_v26, %v5546_v28  ;;  %8485 = vmatprep.subr.bf16.mxu0 %v8754_v4  ;;  %v8480_v25 = vpack.c.bf16 %v7274_v24, %v7273_v23  ;;  %v7275_v26 = vld [vmem:[%s9992_s26 + $0xb0] sm:$0xff] }
0x30f3   : > { %v5360_v32 = vrot.slane %v5359_v30, 2 }
0x30f4   : > { %8472 = vmatpush3.bf16.msra.mxu1 %v8471_v31 }
0x30f5   : > { %v5361_v33 = vadd.f32 %v5360_v32, %v5359_v30  ;;  %8479 = vmatprep.subr.bf16.mxu1 %v8754_v4  ;;  %v7276_v30 = vld [vmem:[%s9992_s26 + $0xb8] sm:$0xff] }
0x30f6   : > { %v8483_v31 = vpack.c.bf16 %v7276_v30, %v7275_v26  ;;  %v7285_v26 = vld [vmem:[%s9994_s10 + $0xa8] sm:$0xff] }
0x30f7   : > { %v5362_v52 = vrot.slane %v5361_v33, 1 }
0x30f9   : > { %v5363_v38 = vadd.f32 %v5362_v52, %v5361_v33  ;;  %v7997_v41 = vpop.f32.mrb[62].mxu0  ;;  %v7245_v52 = vld [vmem:[%s9993_s7 + $0x4] sm:$0x3] }
0x30fa   : > { %v5741_v42 = vmul.f32 0.17677669, %v7997_v41  ;;  %v5731_v46 = vpop.f32.mrb[63].mxu0 }
0x30fb   : > { %v5364_v53 = vmul.f32 0.0625, %v5363_v38  ;;  %v5740_v27 = vmul.f32 0.17677669, %v5731_v46  ;;  %v5973_v38 = vrot.slane %v7245_v52, %v9084_v18 }
0x30fc   : > { %v5745_v54 = vsel %vm2529_vm14, %v5741_v42, -inf }
0x30fd   : > { %5365 = vst.msk [vmem:[%s9587_s11 + $0x1] sm:$0x1] %vm3760_vm2, %v5364_v53  ;;  %5746 = vmax.xlane.f32.xlu1 %v5745_v54  ;;  %v5742_v44 = vsel %vm2529_vm14, %v5740_v27, -inf  ;;  %v5891_v53 = vrot.slane %v7245_v52, %v9081_v17 }
0x30fe   : > { %5743 = vmax.xlane.f32.xlu0 %v5742_v44 }
0x318a   : > { %v5747_v55 = vpop.xlane.xlu1 %5746 }
0x318b   : > { %v5749_v29 = vsub.f32 %v5741_v42, %v5747_v55  ;;  %v5744_v56 = vpop.xlane.xlu0 %5743 }
0x318c   : > { %v5748_v57 = vsub.f32 %v5740_v27, %v5744_v56 }
0x318d   : > { %v5752_v7 = vmul.f32 1.442695, %v5749_v29 }
0x318e   : > { %v5750_v50 = vmul.f32 1.442695, %v5748_v57 }
0x318f   : > { %8677 = vpow2.f32 %v5752_v7 }
0x3190   : > { %8679 = vpow2.f32 %v5750_v50 }
0x3199   : > { %v8678_v51 = vpop.eup %8677 }
0x319a   : > { %v8680_v22 = vpop.eup %8679  ;;  %v5757_v13 = vsel %vm2529_vm14, %v8678_v51, 0.0 }
0x319b   : > { %5758 = vadd.xlane.f32.xlu0 %v5757_v13  ;;  %v5754_v48 = vsel %vm2529_vm14, %v8680_v22, 0.0 }
0x319c   : > { %5755 = vadd.xlane.f32.xlu1 %v5754_v48 }
0x3228   : > { %v5759_v35 = vpop.xlane.xlu0 %5758 }
0x3229   : > { %8681 = vrcp.f32 %v5759_v35  ;;  %v5756_v40 = vpop.xlane.xlu1 %5755 }
0x322a   : > { %8683 = vrcp.f32 %v5756_v40 }
0x3233   : > { %v8682_v10 = vpop.eup %8681 }
0x3234   : > { %v8684_v0 = vpop.eup %8683  ;;  %v5763_v47 = vmul.f32 %v8682_v10, %v8678_v51 }
0x3235   : > { %v5761_v36 = vmul.f32 %v8684_v0, %v8680_v22 }
0x3236   : > { %v5765_v34 = vadd.f32 1e-08, %v5763_v47 }
0x3237   : > { %v5764_v37 = vadd.f32 1e-08, %v5761_v36 }
0x3238   : > { %v5767_v1 = vsel %vm2529_vm14, %v5765_v34, 0.0 }
0x3239   : > { %v5766_v2 = vsel %vm2529_vm14, %v5764_v37, 0.0 }
0x323a   : > { %v5768_v3 = vadd.f32 %v5767_v1, %v5766_v2 }
0x323c   : > { %v5769_v5 = vrot.slane %v5768_v3, 4 }
0x323e   : > { %v5770_v59 = vadd.f32 %v5769_v5, %v5768_v3  ;;  %v6109_v5 = vrot.slane %v9719_v14, %v9427_v39 }
0x3240   : > { %v5771_v6 = vrot.slane %v5770_v59, 2 }
0x3242   : > { %v5772_v8 = vadd.f32 %v5771_v6, %v5770_v59 }
0x3244   : > { %v5773_v60 = vrot.slane %v5772_v8, 1 }
0x3246   : > { %v5774_v9 = vadd.f32 %v5773_v60, %v5772_v8  ;;  %v6100_v8 = vrot.slane %v9719_v14, %v9434_v43  ;;  %v7279_v60 = vld [vmem:[%s9994_s10 + $0x80] sm:$0xff] }
0x3248   : > { %8685 = vrcp.f32 %v5774_v9  ;;  %v7280_v9 = vld [vmem:[%s9994_s10 + $0x88] sm:$0xff] }
0x3252   : > { %v8686_v58 = vpop.eup %8685 }
0x3253   : > { %v5776_v63 = vmul.f32 %v8686_v58, %v5764_v37  ;;  %v5777_v16 = vmul.f32 %v8686_v58, %v5765_v34  ;;  %v7281_v58 = vld [vmem:[%s9994_s10 + $0x90] sm:$0xff] }
0x3255   : > { %5778 = vxpose.xlu1.b32.start [1/2] (short) (narrow) %v5776_v63, 8  ;;  %v8486_v63 = vpack.c.bf16 %v7280_v9, %v7279_v60 }
0x3259   : > { %5779 = vxpose.xlu1.b32.end [2/2] (short) (narrow) %v5777_v16, 8  ;;  %v7282_v16 = vld [vmem:[%s9994_s10 + $0x98] sm:$0xff] }
0x325a   : > { %v8489_v39 = vpack.c.bf16 %v7282_v16, %v7281_v58 }
0x32d5   : > { %v5794_v28 = vpop.trf.xlu1 }
0x32d6   : > { %8003 = vmatmul.mubr.msk.f32.vlgmr.msra.gmra.mrb[24].mxu1 %vm2598_vm15, %v5794_v28 }
0x32d7   : > { %8481 = vmatpush3.bf16.msra.mxu1 %v8480_v25  ;;  %8024 = vmatprep.mubr.msk.f32.mxu1 %vm8755_vm13, %v8756_v62  ;;  %v7284_v25 = vld [vmem:[%s9994_s10 + $0xa0] sm:$0xff] }
0x32d8   : > { %8482 = vmatprep.subr.bf16.mxu1 %v8754_v4  ;;  %v8492_v28 = vpack.c.bf16 %v7285_v26, %v7284_v25 }
0x32db   : > { %8484 = vmatpush3.bf16.msra.mxu1 %v8483_v31 }
0x32dc   : > { %8491 = vmatprep.subr.bf16.mxu1 %v8754_v4 }
0x32de   : > { %8025 = vmatmul.mubr.msk.f32.vlgmr.msra.gmra.mrb[26].mxu1 %vm1123_vm1, %v9695_v12 }
0x32df   : > { %8046 = vmatprep.mubr.msk.f32.mxu1 %vm8755_vm13, %v8756_v62  ;;  %8493 = vmatpush3.bf16.msra.mxu1 %v8492_v28 }
0x32e0   : > { %8494 = vmatprep.subr.bf16.mxu1 %v8754_v4 }
0x33a9   : > { %v5879_v32 = vpop.f32.mrb[24].mxu1 }
0x33aa   : > { %8014 = vmatmul.mubr.msk.f32.vlgmr.msra.gmra.mrb[64].mxu0 %vm1123_vm1, %v5879_v32  ;;  %v8004_v33 = vpop.f32.mrb[25].mxu1  ;;  %v7292_v32 = vld [vmem:[%s9995_s1 + $0x50] sm:$0xff] }
0x33ab   : > { %8035 = vmatprep.mubr.msk.f32.mxu0 %vm8755_vm13, %v8756_v62  ;;  %8487 = vmatpush3.bf16.msra.mxu0 %v8486_v63  ;;  %v7293_v33 = vld [vmem:[%s9995_s1 + $0x58] sm:$0xff] }
0x33ac   : > { %8488 = vmatprep.subr.bf16.mxu0 %v8754_v4  ;;  %v8501_v52 = vpack.c.bf16 %v7293_v33, %v7292_v32 }
0x33af   : > { %8490 = vmatpush3.bf16.msra.mxu0 %v8489_v39 }
0x33b0   : > { %8498 = vmatprep.subr.bf16.mxu0 %v8497_v11 }
0x33b1   : > { %v6043_v41 = vpop.f32.mrb[26].mxu1 }
0x33b2   : > { %v6044_v42 = vadd.f32 %v6043_v41, %v5973_v38  ;;  %v8026_v46 = vpop.f32.mrb[27].mxu1  ;;  %v7286_v41 = vld [vmem:[%s9994_s10 + $0xb0] sm:$0xff] }
0x33b4   : > { %6055 = vrot.lane.b32.xlu0 %v6044_v42, %s10002_s23 }
0x3426   : > { %v6056_v7 = vpop.permute.xlu0 %6055 }
0x347d   : > { %v5961_v27 = vpop.f32.mrb[64].mxu0 }
0x347e   : > { %v5962_v54 = vadd.f32 %v5961_v27, %v5891_v53  ;;  %v8015_v44 = vpop.f32.mrb[65].mxu0  ;;  %v7246_v53 = vld [vmem:[%s9996_s28 + $0x4] sm:$0x3] }
0x347f   : > { %v6123_v27 = vrot.slane %v7246_v53, %v9081_v17  ;;  %v7297_v17 = vld [vmem:[%s9998_s3 + $0x48] sm:$0xff] }
0x3480   : > { %v6047_v55 = vadd.f32 %v6044_v42, %v5962_v54  ;;  %v7287_v42 = vld [vmem:[%s9994_s10 + $0xb8] sm:$0xff] }
0x3481   : > { %v8495_v46 = vpack.c.bf16 %v7287_v42, %v7286_v41 }
0x3482   : > { %v7278_v29 = vmul.f32 -1.442695, %v6047_v55 }
0x3483   : > { %8496 = vmatpush3.bf16.msra.mxu1 %v8495_v46 }
0x3484   : > { %8687 = vpow2.f32 %v7278_v29  ;;  %8505 = vmatprep.subr.bf16.mxu1 %v8754_v4 }
0x348e   : > { %v8688_v56 = vpop.eup %8687 }
0x348f   : > { %v6051_v57 = vadd.f32 1.0, %v8688_v56  ;;  %v7289_v56 = vld [vmem:[%s9997_s2 + $0x8] sm:$0xf] }
0x3491   : > { %8689 = vrcp.f32 %v6051_v57 }
0x349b   : > { %v8690_v50 = vpop.eup %8689 }
0x349c   : > { %v6058_v51 = vmul.f32 %v8690_v50, %v6056_v7  ;;  %v6065_v40 = vsub.f32 1.0, %v8690_v50  ;;  %v7296_v7 = vld [vmem:[%s9998_s3 + $0x40] sm:$0xff] }
0x349e   : > { %6060 = vrot.lane.b32.xlu0 %v6058_v51, %s10002_s23  ;;  %v6286_v51 = vrot.slane %v7246_v53, %v9084_v18 }
0x3510   : > { %v6061_v22 = vpop.permute.xlu0 %6060 }
0x3511   : > { %v6063_v13 = vadd.f32 %v6061_v22, %v5962_v54 }
0x3513   : > { %8691 = vtanh.f32 %v6063_v13  ;;  %v8506_v13 = vpack.c.bf16 %v7297_v17, %v7296_v7 }
0x351d   : > { %v8692_v48 = vpop.eup %8691 }
0x351e   : > { %6067 = vrot.lane.b32.xlu0 %v8692_v48, %s10000_s6  ;;  %v7299_v48 = vld [vmem:[%s9998_s3 + $0x58] sm:$0xff] }
0x3522   : > { %6071 = vrot.lane.b32.xlu0 %v9695_v12, %s9999_s5 }
0x3590   : > { %v6068_v35 = vpop.permute.xlu0 %6067 }
0x3591   : > { %v6070_v0 = vmul.f32 %v6068_v35, %v6065_v40 }
0x3594   : > { %v6072_v10 = vpop.permute.xlu0 %6071 }
0x3595   : > { %v6074_v47 = vmul.f32 %v8690_v50, %v6072_v10  ;;  %v7298_v50 = vld [vmem:[%s9998_s3 + $0x50] sm:$0xff] }
0x3597   : > { %v9826_v36 = vadd.f32 %v6074_v47, %v6070_v0 }
0x3599   : > { %6077 = vrot.lane.b32.xlu0 %v9826_v36, %s10000_s6 }
0x360b   : > { %v6078_v34 = vpop.permute.xlu0 %6077 }
0x360c   : > { %v6080_v37 = vsel %vm2342_vm12, %v6078_v34, 0.0 }
0x360d   : > { %6081 = vadd.xlane.f32.xlu0 %v6080_v37 }
0x369a   : > { %v6082_v1 = vpop.xlane.xlu0 %6081 }
0x369b   : > { %v6083_v12 = vmul.f32 0.03125, %v6082_v1 }
0x369d   : > { %v6084_v2 = vsub.f32 %v9826_v36, %v6083_v12 }
0x369f   : > { %v6085_v3 = vmul.f32 %v6084_v2, %v6084_v2 }
0x36a1   : > { %6087 = vrot.lane.b32.xlu1 %v6085_v3, %s10000_s6 }
0x36a5   : > { %6111 = vrot.lane.b32.xlu1 %v6109_v5, %s9999_s5 }
0x3713   : > { %v6088_v59 = vpop.permute.xlu1 %6087 }
0x3714   : > { %v6090_v6 = vsel %vm2342_vm12, %v6088_v59, 0.0 }
0x3715   : > { %6091 = vadd.xlane.f32.xlu0 %v6090_v6 }
0x3717   : > { %v6112_v24 = vpop.permute.xlu1 %6111 }
0x372b   : > { %6102 = vrot.lane.b32.xlu0 %v6100_v8, %s9999_s5 }
0x372f   : > { %6295 = vrot.lane.b32.xlu0 %v7289_v56, %s9999_s5 }
0x37a2   : > { %v6092_v19 = vpop.xlane.xlu0 %6091 }
0x37a3   : > { %v6093_v43 = vmul.f32 0.03125, %v6092_v19 }
0x37a5   : > { %v6094_v14 = vadd.f32 1e-05, %v6093_v43 }
0x37a6   : > { %v6103_v21 = vpop.permute.xlu0 %6102 }
0x37a7   : > { %8693 = vrsqrt.f32 %v6094_v14 }
0x37aa   : > { %v6296_v0 = vpop.permute.xlu0 %6295 }
0x37b1   : > { %v8694_v20 = vpop.eup %8693 }
0x37b2   : > { %v6096_v23 = vmul.f32 %v8694_v20, %v6084_v2 }
0x37b4   : > { %v6105_v30 = vmul.f32 %v6103_v21, %v6096_v23 }
0x37b6   : > { %v6114_v31 = vadd.f32 %v6112_v24, %v6105_v30 }
0x37b8   : > { %6125 = vrot.lane.b32.xlu1 %v6114_v31, %s10000_s6 }
0x382a   : > { %v6126_v38 = vpop.permute.xlu1 %6125 }
0x382b   : > { %8036 = vmatmul.mubr.msk.f32.vlgmr.msra.gmra.mrb[66].mxu0 %vm1123_vm1, %v6126_v38 }
0x382c   : > { %8500 = vmatpush3.bf16.msra.mxu0 %v8497_v11  ;;  %8057 = vmatprep.mubr.msk.f32.mxu0 %vm1123_vm1, %v9312_v49 }
0x382d   : > { %8502 = vmatprep.subr.bf16.mxu0 %v8501_v52 }
0x3830   : > { %8504 = vmatpush3.bf16.msra.mxu0 %v8501_v52 }
0x3833   : > { %8058 = vmatmul.mubr.msk.f32.vlgmr.msra.gmra.mrb[68].mxu0 %vm1123_vm1, %v9310_v45 }
0x38fe   : > { %v6195_v54 = vpop.f32.mrb[66].mxu0 }
0x38ff   : > { %v6196_v49 = vadd.f32 %v6195_v54, %v6123_v27  ;;  %v8037_v44 = vpop.f32.mrb[67].mxu0 }
0x3901   : > { %v6199_v55 = vmax.f32 %v6196_v49, 0.0 }
0x3903   : > { %8047 = vmatmul.mubr.msk.f32.vlgmr.msra.gmra.mrb[28].mxu1 %vm1123_vm1, %v6199_v55 }
0x3904   : > { %8068 = vmatprep.mubr.msk.f32.mxu1 %vm8755_vm13, %v8756_v62  ;;  %8507 = vmatpush3.bf16.msra.mxu1 %v8506_v13  ;;  %v8509_v62 = vpack.c.bf16 %v7299_v48, %v7298_v50 }
0x3905   : > { %8508 = vmatprep.subr.bf16.mxu1 %v8754_v4 }
0x3906   : > { %v8059_v45 = vpop.f32.mrb[68].mxu0 }
0x3907   : > { %v6370_v29 = vpop.f32.mrb[69].mxu0 }
0x3908   : > { %8073 = vmatprep.mubr.msk.f32.mxu0 %vm2598_vm15, %v6370_v29  ;;  %8510 = vmatpush3.bf16.msra.mxu1 %v8509_v62 }
0x39d6   : > { %v6274_v57 = vpop.f32.mrb[28].mxu1 }
0x39d7   : > { %6279 = vrot.lane.b32.xlu1 %v6274_v57, %s9999_s5  ;;  %v8048_v22 = vpop.f32.mrb[29].mxu1 }
0x39db   : > { %6288 = vrot.lane.b32.xlu1 %v6286_v51, %s9999_s5 }
0x3a49   : > { %v6280_v35 = vpop.permute.xlu1 %6279 }
0x3a4a   : > { %v6282_v40 = vadd.f32 %v6280_v35, %v9826_v36  ;;  %v7313_v35 = vld [vmem:[%s8908_s27 + $0x40] sm:$0xff] }
0x3a4d   : > { %v6289_v10 = vpop.permute.xlu1 %6288 }
0x3a4e   : > { %v6291_v47 = vadd.f32 %v6289_v10, %v6282_v40  ;;  %v7314_v40 = vld [vmem:[%s8908_s27 + $0x48] sm:$0xff]  ;;  %v7315_v10 = vld [vmem:[%s8908_s27 + $0x50] sm:$0xff] }
0x3a50   : > { %v6298_v34 = vadd.f32 %v6296_v0, %v6291_v47  ;;  %v8511_v0 = vpack.c.bf16 %v7314_v40, %v7313_v35  ;;  %v7316_v47 = vld [vmem:[%s8908_s27 + $0x58] sm:$0xff] }
0x3a52   : > { %6385 = vrot.lane.b32.xlu1 %v6298_v34, %s10000_s6  ;;  %v8515_v34 = vpack.c.bf16 %v7316_v47, %v7315_v10 }
0x3a56   : > { %6656 = vrot.lane.b32.xlu1 %v6370_v29, %s10003_s8 }
0x3ac4   : > { %v6386_v18 = vpop.permute.xlu1 %6385 }
0x3ac5   : > { %8069 = vmatmul.mubr.msk.f32.vlgmr.msra.gmra.mrb[30].mxu1 %vm1123_vm1, %v6386_v18 }
0x3ac8   : > { %v6657_v36 = vpop.permute.xlu1 %6656 }
0x3b98   : > { %v6455_v37 = vpop.f32.mrb[30].mxu1 }
0x3b99   : > { %6660 = vrot.lane.b32.xlu0 %v6455_v37, %s10003_s8  ;;  %v8070_v4 = vpop.f32.mrb[31].mxu1  ;;  %8071 = vmatprep.subr.msk.mxu0 %vm2598_vm15, %v6455_v37 }
0x3b9a   : > { %8072 = vmatpush3.xpose.msk.msra.mxu0 %vm2598_vm15, %v6455_v37 }
0x3b9d   : > { %6658 = vrot.lane.b32.xlu0 %v8059_v45, %s10003_s8  ;;  %8074 = vmatmul.mubr.msk.f32.vlgmr.msra.gmra.mrb[70].mxu0 %vm2598_vm15, %v8059_v45 }
0x3b9e   : > { %8083 = vmatprep.mubr.msk.f32.mxu0 %vm2598_vm15, %v6657_v36 }
0x3c0b   : > { %v6661_v1 = vpop.permute.xlu0 %6660 }
0x3c0c   : > { %8081 = vmatprep.subr.msk.mxu0 %vm2598_vm15, %v6661_v1 }
0x3c0d   : > { %8082 = vmatpush3.xpose.msk.msra.mxu0 %vm2598_vm15, %v6661_v1 }
0x3c0e   : > { %8512 = vmatprep.subr.bf16.mxu0 %v8511_v0 }
0x3c0f   : > { %v6659_v12 = vpop.permute.xlu0 %6658 }
0x3c10   : > { %8084 = vmatmul.mubr.msk.f32.vlgmr.msra.gmra.mrb[72].mxu0 %vm2598_vm15, %v6659_v12 }
0x3c11   : > { %8514 = vmatpush3.bf16.msra.mxu0 %v8511_v0 }
0x3c12   : > { %8516 = vmatprep.subr.bf16.mxu0 %v8515_v34 }
0x3c15   : > { %8518 = vmatpush3.bf16.msra.mxu0 %v8515_v34 }
0x3c70   : > { %v8075_v2 = vpop.f32.mrb[70].mxu0 }
0x3c71   : > { %v6544_v3 = vmul.f32 0.25, %v8075_v2  ;;  %v6534_v5 = vpop.f32.mrb[71].mxu0 }
0x3c72   : > { %v6543_v59 = vmul.f32 0.25, %v6534_v5  ;;  %v7318_v5 = vld [vmem:[%s8913_s4 + $0x2] ss:$0 sm:$0xff] }
0x3c73   : > { %v6548_v6 = vsel %vm2529_vm14, %v6544_v3, -inf }
0x3c74   : > { %6549 = vmax.xlane.f32.xlu0 %v6548_v6  ;;  %v6545_v8 = vsel %vm2529_vm14, %v6543_v59, -inf }
0x3c75   : > { %6546 = vmax.xlane.f32.xlu1 %v6545_v8 }
0x3ce3   : > { %v8085_v60 = vpop.f32.mrb[72].mxu0 }
0x3ce4   : > { %v6744_v9 = vmul.f32 0.25, %v8085_v60  ;;  %v6734_v58 = vpop.f32.mrb[73].mxu0 }
0x3ce5   : > { %v6743_v63 = vmul.f32 0.25, %v6734_v58 }
0x3ce6   : > { %v6748_v16 = vsel %vm2529_vm14, %v6744_v9, -inf }
0x3ce7   : > { %6749 = vmax.xlane.f32.xlu1 %v6748_v16  ;;  %v6745_v61 = vsel %vm2529_vm14, %v6743_v63, -inf }
0x3ce8   : > { %6746 = vmax.xlane.f32.xlu0 %v6745_v61 }
0x3d01   : > { %v6550_v15 = vpop.xlane.xlu0 %6549 }
0x3d02   : > { %v6552_v39 = vsub.f32 %v6544_v3, %v6550_v15  ;;  %v6547_v11 = vpop.xlane.xlu1 %6546 }
0x3d03   : > { %v6551_v19 = vsub.f32 %v6543_v59, %v6547_v11 }
0x3d04   : > { %v6555_v43 = vmul.f32 1.442695, %v6552_v39 }
0x3d05   : > { %v6553_v14 = vmul.f32 1.442695, %v6551_v19 }
0x3d06   : > { %8695 = vpow2.f32 %v6555_v43 }
0x3d07   : > { %8697 = vpow2.f32 %v6553_v14 }
0x3d10   : > { %v8696_v20 = vpop.eup %8695 }
0x3d11   : > { %v8698_v21 = vpop.eup %8697  ;;  %v6560_v23 = vsel %vm2529_vm14, %v8696_v20, 0.0 }
0x3d12   : > { %6561 = vadd.xlane.f32.xlu1 %v6560_v23  ;;  %v6557_v24 = vsel %vm2529_vm14, %v8698_v21, 0.0 }
0x3d13   : > { %6558 = vadd.xlane.f32.xlu0 %v6557_v24 }
0x3d74   : > { %v6750_v25 = vpop.xlane.xlu1 %6749 }
0x3d75   : > { %v6752_v26 = vsub.f32 %v6744_v9, %v6750_v25  ;;  %v6747_v30 = vpop.xlane.xlu0 %6746 }
0x3d76   : > { %v6751_v28 = vsub.f32 %v6743_v63, %v6747_v30 }
0x3d77   : > { %v6755_v31 = vmul.f32 1.442695, %v6752_v26 }
0x3d78   : > { %v6753_v32 = vmul.f32 1.442695, %v6751_v28 }
0x3d79   : > { %8699 = vpow2.f32 %v6755_v31 }
0x3d7a   : > { %8701 = vpow2.f32 %v6753_v32 }
0x3d83   : > { %v8700_v33 = vpop.eup %8699 }
0x3d84   : > { %v8702_v52 = vpop.eup %8701  ;;  %v6760_v38 = vsel %vm2529_vm14, %v8700_v33, 0.0 }
0x3d85   : > { %6761 = vadd.xlane.f32.xlu1 %v6760_v38  ;;  %v6757_v41 = vsel %vm2529_vm14, %v8702_v52, 0.0 }
0x3d86   : > { %6758 = vadd.xlane.f32.xlu0 %v6757_v41 }
0x3d96   : > { %6771 = vrot.lane.b32.xlu1 %v6455_v37, %s10004_s12 }
0x3d9c   : > { %6571 = vrot.lane.b32.xlu0 %v6455_v37, %s10000_s6 }
0x3d9f   : > { %v6562_v27 = vpop.xlane.xlu1 %6561 }
0x3da0   : > { %v6559_v42 = vpop.xlane.xlu0 %6558 }
0x3da1   : > { %8703 = vrcp.f32 %v6559_v42 }
0x3da2   : > { %8705 = vrcp.f32 %v6562_v27 }
0x3dab   : > { %v8704_v46 = vpop.eup %8703 }
0x3dac   : > { %v6564_v53 = vmul.f32 %v8704_v46, %v8698_v21  ;;  %v8706_v44 = vpop.eup %8705 }
0x3dad   : > { %v6566_v45 = vmul.f32 %v8706_v44, %v8696_v20 }
0x3dae   : > { %8078 = vmatprep.mubr.msk.f32.mxu1 %vm2529_vm14, %v6564_v53  ;;  %v6567_v22 = vmul.f32 0.5, %v6564_v53 }
0x3daf   : > { %v6568_v50 = vmul.f32 0.5, %v6566_v45 }
0x3e12   : > { %v6762_v54 = vpop.xlane.xlu1 %6761 }
0x3e13   : > { %8707 = vrcp.f32 %v6762_v54  ;;  %v6759_v49 = vpop.xlane.xlu0 %6758 }
0x3e14   : > { %8709 = vrcp.f32 %v6759_v49 }
0x3e16   : > { %v6772_v29 = vpop.permute.xlu1 %6771 }
0x3e17   : > { %v6572_v55 = vpop.permute.xlu0 %6571 }
0x3e18   : > { %8076 = vmatprep.subr.msk.mxu1 %vm1467_vm4, %v6572_v55 }
0x3e19   : > { %8077 = vmatpush3.msk.msra.mxu1 %vm1467_vm4, %v6572_v55 }
0x3e1a   : > { %8079 = vmatmul.mubr.msk.f32.vlgmr.msra.gmra.mrb[32].mxu1 %vm2529_vm14, %v6566_v45  ;;  %8086 = vmatprep.subr.msk.mxu1 %vm1467_vm4, %v6772_v29 }
0x3e1b   : > { %8087 = vmatpush3.msk.msra.mxu1 %vm1467_vm4, %v6772_v29 }
0x3e1d   : > { %v8708_v56 = vpop.eup %8707 }
0x3e1e   : > { %v8710_v57 = vpop.eup %8709  ;;  %v6766_v7 = vmul.f32 %v8708_v56, %v8700_v33 }
0x3e1f   : > { %v6764_v17 = vmul.f32 %v8710_v57, %v8702_v52 }
0x3e20   : > { %v6768_v51 = vmul.f32 0.5, %v6766_v7 }
0x3e21   : > { %v6767_v13 = vmul.f32 0.5, %v6764_v17  ;;  %8088 = vmatprep.mubr.msk.f32.mxu1 %vm2529_vm14, %v6764_v17 }
0x3e22   : > { %v6770_v48 = vadd.f32 %v6768_v51, %v6568_v50  ;;  %8089 = vmatmul.mubr.msk.f32.vlgmr.msra.gmra.mrb[34].mxu1 %vm2529_vm14, %v6766_v7 }
0x3e23   : > { %v6769_v62 = vadd.f32 %v6767_v13, %v6567_v22 }
0x3e24   : > { %7322 = vst.msk [vmem:[%s9521_s9 + $0x28] sm:$0xff] %vm2529_vm14, %v6770_v48 }
0x3e25   : > { %7321 = vst.msk [vmem:[%s9521_s9 + $0x20] sm:$0xff] %vm2529_vm14, %v6769_v62 }
0x3eed   : > { %v8080_v18 = vpop.f32.mrb[32].mxu1 }
0x3eee   : > { %v6647_v37 = vpop.f32.mrb[33].mxu1 }
0x3ef5   : > { %v8090_v4 = vpop.f32.mrb[34].mxu1 }
0x3ef6   : > { %6860 = vrot.lane.b32.xlu0 %v8090_v4, %s10005_s0  ;;  %v6847_v36 = vpop.f32.mrb[35].mxu1 }
0x3ef7   : > { %6858 = vrot.lane.b32.xlu1 %v6847_v36, %s10005_s0 }
0x3f68   : > { %v6861_v1 = vpop.permute.xlu0 %6860 }
0x3f69   : > { %v6859_v12 = vpop.permute.xlu1 %6858  ;;  %v6865_v3 = vsel %vm2598_vm15, %v8080_v18, %v6861_v1 }
0x3f6a   : > { %v6864_v2 = vsel %vm2598_vm15, %v6647_v37, %v6859_v12 }
0x3f6b   : > { %8099 = vmatprep.mubr.msk.f32.mxu0 %vm1123_vm1, %v6864_v2 }
0x3f6c   : > { %8100 = vmatmul.mubr.msk.f32.vlgmr.msra.gmra.mrb[74].mxu0 %vm1123_vm1, %v6865_v3 }
0x403f   : > { %v8101_v59 = vpop.f32.mrb[74].mxu0 }
0x4040   : > { %v6957_v6 = vadd.f32 %v8101_v59, %v7318_v5  ;;  %v6951_v8 = vpop.f32.mrb[75].mxu0 }
0x4041   : > { %v6952_v60 = vadd.f32 %v7318_v5, %v6951_v8 }
0x4042   : > { %v6961_v9 = vsel %vm3748_vm0, %v6957_v6, 0.0 }
0x4043   : > { %v6960_v58 = vsel %vm3748_vm0, %v6952_v60, 0.0 }
0x4044   : > { %v6962_v63 = vadd.f32 %v6961_v9, %v6960_v58 }
0x4046   : > { %v6963_v16 = vrot.slane %v6962_v63, 4 }
0x4048   : > { %v6964_v61 = vadd.f32 %v6963_v16, %v6962_v63 }
0x404a   : > { %v6965_v15 = vrot.slane %v6964_v61, 2 }
0x404c   : > { %v6966_v39 = vadd.f32 %v6965_v15, %v6964_v61 }
0x404e   : > { %v6967_v11 = vrot.slane %v6966_v39, 1 }
0x4050   : > { %v6968_v19 = vadd.f32 %v6967_v11, %v6966_v39 }
0x4052   : > { %v6969_v43 = vmul.f32 0.0625, %v6968_v19 }
0x4054   : > { %6970 = vst.msk [vmem:[%s9587_s11 + $0x2] sm:$0x1] %vm3760_vm2, %v6969_v43 }
0x4055 PF: > { %s74_s22 = sadd.s32 1, %s8717_s22  }
0x4056   : > { %p71_p4 = scmp.ge.s32.totalorder %s74_s22, 4  }
0x4058   :  { %73 = sbr.rel (!%p71_p4) target bundleno = 64 (0x40), region = 251 }

</bundles_post_ra>
